<compile_context>
chip_gen: v6e
topology: v6e:2x2x1
jax: 0.10.0
libtpu: 0.0.40
codegen_flags: <defaults>
</compile_context>

<pallas_src>
import jax
import jax.numpy as jnp
from jax.experimental import pallas as pl
from jax.experimental.pallas import tpu as pltpu

KH = KW = 5
PAD = 2


# ----------------------------------------------------------------------------
# Fused forward kernel
# ----------------------------------------------------------------------------
def make_fused_kernel(TB, H, W, Cin, C1, C2, FC, NOUT_P):
    Ho, Wo = H // 2, W // 2          # spatial after pool1
    Ho2, Wo2 = Ho // 2, Wo // 2      # spatial after pool2
    WC1, WC2 = W * C1, Wo * C2       # lane widths of conv1 / conv2 outputs
    PW1 = (W + 2 * PAD) * Cin        # padded (w, c)-flattened conv1 row width
    PW2 = (Wo + 2 * PAD) * C1        # padded (w, c)-flattened conv2 row width

    def kernel(xp_ref, t1_ref, bc1_ref, p1e_ref, p1o_ref,
               t2_ref, bc2_ref, q2e_ref, q2o_ref,
               wf1_ref, bf1_ref, wf2_ref, bf2_ref,
               o_ref,
               c1_ref, hp1_ref, pad2_ref, c2_ref):
        f32 = jnp.float32

        # ---------- conv1 (5x5, pad 2): 5 lane-dense banded matmuls over kh ---
        for kh in range(KH):
            lhs = xp_ref[:, kh:kh + H, :].reshape(TB * H, PW1)
            y = jnp.dot(lhs, t1_ref[kh],
                        preferred_element_type=f32).reshape(TB, H, WC1)
            if kh == 0:
                c1_ref[...] = y + bc1_ref[...]
            else:
                c1_ref[...] += y
        c1_ref[...] = jnp.maximum(c1_ref[...], 0.0)

        # ---------- pool1 over h: Ho whole-slab (TB, 128-lane) maxima ---------
        for i in range(Ho):
            hp1_ref[:, i, :] = jnp.maximum(c1_ref[:, 2 * i, :],
                                           c1_ref[:, 2 * i + 1, :])

        # ---------- pool1 over w + conv2 w-halo placement (selection matmuls) -
        hm1 = hp1_ref[...].reshape(TB * Ho, WC1)
        interior = jnp.maximum(
            jnp.dot(hm1, p1e_ref[...], preferred_element_type=f32),
            jnp.dot(hm1, p1o_ref[...], preferred_element_type=f32))
        # Only the h-halo rows need zeroing; w-halos are exact zeros from P.
        pad2_ref[:, 0:PAD, :] = jnp.zeros((TB, PAD, PW2), f32)
        pad2_ref[:, PAD + Ho:Ho + 2 * PAD, :] = jnp.zeros((TB, PAD, PW2), f32)
        pad2_ref[:, PAD:PAD + Ho, :] = interior.reshape(TB, Ho, PW2)

        # ---------- conv2 (5x5, pad 2): same banded-matmul scheme -------------
        for kh in range(KH):
            lhs = pad2_ref[:, kh:kh + Ho, :].reshape(TB * Ho, PW2)
            y = jnp.dot(lhs, t2_ref[kh],
                        preferred_element_type=f32).reshape(TB, Ho, WC2)
            if kh == 0:
                c2_ref[...] = y + bc2_ref[...]
            else:
                c2_ref[...] += y
        c2_ref[...] = jnp.maximum(c2_ref[...], 0.0)

        # ---------- pool2 + flatten + fc1 (flatten order folded into slabs) ---
        h1 = jnp.zeros((TB, FC), f32)
        for q in range(Ho2):
            hm = jnp.maximum(c2_ref[:, 2 * q, :], c2_ref[:, 2 * q + 1, :])   # (TB, WC2)
            m2q = jnp.maximum(
                jnp.dot(hm, q2e_ref[...], preferred_element_type=f32),
                jnp.dot(hm, q2o_ref[...], preferred_element_type=f32))       # (TB, Wo2*C2)
            h1 = h1 + jnp.dot(m2q, wf1_ref[q], preferred_element_type=f32)
        h1 = jnp.maximum(h1 + bf1_ref[...], 0.0)

        # TODO(synk): torch.nn.Dropout is identity in eval mode; training-mode
        # stochastic masking (p=0.5) is not implemented here.
        o_ref[...] = (jnp.dot(h1, wf2_ref[...], preferred_element_type=f32)
                      + bf2_ref[...]).astype(o_ref.dtype)

    return kernel


# ----------------------------------------------------------------------------
# Parameter prep (torch layouts -> kernel layouts), traced once in the wrapper
# ----------------------------------------------------------------------------
def _toeplitz(w_oihw, Win):
    """Torch conv weight (Cout, Cin, 5, 5) -> (KH, (Win+4)*Cin, Win*Cout)
    banded matrices: row (p*Cin + ci), col (w*Cout + co) holds
    weight[co, ci, kh, p - w] when 0 <= p - w < 5, else 0."""
    Cout, Cin = int(w_oihw.shape[0]), int(w_oihw.shape[1])
    w_hwio = jnp.transpose(w_oihw, (2, 3, 1, 0)).astype(jnp.float32)  # (KH,KW,Cin,Cout)
    eye = jnp.eye(Win, dtype=jnp.float32)
    rows = []
    for kh in range(KH):
        t = jnp.zeros(((Win + KW - 1) * Cin, Win * Cout), jnp.float32)
        for kw in range(KW):
            s = jnp.zeros((Win + KW - 1, Win), jnp.float32).at[kw:kw + Win, :].set(eye)
            t = t + jnp.kron(s, w_hwio[kh, kw])
        rows.append(t)
    return jnp.stack(rows)            # Win + KW - 1 == Win + 2*PAD


def _pool_select(Win, C, pad_out):
    """Even/odd 0/1 selection matrices for a 2x stride-2 w-pool on a
    (w, c)-flattened lane axis.  Output block w' lands at lane (w'+pad_out)*C,
    so conv-input w-halos come out as exact zeros when pad_out > 0."""
    Wout = Win // 2
    ncol = (Wout + 2 * pad_out) * C
    eye_c = jnp.eye(C, dtype=jnp.float32)
    pe = jnp.zeros((Win * C, ncol), jnp.float32)
    po = jnp.zeros((Win * C, ncol), jnp.float32)
    for wp in range(Wout):
        col = (wp + pad_out) * C
        pe = pe.at[(2 * wp) * C:(2 * wp + 1) * C, col:col + C].set(eye_c)
        po = po.at[(2 * wp + 1) * C:(2 * wp + 2) * C, col:col + C].set(eye_c)
    return pe, po


def prepare_params(params, H, W):
    C1, Cin = int(params["w_conv1"].shape[0]), int(params["w_conv1"].shape[1])
    C2 = int(params["w_conv2"].shape[0])
    FC, FLAT = int(params["w_fc1"].shape[0]), int(params["w_fc1"].shape[1])
    NOUT = int(params["w_fc2"].shape[0])
    Ho, Wo = H // 2, W // 2
    Ho2, Wo2 = Ho // 2, Wo // 2
    assert FLAT == C2 * Ho2 * Wo2

    t1 = _toeplitz(params["w_conv1"], W)                         # (5, (W+4)*Cin, W*C1)
    bc1 = jnp.tile(params["b_conv1"].astype(jnp.float32), W).reshape(1, W * C1)
    p1e, p1o = _pool_select(W, C1, PAD)                          # (W*C1, (Wo+4)*C1)
    t2 = _toeplitz(params["w_conv2"], Wo)                        # (5, (Wo+4)*C1, Wo*C2)
    bc2 = jnp.tile(params["b_conv2"].astype(jnp.float32), Wo).reshape(1, Wo * C2)
    q2e, q2o = _pool_select(Wo, C2, 0)                           # (Wo*C2, Wo2*C2)

    # Fold torch's NCHW flatten order (c, i, j) and the pooled lane layout
    # (j, c) into per-output-row fc1 weight slabs: (Ho2, Wo2*C2, FC).
    wf1 = params["w_fc1"].astype(jnp.float32).T.reshape(C2, Ho2, Wo2, FC)
    wf1s = jnp.transpose(wf1, (1, 2, 0, 3)).reshape(Ho2, Wo2 * C2, FC)
    bf1 = params["b_fc1"].astype(jnp.float32).reshape(1, FC)

    # Pad the logits dimension to a lane-dense multiple of 128.
    NOUT_P = ((NOUT + 127) // 128) * 128
    wf2 = jnp.zeros((FC, NOUT_P), jnp.float32).at[:, :NOUT].set(
        params["w_fc2"].astype(jnp.float32).T)
    bf2 = jnp.zeros((1, NOUT_P), jnp.float32).at[:, :NOUT].set(
        params["b_fc2"].astype(jnp.float32).reshape(1, NOUT))
    return (t1, bc1, p1e, p1o, t2, bc2, q2e, q2o, wf1s, bf1, wf2, bf2), NOUT, NOUT_P


# ----------------------------------------------------------------------------
# Public forward (matches CNN2DTorch.forward, eval mode)
# ----------------------------------------------------------------------------
def cnn2d_forward(x_nchw, params):
    N, Cin, H, W = x_nchw.shape
    assert H % 4 == 0 and W % 4 == 0
    (t1, bc1, p1e, p1o, t2, bc2, q2e, q2o, wf1s, bf1, wf2, bf2), NOUT, NOUT_P = \
        prepare_params(params, H, W)
    C1 = int(params["w_conv1"].shape[0])
    C2 = int(params["w_conv2"].shape[0])
    FC = int(params["w_fc1"].shape[0])
    Ho, Wo = H // 2, W // 2

    # Batch tile: multiples of 8 for large batches (sublane-aligned output
    # blocks, grid >= 2 so two TensorCores can split it); whole batch otherwise.
    if N > 16 and N % 16 == 0:
        TB = 16
    elif N > 8 and N % 8 == 0:
        TB = 8
    else:
        TB = N
    assert N % TB == 0

    # Lane-dense input layout: NCHW -> NHWC -> zero-pad h/w by 2 -> rows with
    # (w, channel) flattened into the lane axis.  One contiguous DMA per tile.
    x = jnp.transpose(x_nchw, (0, 2, 3, 1)).astype(jnp.float32)
    xp = jnp.pad(x, ((0, 0), (PAD, PAD), (PAD, PAD), (0, 0))).reshape(
        N, H + 2 * PAD, (W + 2 * PAD) * Cin)

    kernel = make_fused_kernel(TB, H, W, Cin, C1, C2, FC, NOUT_P)

    def full(shape):
        nd = len(shape)
        return pl.BlockSpec(tuple(shape), lambda n, _nd=nd: (0,) * _nd)

    out = pl.pallas_call(
        kernel,
        out_shape=jax.ShapeDtypeStruct((N, NOUT_P), jnp.float32),
        grid=(N // TB,),
        in_specs=[
            pl.BlockSpec((TB, H + 2 * PAD, (W + 2 * PAD) * Cin),
                         lambda n: (n, 0, 0)),
            full(t1.shape), full(bc1.shape), full(p1e.shape), full(p1o.shape),
            full(t2.shape), full(bc2.shape), full(q2e.shape), full(q2o.shape),
            full(wf1s.shape), full(bf1.shape), full(wf2.shape), full(bf2.shape),
        ],
        out_specs=pl.BlockSpec((TB, NOUT_P), lambda n: (n, 0)),
        scratch_shapes=[
            pltpu.VMEM((TB, H, W * C1), jnp.float32),                       # conv1 out
            pltpu.VMEM((TB, Ho, W * C1), jnp.float32),                      # h-pooled conv1
            pltpu.VMEM((TB, Ho + 2 * PAD, (Wo + 2 * PAD) * C1), jnp.float32),  # pad2
            pltpu.VMEM((TB, Ho, Wo * C2), jnp.float32),                     # conv2 out
        ],
        compiler_params=pltpu.CompilerParams(dimension_semantics=("parallel",)),
    )(xp, t1, bc1, p1e, p1o, t2, bc2, q2e, q2o, wf1s, bf1, wf2, bf2)
    return out[:, :NOUT]


# ----------------------------------------------------------------------------
# Pure-JAX reference (torch-layout parameters) for correctness check
# ----------------------------------------------------------------------------
def reference_forward(x_nchw, params):
    x = jnp.transpose(x_nchw, (0, 2, 3, 1))
    for w, b in ((params["w_conv1"], params["b_conv1"]),
                 (params["w_conv2"], params["b_conv2"])):
        wf = jnp.transpose(w, (2, 3, 1, 0))                       # OIHW -> HWIO
        y = jax.lax.conv_general_dilated(
            x, wf, window_strides=(1, 1), padding=((2, 2), (2, 2)),
            dimension_numbers=("NHWC", "HWIO", "NHWC"))
        y = jnp.maximum(y + b.reshape(1, 1, 1, -1), 0.0)
        x = jax.lax.reduce_window(y, -jnp.inf, jax.lax.max,
                                  (1, 2, 2, 1), (1, 2, 2, 1), "VALID")
    x = jnp.transpose(x, (0, 3, 1, 2)).reshape(x.shape[0], -1)    # torch NCHW flatten
    h = jnp.maximum(x @ params["w_fc1"].T + params["b_fc1"], 0.0)
    return h @ params["w_fc2"].T + params["b_fc2"]


if __name__ == "__main__":
    # Small shapes consistent with the module:
    #   input_shape=(4, 16, 16), conv_filters=(8, 16), fc_nodes=32, output_shape=10
    N, Cin, H, W = 2, 4, 16, 16
    C1, C2 = 8, 16
    FC_NODES, N_OUT = 32, 10
    FLAT = C2 * (H // 4) * (W // 4)                               # 16 * 4 * 4 = 256

    key = jax.random.PRNGKey(0)
    ks = jax.random.split(key, 9)
    x = jax.random.normal(ks[0], (N, Cin, H, W), jnp.float32)     # NCHW like PyTorch

    # Parameters in PyTorch layouts (Conv2d: (Cout,Cin,KH,KW); Linear: (out,in)).
    params = {
        "w_conv1": 0.1 * jax.random.normal(ks[1], (C1, Cin, 5, 5), jnp.float32),
        "b_conv1": 0.1 * jax.random.normal(ks[2], (C1,), jnp.float32),
        "w_conv2": 0.1 * jax.random.normal(ks[3], (C2, C1, 5, 5), jnp.float32),
        "b_conv2": 0.1 * jax.random.normal(ks[4], (C2,), jnp.float32),
        "w_fc1": 0.05 * jax.random.normal(ks[5], (FC_NODES, FLAT), jnp.float32),
        "b_fc1": 0.05 * jax.random.normal(ks[6], (FC_NODES,), jnp.float32),
        "w_fc2": 0.05 * jax.random.normal(ks[7], (N_OUT, FC_NODES), jnp.float32),
        "b_fc2": 0.05 * jax.random.normal(ks[8], (N_OUT,), jnp.float32),
    }

    y = jax.jit(cnn2d_forward)(x, params)
    y = jax.block_until_ready(y)
    assert y.shape == (N, N_OUT), y.shape

    y_ref = reference_forward(x, params)
    max_err = float(jnp.max(jnp.abs(y - y_ref)))
    assert jnp.allclose(y, y_ref, rtol=1e-3, atol=1e-3), max_err

    print("KERNEL_OK")
</pallas_src>

<mosaic_0001>
module attributes {stable_mosaic.version = 11 : i64} {
  func.func @kernel(%arg0: i32, %arg1: memref<2x20x80xf32, #tpu.memory_space<vmem>>, %arg2: memref<5x80x128xf32, #tpu.memory_space<vmem>>, %arg3: memref<1x128xf32, #tpu.memory_space<vmem>>, %arg4: memref<128x96xf32, #tpu.memory_space<vmem>>, %arg5: memref<128x96xf32, #tpu.memory_space<vmem>>, %arg6: memref<5x96x128xf32, #tpu.memory_space<vmem>>, %arg7: memref<1x128xf32, #tpu.memory_space<vmem>>, %arg8: memref<128x64xf32, #tpu.memory_space<vmem>>, %arg9: memref<128x64xf32, #tpu.memory_space<vmem>>, %arg10: memref<4x64x32xf32, #tpu.memory_space<vmem>>, %arg11: memref<1x32xf32, #tpu.memory_space<vmem>>, %arg12: memref<32x128xf32, #tpu.memory_space<vmem>>, %arg13: memref<1x128xf32, #tpu.memory_space<vmem>>, %arg14: memref<2x128xf32, #tpu.memory_space<vmem>>, %arg15: memref<2x16x128xf32, #tpu.memory_space<vmem>>, %arg16: memref<2x8x128xf32, #tpu.memory_space<vmem>>, %arg17: memref<2x12x96xf32, #tpu.memory_space<vmem>>, %arg18: memref<2x8x128xf32, #tpu.memory_space<vmem>>) attributes {dimension_semantics = [#tpu.dimension_semantics<parallel>], iteration_bounds = array<i64: 1>, scalar_prefetch = 0 : i64, scratch_operands = 4 : i64, tpu.core_type = #tpu.core_type<tc>, window_params = [{transform_indices = @transform_0, window_bounds = array<i64: 2, 20, 80>}, {pipeline_mode = #tpu.pipeline_mode<synchronous>, transform_indices = @transform_1, window_bounds = array<i64: 5, 80, 128>}, {pipeline_mode = #tpu.pipeline_mode<synchronous>, transform_indices = @transform_2, window_bounds = array<i64: 1, 128>}, {pipeline_mode = #tpu.pipeline_mode<synchronous>, transform_indices = @transform_3, window_bounds = array<i64: 128, 96>}, {pipeline_mode = #tpu.pipeline_mode<synchronous>, transform_indices = @transform_4, window_bounds = array<i64: 128, 96>}, {pipeline_mode = #tpu.pipeline_mode<synchronous>, transform_indices = @transform_5, window_bounds = array<i64: 5, 96, 128>}, {pipeline_mode = #tpu.pipeline_mode<synchronous>, transform_indices = @transform_6, window_bounds = array<i64: 1, 128>}, {pipeline_mode = #tpu.pipeline_mode<synchronous>, transform_indices = @transform_7, window_bounds = array<i64: 128, 64>}, {pipeline_mode = #tpu.pipeline_mode<synchronous>, transform_indices = @transform_8, window_bounds = array<i64: 128, 64>}, {pipeline_mode = #tpu.pipeline_mode<synchronous>, transform_indices = @transform_9, window_bounds = array<i64: 4, 64, 32>}, {pipeline_mode = #tpu.pipeline_mode<synchronous>, transform_indices = @transform_10, window_bounds = array<i64: 1, 32>}, {pipeline_mode = #tpu.pipeline_mode<synchronous>, transform_indices = @transform_11, window_bounds = array<i64: 32, 128>}, {pipeline_mode = #tpu.pipeline_mode<synchronous>, transform_indices = @transform_12, window_bounds = array<i64: 1, 128>}, {transform_indices = @transform_13, window_bounds = array<i64: 2, 128>}]} {
    %c0 = arith.constant 0 : index
    %c0_0 = arith.constant 0 : index
    %c0_1 = arith.constant 0 : index
    %0 = vector.load %arg1[%c0, %c0_0, %c0_1] : memref<2x20x80xf32, #tpu.memory_space<vmem>>, vector<2x16x80xf32>
    %1 = vector.shape_cast %0 : vector<2x16x80xf32> to vector<32x80xf32>
    %c0_2 = arith.constant 0 : index
    %c0_3 = arith.constant 0 : index
    %c0_4 = arith.constant 0 : index
    %2 = vector.load %arg2[%c0_2, %c0_3, %c0_4] : memref<5x80x128xf32, #tpu.memory_space<vmem>>, vector<1x80x128xf32>
    %3 = vector.shape_cast %2 : vector<1x80x128xf32> to vector<80x128xf32>
    %cst = arith.constant dense<0.000000e+00> : vector<32x128xf32>
    %4 = tpu.matmul %1, %3, %cst {dimension_numbers = #tpu.dot_dimension_numbers<[1], [0], [0], [1], [0, 0, 1, 1], [], []>} : vector<32x80xf32>, vector<80x128xf32>, vector<32x128xf32> -> vector<32x128xf32>
    %5 = vector.shape_cast %4 : vector<32x128xf32> to vector<2x16x128xf32>
    %c0_5 = arith.constant 0 : index
    %c0_6 = arith.constant 0 : index
    %6 = vector.load %arg3[%c0_5, %c0_6] : memref<1x128xf32, #tpu.memory_space<vmem>>, vector<1x128xf32>
    %7 = vector.shape_cast %6 : vector<1x128xf32> to vector<1x1x128xf32>
    %8 = vector.broadcast %7 : vector<1x1x128xf32> to vector<2x16x128xf32>
    %9 = arith.addf %5, %8 : vector<2x16x128xf32>
    %c0_7 = arith.constant 0 : index
    %c0_8 = arith.constant 0 : index
    %c0_9 = arith.constant 0 : index
    %10 = vector.load %arg15[%c0_7, %c0_8, %c0_9] : memref<2x16x128xf32, #tpu.memory_space<vmem>>, vector<2x16x128xf32>
    tpu.vector_store %arg15[%c0_7, %c0_8, %c0_9], %9 {strides = array<i32>} : memref<2x16x128xf32, #tpu.memory_space<vmem>>, vector<2x16x128xf32>,
    %c0_10 = arith.constant 0 : index
    %c1 = arith.constant 1 : index
    %c0_11 = arith.constant 0 : index
    %11 = vector.load %arg1[%c0_10, %c1, %c0_11] : memref<2x20x80xf32, #tpu.memory_space<vmem>>, vector<2x16x80xf32>
    %12 = vector.shape_cast %11 : vector<2x16x80xf32> to vector<32x80xf32>
    %c1_12 = arith.constant 1 : index
    %c0_13 = arith.constant 0 : index
    %c0_14 = arith.constant 0 : index
    %13 = vector.load %arg2[%c1_12, %c0_13, %c0_14] : memref<5x80x128xf32, #tpu.memory_space<vmem>>, vector<1x80x128xf32>
    %14 = vector.shape_cast %13 : vector<1x80x128xf32> to vector<80x128xf32>
    %cst_15 = arith.constant dense<0.000000e+00> : vector<32x128xf32>
    %15 = tpu.matmul %12, %14, %cst_15 {dimension_numbers = #tpu.dot_dimension_numbers<[1], [0], [0], [1], [0, 0, 1, 1], [], []>} : vector<32x80xf32>, vector<80x128xf32>, vector<32x128xf32> -> vector<32x128xf32>
    %16 = vector.shape_cast %15 : vector<32x128xf32> to vector<2x16x128xf32>
    %c0_16 = arith.constant 0 : index
    %c0_17 = arith.constant 0 : index
    %c0_18 = arith.constant 0 : index
    %17 = vector.load %arg15[%c0_16, %c0_17, %c0_18] : memref<2x16x128xf32, #tpu.memory_space<vmem>>, vector<2x16x128xf32>
    %18 = arith.addf %17, %16 : vector<2x16x128xf32>
    %c0_19 = arith.constant 0 : index
    %c0_20 = arith.constant 0 : index
    %c0_21 = arith.constant 0 : index
    %19 = vector.load %arg15[%c0_19, %c0_20, %c0_21] : memref<2x16x128xf32, #tpu.memory_space<vmem>>, vector<2x16x128xf32>
    tpu.vector_store %arg15[%c0_19, %c0_20, %c0_21], %18 {strides = array<i32>} : memref<2x16x128xf32, #tpu.memory_space<vmem>>, vector<2x16x128xf32>,
    %c0_22 = arith.constant 0 : index
    %c2 = arith.constant 2 : index
    %c0_23 = arith.constant 0 : index
    %20 = vector.load %arg1[%c0_22, %c2, %c0_23] : memref<2x20x80xf32, #tpu.memory_space<vmem>>, vector<2x16x80xf32>
    %21 = vector.shape_cast %20 : vector<2x16x80xf32> to vector<32x80xf32>
    %c2_24 = arith.constant 2 : index
    %c0_25 = arith.constant 0 : index
    %c0_26 = arith.constant 0 : index
    %22 = vector.load %arg2[%c2_24, %c0_25, %c0_26] : memref<5x80x128xf32, #tpu.memory_space<vmem>>, vector<1x80x128xf32>
    %23 = vector.shape_cast %22 : vector<1x80x128xf32> to vector<80x128xf32>
    %cst_27 = arith.constant dense<0.000000e+00> : vector<32x128xf32>
    %24 = tpu.matmul %21, %23, %cst_27 {dimension_numbers = #tpu.dot_dimension_numbers<[1], [0], [0], [1], [0, 0, 1, 1], [], []>} : vector<32x80xf32>, vector<80x128xf32>, vector<32x128xf32> -> vector<32x128xf32>
    %25 = vector.shape_cast %24 : vector<32x128xf32> to vector<2x16x128xf32>
    %c0_28 = arith.constant 0 : index
    %c0_29 = arith.constant 0 : index
    %c0_30 = arith.constant 0 : index
    %26 = vector.load %arg15[%c0_28, %c0_29, %c0_30] : memref<2x16x128xf32, #tpu.memory_space<vmem>>, vector<2x16x128xf32>
    %27 = arith.addf %26, %25 : vector<2x16x128xf32>
    %c0_31 = arith.constant 0 : index
    %c0_32 = arith.constant 0 : index
    %c0_33 = arith.constant 0 : index
    %28 = vector.load %arg15[%c0_31, %c0_32, %c0_33] : memref<2x16x128xf32, #tpu.memory_space<vmem>>, vector<2x16x128xf32>
    tpu.vector_store %arg15[%c0_31, %c0_32, %c0_33], %27 {strides = array<i32>} : memref<2x16x128xf32, #tpu.memory_space<vmem>>, vector<2x16x128xf32>,
    %c0_34 = arith.constant 0 : index
    %c3 = arith.constant 3 : index
    %c0_35 = arith.constant 0 : index
    %29 = vector.load %arg1[%c0_34, %c3, %c0_35] : memref<2x20x80xf32, #tpu.memory_space<vmem>>, vector<2x16x80xf32>
    %30 = vector.shape_cast %29 : vector<2x16x80xf32> to vector<32x80xf32>
    %c3_36 = arith.constant 3 : index
    %c0_37 = arith.constant 0 : index
    %c0_38 = arith.constant 0 : index
    %31 = vector.load %arg2[%c3_36, %c0_37, %c0_38] : memref<5x80x128xf32, #tpu.memory_space<vmem>>, vector<1x80x128xf32>
    %32 = vector.shape_cast %31 : vector<1x80x128xf32> to vector<80x128xf32>
    %cst_39 = arith.constant dense<0.000000e+00> : vector<32x128xf32>
    %33 = tpu.matmul %30, %32, %cst_39 {dimension_numbers = #tpu.dot_dimension_numbers<[1], [0], [0], [1], [0, 0, 1, 1], [], []>} : vector<32x80xf32>, vector<80x128xf32>, vector<32x128xf32> -> vector<32x128xf32>
    %34 = vector.shape_cast %33 : vector<32x128xf32> to vector<2x16x128xf32>
    %c0_40 = arith.constant 0 : index
    %c0_41 = arith.constant 0 : index
    %c0_42 = arith.constant 0 : index
    %35 = vector.load %arg15[%c0_40, %c0_41, %c0_42] : memref<2x16x128xf32, #tpu.memory_space<vmem>>, vector<2x16x128xf32>
    %36 = arith.addf %35, %34 : vector<2x16x128xf32>
    %c0_43 = arith.constant 0 : index
    %c0_44 = arith.constant 0 : index
    %c0_45 = arith.constant 0 : index
    %37 = vector.load %arg15[%c0_43, %c0_44, %c0_45] : memref<2x16x128xf32, #tpu.memory_space<vmem>>, vector<2x16x128xf32>
    tpu.vector_store %arg15[%c0_43, %c0_44, %c0_45], %36 {strides = array<i32>} : memref<2x16x128xf32, #tpu.memory_space<vmem>>, vector<2x16x128xf32>,
    %c0_46 = arith.constant 0 : index
    %c4 = arith.constant 4 : index
    %c0_47 = arith.constant 0 : index
    %38 = vector.load %arg1[%c0_46, %c4, %c0_47] : memref<2x20x80xf32, #tpu.memory_space<vmem>>, vector<2x16x80xf32>
    %39 = vector.shape_cast %38 : vector<2x16x80xf32> to vector<32x80xf32>
    %c4_48 = arith.constant 4 : index
    %c0_49 = arith.constant 0 : index
    %c0_50 = arith.constant 0 : index
    %40 = vector.load %arg2[%c4_48, %c0_49, %c0_50] : memref<5x80x128xf32, #tpu.memory_space<vmem>>, vector<1x80x128xf32>
    %41 = vector.shape_cast %40 : vector<1x80x128xf32> to vector<80x128xf32>
    %cst_51 = arith.constant dense<0.000000e+00> : vector<32x128xf32>
    %42 = tpu.matmul %39, %41, %cst_51 {dimension_numbers = #tpu.dot_dimension_numbers<[1], [0], [0], [1], [0, 0, 1, 1], [], []>} : vector<32x80xf32>, vector<80x128xf32>, vector<32x128xf32> -> vector<32x128xf32>
    %43 = vector.shape_cast %42 : vector<32x128xf32> to vector<2x16x128xf32>
    %c0_52 = arith.constant 0 : index
    %c0_53 = arith.constant 0 : index
    %c0_54 = arith.constant 0 : index
    %44 = vector.load %arg15[%c0_52, %c0_53, %c0_54] : memref<2x16x128xf32, #tpu.memory_space<vmem>>, vector<2x16x128xf32>
    %45 = arith.addf %44, %43 : vector<2x16x128xf32>
    %c0_55 = arith.constant 0 : index
    %c0_56 = arith.constant 0 : index
    %c0_57 = arith.constant 0 : index
    %46 = vector.load %arg15[%c0_55, %c0_56, %c0_57] : memref<2x16x128xf32, #tpu.memory_space<vmem>>, vector<2x16x128xf32>
    tpu.vector_store %arg15[%c0_55, %c0_56, %c0_57], %45 {strides = array<i32>} : memref<2x16x128xf32, #tpu.memory_space<vmem>>, vector<2x16x128xf32>,
    %c0_58 = arith.constant 0 : index
    %c0_59 = arith.constant 0 : index
    %c0_60 = arith.constant 0 : index
    %47 = vector.load %arg15[%c0_58, %c0_59, %c0_60] : memref<2x16x128xf32, #tpu.memory_space<vmem>>, vector<2x16x128xf32>
    %cst_61 = arith.constant 0.000000e+00 : f32
    %48 = vector.broadcast %cst_61 : f32 to vector<2x16x128xf32>
    %49 = arith.maximumf %47, %48 : vector<2x16x128xf32>
    %c0_62 = arith.constant 0 : index
    %c0_63 = arith.constant 0 : index
    %c0_64 = arith.constant 0 : index
    %50 = vector.load %arg15[%c0_62, %c0_63, %c0_64] : memref<2x16x128xf32, #tpu.memory_space<vmem>>, vector<2x16x128xf32>
    tpu.vector_store %arg15[%c0_62, %c0_63, %c0_64], %49 {strides = array<i32>} : memref<2x16x128xf32, #tpu.memory_space<vmem>>, vector<2x16x128xf32>,
    %c0_65 = arith.constant 0 : index
    %c0_66 = arith.constant 0 : index
    %c0_67 = arith.constant 0 : index
    %51 = vector.load %arg15[%c0_65, %c0_66, %c0_67] : memref<2x16x128xf32, #tpu.memory_space<vmem>>, vector<2x1x128xf32>
    %52 = vector.shape_cast %51 : vector<2x1x128xf32> to vector<2x128xf32>
    %c0_68 = arith.constant 0 : index
    %c1_69 = arith.constant 1 : index
    %c0_70 = arith.constant 0 : index
    %53 = vector.load %arg15[%c0_68, %c1_69, %c0_70] : memref<2x16x128xf32, #tpu.memory_space<vmem>>, vector<2x1x128xf32>
    %54 = vector.shape_cast %53 : vector<2x1x128xf32> to vector<2x128xf32>
    %55 = arith.maximumf %52, %54 : vector<2x128xf32>
    %c0_71 = arith.constant 0 : index
    %c0_72 = arith.constant 0 : index
    %c0_73 = arith.constant 0 : index
    %56 = vector.load %arg16[%c0_71, %c0_72, %c0_73] : memref<2x8x128xf32, #tpu.memory_space<vmem>>, vector<2x1x128xf32>
    %57 = vector.shape_cast %56 : vector<2x1x128xf32> to vector<2x128xf32>
    %58 = vector.shape_cast %55 : vector<2x128xf32> to vector<2x1x128xf32>
    tpu.vector_store %arg16[%c0_71, %c0_72, %c0_73], %58 {strides = array<i32>} : memref<2x8x128xf32, #tpu.memory_space<vmem>>, vector<2x1x128xf32>,
    %c0_74 = arith.constant 0 : index
    %c2_75 = arith.constant 2 : index
    %c0_76 = arith.constant 0 : index
    %59 = vector.load %arg15[%c0_74, %c2_75, %c0_76] : memref<2x16x128xf32, #tpu.memory_space<vmem>>, vector<2x1x128xf32>
    %60 = vector.shape_cast %59 : vector<2x1x128xf32> to vector<2x128xf32>
    %c0_77 = arith.constant 0 : index
    %c3_78 = arith.constant 3 : index
    %c0_79 = arith.constant 0 : index
    %61 = vector.load %arg15[%c0_77, %c3_78, %c0_79] : memref<2x16x128xf32, #tpu.memory_space<vmem>>, vector<2x1x128xf32>
    %62 = vector.shape_cast %61 : vector<2x1x128xf32> to vector<2x128xf32>
    %63 = arith.maximumf %60, %62 : vector<2x128xf32>
    %c0_80 = arith.constant 0 : index
    %c1_81 = arith.constant 1 : index
    %c0_82 = arith.constant 0 : index
    %64 = vector.load %arg16[%c0_80, %c1_81, %c0_82] : memref<2x8x128xf32, #tpu.memory_space<vmem>>, vector<2x1x128xf32>
    %65 = vector.shape_cast %64 : vector<2x1x128xf32> to vector<2x128xf32>
    %66 = vector.shape_cast %63 : vector<2x128xf32> to vector<2x1x128xf32>
    tpu.vector_store %arg16[%c0_80, %c1_81, %c0_82], %66 {strides = array<i32>} : memref<2x8x128xf32, #tpu.memory_space<vmem>>, vector<2x1x128xf32>,
    %c0_83 = arith.constant 0 : index
    %c4_84 = arith.constant 4 : index
    %c0_85 = arith.constant 0 : index
    %67 = vector.load %arg15[%c0_83, %c4_84, %c0_85] : memref<2x16x128xf32, #tpu.memory_space<vmem>>, vector<2x1x128xf32>
    %68 = vector.shape_cast %67 : vector<2x1x128xf32> to vector<2x128xf32>
    %c0_86 = arith.constant 0 : index
    %c5 = arith.constant 5 : index
    %c0_87 = arith.constant 0 : index
    %69 = vector.load %arg15[%c0_86, %c5, %c0_87] : memref<2x16x128xf32, #tpu.memory_space<vmem>>, vector<2x1x128xf32>
    %70 = vector.shape_cast %69 : vector<2x1x128xf32> to vector<2x128xf32>
    %71 = arith.maximumf %68, %70 : vector<2x128xf32>
    %c0_88 = arith.constant 0 : index
    %c2_89 = arith.constant 2 : index
    %c0_90 = arith.constant 0 : index
    %72 = vector.load %arg16[%c0_88, %c2_89, %c0_90] : memref<2x8x128xf32, #tpu.memory_space<vmem>>, vector<2x1x128xf32>
    %73 = vector.shape_cast %72 : vector<2x1x128xf32> to vector<2x128xf32>
    %74 = vector.shape_cast %71 : vector<2x128xf32> to vector<2x1x128xf32>
    tpu.vector_store %arg16[%c0_88, %c2_89, %c0_90], %74 {strides = array<i32>} : memref<2x8x128xf32, #tpu.memory_space<vmem>>, vector<2x1x128xf32>,
    %c0_91 = arith.constant 0 : index
    %c6 = arith.constant 6 : index
    %c0_92 = arith.constant 0 : index
    %75 = vector.load %arg15[%c0_91, %c6, %c0_92] : memref<2x16x128xf32, #tpu.memory_space<vmem>>, vector<2x1x128xf32>
    %76 = vector.shape_cast %75 : vector<2x1x128xf32> to vector<2x128xf32>
    %c0_93 = arith.constant 0 : index
    %c7 = arith.constant 7 : index
    %c0_94 = arith.constant 0 : index
    %77 = vector.load %arg15[%c0_93, %c7, %c0_94] : memref<2x16x128xf32, #tpu.memory_space<vmem>>, vector<2x1x128xf32>
    %78 = vector.shape_cast %77 : vector<2x1x128xf32> to vector<2x128xf32>
    %79 = arith.maximumf %76, %78 : vector<2x128xf32>
    %c0_95 = arith.constant 0 : index
    %c3_96 = arith.constant 3 : index
    %c0_97 = arith.constant 0 : index
    %80 = vector.load %arg16[%c0_95, %c3_96, %c0_97] : memref<2x8x128xf32, #tpu.memory_space<vmem>>, vector<2x1x128xf32>
    %81 = vector.shape_cast %80 : vector<2x1x128xf32> to vector<2x128xf32>
    %82 = vector.shape_cast %79 : vector<2x128xf32> to vector<2x1x128xf32>
    tpu.vector_store %arg16[%c0_95, %c3_96, %c0_97], %82 {strides = array<i32>} : memref<2x8x128xf32, #tpu.memory_space<vmem>>, vector<2x1x128xf32>,
    %c0_98 = arith.constant 0 : index
    %c8 = arith.constant 8 : index
    %c0_99 = arith.constant 0 : index
    %83 = vector.load %arg15[%c0_98, %c8, %c0_99] : memref<2x16x128xf32, #tpu.memory_space<vmem>>, vector<2x1x128xf32>
    %84 = vector.shape_cast %83 : vector<2x1x128xf32> to vector<2x128xf32>
    %c0_100 = arith.constant 0 : index
    %c9 = arith.constant 9 : index
    %c0_101 = arith.constant 0 : index
    %85 = vector.load %arg15[%c0_100, %c9, %c0_101] : memref<2x16x128xf32, #tpu.memory_space<vmem>>, vector<2x1x128xf32>
    %86 = vector.shape_cast %85 : vector<2x1x128xf32> to vector<2x128xf32>
    %87 = arith.maximumf %84, %86 : vector<2x128xf32>
    %c0_102 = arith.constant 0 : index
    %c4_103 = arith.constant 4 : index
    %c0_104 = arith.constant 0 : index
    %88 = vector.load %arg16[%c0_102, %c4_103, %c0_104] : memref<2x8x128xf32, #tpu.memory_space<vmem>>, vector<2x1x128xf32>
    %89 = vector.shape_cast %88 : vector<2x1x128xf32> to vector<2x128xf32>
    %90 = vector.shape_cast %87 : vector<2x128xf32> to vector<2x1x128xf32>
    tpu.vector_store %arg16[%c0_102, %c4_103, %c0_104], %90 {strides = array<i32>} : memref<2x8x128xf32, #tpu.memory_space<vmem>>, vector<2x1x128xf32>,
    %c0_105 = arith.constant 0 : index
    %c10 = arith.constant 10 : index
    %c0_106 = arith.constant 0 : index
    %91 = vector.load %arg15[%c0_105, %c10, %c0_106] : memref<2x16x128xf32, #tpu.memory_space<vmem>>, vector<2x1x128xf32>
    %92 = vector.shape_cast %91 : vector<2x1x128xf32> to vector<2x128xf32>
    %c0_107 = arith.constant 0 : index
    %c11 = arith.constant 11 : index
    %c0_108 = arith.constant 0 : index
    %93 = vector.load %arg15[%c0_107, %c11, %c0_108] : memref<2x16x128xf32, #tpu.memory_space<vmem>>, vector<2x1x128xf32>
    %94 = vector.shape_cast %93 : vector<2x1x128xf32> to vector<2x128xf32>
    %95 = arith.maximumf %92, %94 : vector<2x128xf32>
    %c0_109 = arith.constant 0 : index
    %c5_110 = arith.constant 5 : index
    %c0_111 = arith.constant 0 : index
    %96 = vector.load %arg16[%c0_109, %c5_110, %c0_111] : memref<2x8x128xf32, #tpu.memory_space<vmem>>, vector<2x1x128xf32>
    %97 = vector.shape_cast %96 : vector<2x1x128xf32> to vector<2x128xf32>
    %98 = vector.shape_cast %95 : vector<2x128xf32> to vector<2x1x128xf32>
    tpu.vector_store %arg16[%c0_109, %c5_110, %c0_111], %98 {strides = array<i32>} : memref<2x8x128xf32, #tpu.memory_space<vmem>>, vector<2x1x128xf32>,
    %c0_112 = arith.constant 0 : index
    %c12 = arith.constant 12 : index
    %c0_113 = arith.constant 0 : index
    %99 = vector.load %arg15[%c0_112, %c12, %c0_113] : memref<2x16x128xf32, #tpu.memory_space<vmem>>, vector<2x1x128xf32>
    %100 = vector.shape_cast %99 : vector<2x1x128xf32> to vector<2x128xf32>
    %c0_114 = arith.constant 0 : index
    %c13 = arith.constant 13 : index
    %c0_115 = arith.constant 0 : index
    %101 = vector.load %arg15[%c0_114, %c13, %c0_115] : memref<2x16x128xf32, #tpu.memory_space<vmem>>, vector<2x1x128xf32>
    %102 = vector.shape_cast %101 : vector<2x1x128xf32> to vector<2x128xf32>
    %103 = arith.maximumf %100, %102 : vector<2x128xf32>
    %c0_116 = arith.constant 0 : index
    %c6_117 = arith.constant 6 : index
    %c0_118 = arith.constant 0 : index
    %104 = vector.load %arg16[%c0_116, %c6_117, %c0_118] : memref<2x8x128xf32, #tpu.memory_space<vmem>>, vector<2x1x128xf32>
    %105 = vector.shape_cast %104 : vector<2x1x128xf32> to vector<2x128xf32>
    %106 = vector.shape_cast %103 : vector<2x128xf32> to vector<2x1x128xf32>
    tpu.vector_store %arg16[%c0_116, %c6_117, %c0_118], %106 {strides = array<i32>} : memref<2x8x128xf32, #tpu.memory_space<vmem>>, vector<2x1x128xf32>,
    %c0_119 = arith.constant 0 : index
    %c14 = arith.constant 14 : index
    %c0_120 = arith.constant 0 : index
    %107 = vector.load %arg15[%c0_119, %c14, %c0_120] : memref<2x16x128xf32, #tpu.memory_space<vmem>>, vector<2x1x128xf32>
    %108 = vector.shape_cast %107 : vector<2x1x128xf32> to vector<2x128xf32>
    %c0_121 = arith.constant 0 : index
    %c15 = arith.constant 15 : index
    %c0_122 = arith.constant 0 : index
    %109 = vector.load %arg15[%c0_121, %c15, %c0_122] : memref<2x16x128xf32, #tpu.memory_space<vmem>>, vector<2x1x128xf32>
    %110 = vector.shape_cast %109 : vector<2x1x128xf32> to vector<2x128xf32>
    %111 = arith.maximumf %108, %110 : vector<2x128xf32>
    %c0_123 = arith.constant 0 : index
    %c7_124 = arith.constant 7 : index
    %c0_125 = arith.constant 0 : index
    %112 = vector.load %arg16[%c0_123, %c7_124, %c0_125] : memref<2x8x128xf32, #tpu.memory_space<vmem>>, vector<2x1x128xf32>
    %113 = vector.shape_cast %112 : vector<2x1x128xf32> to vector<2x128xf32>
    %114 = vector.shape_cast %111 : vector<2x128xf32> to vector<2x1x128xf32>
    tpu.vector_store %arg16[%c0_123, %c7_124, %c0_125], %114 {strides = array<i32>} : memref<2x8x128xf32, #tpu.memory_space<vmem>>, vector<2x1x128xf32>,
    %c0_126 = arith.constant 0 : index
    %c0_127 = arith.constant 0 : index
    %c0_128 = arith.constant 0 : index
    %115 = vector.load %arg16[%c0_126, %c0_127, %c0_128] : memref<2x8x128xf32, #tpu.memory_space<vmem>>, vector<2x8x128xf32>
    %116 = vector.shape_cast %115 : vector<2x8x128xf32> to vector<16x128xf32>
    %c0_129 = arith.constant 0 : index
    %c0_130 = arith.constant 0 : index
    %117 = vector.load %arg4[%c0_129, %c0_130] : memref<128x96xf32, #tpu.memory_space<vmem>>, vector<128x96xf32>
    %cst_131 = arith.constant dense<0.000000e+00> : vector<16x96xf32>
    %118 = tpu.matmul %116, %117, %cst_131 {dimension_numbers = #tpu.dot_dimension_numbers<[1], [0], [0], [1], [0, 0, 1, 1], [], []>} : vector<16x128xf32>, vector<128x96xf32>, vector<16x96xf32> -> vector<16x96xf32>
    %c0_132 = arith.constant 0 : index
    %c0_133 = arith.constant 0 : index
    %119 = vector.load %arg5[%c0_132, %c0_133] : memref<128x96xf32, #tpu.memory_space<vmem>>, vector<128x96xf32>
    %cst_134 = arith.constant dense<0.000000e+00> : vector<16x96xf32>
    %120 = tpu.matmul %116, %119, %cst_134 {dimension_numbers = #tpu.dot_dimension_numbers<[1], [0], [0], [1], [0, 0, 1, 1], [], []>} : vector<16x128xf32>, vector<128x96xf32>, vector<16x96xf32> -> vector<16x96xf32>
    %121 = arith.maximumf %118, %120 : vector<16x96xf32>
    %cst_135 = arith.constant 0.000000e+00 : f32
    %122 = vector.broadcast %cst_135 : f32 to vector<2x2x96xf32>
    %c0_136 = arith.constant 0 : index
    %c0_137 = arith.constant 0 : index
    %c0_138 = arith.constant 0 : index
    %123 = vector.load %arg17[%c0_136, %c0_137, %c0_138] : memref<2x12x96xf32, #tpu.memory_space<vmem>>, vector<2x2x96xf32>
    tpu.vector_store %arg17[%c0_136, %c0_137, %c0_138], %122 {strides = array<i32>} : memref<2x12x96xf32, #tpu.memory_space<vmem>>, vector<2x2x96xf32>,
    %cst_139 = arith.constant 0.000000e+00 : f32
    %124 = vector.broadcast %cst_139 : f32 to vector<2x2x96xf32>
    %c0_140 = arith.constant 0 : index
    %c10_141 = arith.constant 10 : index
    %c0_142 = arith.constant 0 : index
    %125 = vector.load %arg17[%c0_140, %c10_141, %c0_142] : memref<2x12x96xf32, #tpu.memory_space<vmem>>, vector<2x2x96xf32>
    tpu.vector_store %arg17[%c0_140, %c10_141, %c0_142], %124 {strides = array<i32>} : memref<2x12x96xf32, #tpu.memory_space<vmem>>, vector<2x2x96xf32>,
    %126 = vector.shape_cast %121 : vector<16x96xf32> to vector<2x8x96xf32>
    %c0_143 = arith.constant 0 : index
    %c2_144 = arith.constant 2 : index
    %c0_145 = arith.constant 0 : index
    %127 = vector.load %arg17[%c0_143, %c2_144, %c0_145] : memref<2x12x96xf32, #tpu.memory_space<vmem>>, vector<2x8x96xf32>
    tpu.vector_store %arg17[%c0_143, %c2_144, %c0_145], %126 {strides = array<i32>} : memref<2x12x96xf32, #tpu.memory_space<vmem>>, vector<2x8x96xf32>,
    %c0_146 = arith.constant 0 : index
    %c0_147 = arith.constant 0 : index
    %c0_148 = arith.constant 0 : index
    %128 = vector.load %arg17[%c0_146, %c0_147, %c0_148] : memref<2x12x96xf32, #tpu.memory_space<vmem>>, vector<2x8x96xf32>
    %129 = vector.shape_cast %128 : vector<2x8x96xf32> to vector<16x96xf32>
    %c0_149 = arith.constant 0 : index
    %c0_150 = arith.constant 0 : index
    %c0_151 = arith.constant 0 : index
    %130 = vector.load %arg6[%c0_149, %c0_150, %c0_151] : memref<5x96x128xf32, #tpu.memory_space<vmem>>, vector<1x96x128xf32>
    %131 = vector.shape_cast %130 : vector<1x96x128xf32> to vector<96x128xf32>
    %cst_152 = arith.constant dense<0.000000e+00> : vector<16x128xf32>
    %132 = tpu.matmul %129, %131, %cst_152 {dimension_numbers = #tpu.dot_dimension_numbers<[1], [0], [0], [1], [0, 0, 1, 1], [], []>} : vector<16x96xf32>, vector<96x128xf32>, vector<16x128xf32> -> vector<16x128xf32>
    %133 = vector.shape_cast %132 : vector<16x128xf32> to vector<2x8x128xf32>
    %c0_153 = arith.constant 0 : index
    %c0_154 = arith.constant 0 : index
    %134 = vector.load %arg7[%c0_153, %c0_154] : memref<1x128xf32, #tpu.memory_space<vmem>>, vector<1x128xf32>
    %135 = vector.shape_cast %134 : vector<1x128xf32> to vector<1x1x128xf32>
    %136 = vector.broadcast %135 : vector<1x1x128xf32> to vector<2x8x128xf32>
    %137 = arith.addf %133, %136 : vector<2x8x128xf32>
    %c0_155 = arith.constant 0 : index
    %c0_156 = arith.constant 0 : index
    %c0_157 = arith.constant 0 : index
    %138 = vector.load %arg18[%c0_155, %c0_156, %c0_157] : memref<2x8x128xf32, #tpu.memory_space<vmem>>, vector<2x8x128xf32>
    tpu.vector_store %arg18[%c0_155, %c0_156, %c0_157], %137 {strides = array<i32>} : memref<2x8x128xf32, #tpu.memory_space<vmem>>, vector<2x8x128xf32>,
    %c0_158 = arith.constant 0 : index
    %c1_159 = arith.constant 1 : index
    %c0_160 = arith.constant 0 : index
    %139 = vector.load %arg17[%c0_158, %c1_159, %c0_160] : memref<2x12x96xf32, #tpu.memory_space<vmem>>, vector<2x8x96xf32>
    %140 = vector.shape_cast %139 : vector<2x8x96xf32> to vector<16x96xf32>
    %c1_161 = arith.constant 1 : index
    %c0_162 = arith.constant 0 : index
    %c0_163 = arith.constant 0 : index
    %141 = vector.load %arg6[%c1_161, %c0_162, %c0_163] : memref<5x96x128xf32, #tpu.memory_space<vmem>>, vector<1x96x128xf32>
    %142 = vector.shape_cast %141 : vector<1x96x128xf32> to vector<96x128xf32>
    %cst_164 = arith.constant dense<0.000000e+00> : vector<16x128xf32>
    %143 = tpu.matmul %140, %142, %cst_164 {dimension_numbers = #tpu.dot_dimension_numbers<[1], [0], [0], [1], [0, 0, 1, 1], [], []>} : vector<16x96xf32>, vector<96x128xf32>, vector<16x128xf32> -> vector<16x128xf32>
    %144 = vector.shape_cast %143 : vector<16x128xf32> to vector<2x8x128xf32>
    %c0_165 = arith.constant 0 : index
    %c0_166 = arith.constant 0 : index
    %c0_167 = arith.constant 0 : index
    %145 = vector.load %arg18[%c0_165, %c0_166, %c0_167] : memref<2x8x128xf32, #tpu.memory_space<vmem>>, vector<2x8x128xf32>
    %146 = arith.addf %145, %144 : vector<2x8x128xf32>
    %c0_168 = arith.constant 0 : index
    %c0_169 = arith.constant 0 : index
    %c0_170 = arith.constant 0 : index
    %147 = vector.load %arg18[%c0_168, %c0_169, %c0_170] : memref<2x8x128xf32, #tpu.memory_space<vmem>>, vector<2x8x128xf32>
    tpu.vector_store %arg18[%c0_168, %c0_169, %c0_170], %146 {strides = array<i32>} : memref<2x8x128xf32, #tpu.memory_space<vmem>>, vector<2x8x128xf32>,
    %c0_171 = arith.constant 0 : index
    %c2_172 = arith.constant 2 : index
    %c0_173 = arith.constant 0 : index
    %148 = vector.load %arg17[%c0_171, %c2_172, %c0_173] : memref<2x12x96xf32, #tpu.memory_space<vmem>>, vector<2x8x96xf32>
    %149 = vector.shape_cast %148 : vector<2x8x96xf32> to vector<16x96xf32>
    %c2_174 = arith.constant 2 : index
    %c0_175 = arith.constant 0 : index
    %c0_176 = arith.constant 0 : index
    %150 = vector.load %arg6[%c2_174, %c0_175, %c0_176] : memref<5x96x128xf32, #tpu.memory_space<vmem>>, vector<1x96x128xf32>
    %151 = vector.shape_cast %150 : vector<1x96x128xf32> to vector<96x128xf32>
    %cst_177 = arith.constant dense<0.000000e+00> : vector<16x128xf32>
    %152 = tpu.matmul %149, %151, %cst_177 {dimension_numbers = #tpu.dot_dimension_numbers<[1], [0], [0], [1], [0, 0, 1, 1], [], []>} : vector<16x96xf32>, vector<96x128xf32>, vector<16x128xf32> -> vector<16x128xf32>
    %153 = vector.shape_cast %152 : vector<16x128xf32> to vector<2x8x128xf32>
    %c0_178 = arith.constant 0 : index
    %c0_179 = arith.constant 0 : index
    %c0_180 = arith.constant 0 : index
    %154 = vector.load %arg18[%c0_178, %c0_179, %c0_180] : memref<2x8x128xf32, #tpu.memory_space<vmem>>, vector<2x8x128xf32>
    %155 = arith.addf %154, %153 : vector<2x8x128xf32>
    %c0_181 = arith.constant 0 : index
    %c0_182 = arith.constant 0 : index
    %c0_183 = arith.constant 0 : index
    %156 = vector.load %arg18[%c0_181, %c0_182, %c0_183] : memref<2x8x128xf32, #tpu.memory_space<vmem>>, vector<2x8x128xf32>
    tpu.vector_store %arg18[%c0_181, %c0_182, %c0_183], %155 {strides = array<i32>} : memref<2x8x128xf32, #tpu.memory_space<vmem>>, vector<2x8x128xf32>,
    %c0_184 = arith.constant 0 : index
    %c3_185 = arith.constant 3 : index
    %c0_186 = arith.constant 0 : index
    %157 = vector.load %arg17[%c0_184, %c3_185, %c0_186] : memref<2x12x96xf32, #tpu.memory_space<vmem>>, vector<2x8x96xf32>
    %158 = vector.shape_cast %157 : vector<2x8x96xf32> to vector<16x96xf32>
    %c3_187 = arith.constant 3 : index
    %c0_188 = arith.constant 0 : index
    %c0_189 = arith.constant 0 : index
    %159 = vector.load %arg6[%c3_187, %c0_188, %c0_189] : memref<5x96x128xf32, #tpu.memory_space<vmem>>, vector<1x96x128xf32>
    %160 = vector.shape_cast %159 : vector<1x96x128xf32> to vector<96x128xf32>
    %cst_190 = arith.constant dense<0.000000e+00> : vector<16x128xf32>
    %161 = tpu.matmul %158, %160, %cst_190 {dimension_numbers = #tpu.dot_dimension_numbers<[1], [0], [0], [1], [0, 0, 1, 1], [], []>} : vector<16x96xf32>, vector<96x128xf32>, vector<16x128xf32> -> vector<16x128xf32>
    %162 = vector.shape_cast %161 : vector<16x128xf32> to vector<2x8x128xf32>
    %c0_191 = arith.constant 0 : index
    %c0_192 = arith.constant 0 : index
    %c0_193 = arith.constant 0 : index
    %163 = vector.load %arg18[%c0_191, %c0_192, %c0_193] : memref<2x8x128xf32, #tpu.memory_space<vmem>>, vector<2x8x128xf32>
    %164 = arith.addf %163, %162 : vector<2x8x128xf32>
    %c0_194 = arith.constant 0 : index
    %c0_195 = arith.constant 0 : index
    %c0_196 = arith.constant 0 : index
    %165 = vector.load %arg18[%c0_194, %c0_195, %c0_196] : memref<2x8x128xf32, #tpu.memory_space<vmem>>, vector<2x8x128xf32>
    tpu.vector_store %arg18[%c0_194, %c0_195, %c0_196], %164 {strides = array<i32>} : memref<2x8x128xf32, #tpu.memory_space<vmem>>, vector<2x8x128xf32>,
    %c0_197 = arith.constant 0 : index
    %c4_198 = arith.constant 4 : index
    %c0_199 = arith.constant 0 : index
    %166 = vector.load %arg17[%c0_197, %c4_198, %c0_199] : memref<2x12x96xf32, #tpu.memory_space<vmem>>, vector<2x8x96xf32>
    %167 = vector.shape_cast %166 : vector<2x8x96xf32> to vector<16x96xf32>
    %c4_200 = arith.constant 4 : index
    %c0_201 = arith.constant 0 : index
    %c0_202 = arith.constant 0 : index
    %168 = vector.load %arg6[%c4_200, %c0_201, %c0_202] : memref<5x96x128xf32, #tpu.memory_space<vmem>>, vector<1x96x128xf32>
    %169 = vector.shape_cast %168 : vector<1x96x128xf32> to vector<96x128xf32>
    %cst_203 = arith.constant dense<0.000000e+00> : vector<16x128xf32>
    %170 = tpu.matmul %167, %169, %cst_203 {dimension_numbers = #tpu.dot_dimension_numbers<[1], [0], [0], [1], [0, 0, 1, 1], [], []>} : vector<16x96xf32>, vector<96x128xf32>, vector<16x128xf32> -> vector<16x128xf32>
    %171 = vector.shape_cast %170 : vector<16x128xf32> to vector<2x8x128xf32>
    %c0_204 = arith.constant 0 : index
    %c0_205 = arith.constant 0 : index
    %c0_206 = arith.constant 0 : index
    %172 = vector.load %arg18[%c0_204, %c0_205, %c0_206] : memref<2x8x128xf32, #tpu.memory_space<vmem>>, vector<2x8x128xf32>
    %173 = arith.addf %172, %171 : vector<2x8x128xf32>
    %c0_207 = arith.constant 0 : index
    %c0_208 = arith.constant 0 : index
    %c0_209 = arith.constant 0 : index
    %174 = vector.load %arg18[%c0_207, %c0_208, %c0_209] : memref<2x8x128xf32, #tpu.memory_space<vmem>>, vector<2x8x128xf32>
    tpu.vector_store %arg18[%c0_207, %c0_208, %c0_209], %173 {strides = array<i32>} : memref<2x8x128xf32, #tpu.memory_space<vmem>>, vector<2x8x128xf32>,
    %c0_210 = arith.constant 0 : index
    %c0_211 = arith.constant 0 : index
    %c0_212 = arith.constant 0 : index
    %175 = vector.load %arg18[%c0_210, %c0_211, %c0_212] : memref<2x8x128xf32, #tpu.memory_space<vmem>>, vector<2x8x128xf32>
    %cst_213 = arith.constant 0.000000e+00 : f32
    %176 = vector.broadcast %cst_213 : f32 to vector<2x8x128xf32>
    %177 = arith.maximumf %175, %176 : vector<2x8x128xf32>
    %c0_214 = arith.constant 0 : index
    %c0_215 = arith.constant 0 : index
    %c0_216 = arith.constant 0 : index
    %178 = vector.load %arg18[%c0_214, %c0_215, %c0_216] : memref<2x8x128xf32, #tpu.memory_space<vmem>>, vector<2x8x128xf32>
    tpu.vector_store %arg18[%c0_214, %c0_215, %c0_216], %177 {strides = array<i32>} : memref<2x8x128xf32, #tpu.memory_space<vmem>>, vector<2x8x128xf32>,
    %cst_217 = arith.constant 0.000000e+00 : f32
    %179 = vector.broadcast %cst_217 : f32 to vector<2x32xf32>
    %c0_218 = arith.constant 0 : index
    %c0_219 = arith.constant 0 : index
    %c0_220 = arith.constant 0 : index
    %180 = vector.load %arg18[%c0_218, %c0_219, %c0_220] : memref<2x8x128xf32, #tpu.memory_space<vmem>>, vector<2x1x128xf32>
    %181 = vector.shape_cast %180 : vector<2x1x128xf32> to vector<2x128xf32>
    %c0_221 = arith.constant 0 : index
    %c1_222 = arith.constant 1 : index
    %c0_223 = arith.constant 0 : index
    %182 = vector.load %arg18[%c0_221, %c1_222, %c0_223] : memref<2x8x128xf32, #tpu.memory_space<vmem>>, vector<2x1x128xf32>
    %183 = vector.shape_cast %182 : vector<2x1x128xf32> to vector<2x128xf32>
    %184 = arith.maximumf %181, %183 : vector<2x128xf32>
    %c0_224 = arith.constant 0 : index
    %c0_225 = arith.constant 0 : index
    %185 = vector.load %arg8[%c0_224, %c0_225] : memref<128x64xf32, #tpu.memory_space<vmem>>, vector<128x64xf32>
    %cst_226 = arith.constant dense<0.000000e+00> : vector<2x64xf32>
    %186 = tpu.matmul %184, %185, %cst_226 {dimension_numbers = #tpu.dot_dimension_numbers<[1], [0], [0], [1], [0, 0, 1, 1], [], []>} : vector<2x128xf32>, vector<128x64xf32>, vector<2x64xf32> -> vector<2x64xf32>
    %c0_227 = arith.constant 0 : index
    %c0_228 = arith.constant 0 : index
    %187 = vector.load %arg9[%c0_227, %c0_228] : memref<128x64xf32, #tpu.memory_space<vmem>>, vector<128x64xf32>
    %cst_229 = arith.constant dense<0.000000e+00> : vector<2x64xf32>
    %188 = tpu.matmul %184, %187, %cst_229 {dimension_numbers = #tpu.dot_dimension_numbers<[1], [0], [0], [1], [0, 0, 1, 1], [], []>} : vector<2x128xf32>, vector<128x64xf32>, vector<2x64xf32> -> vector<2x64xf32>
    %189 = arith.maximumf %186, %188 : vector<2x64xf32>
    %c0_230 = arith.constant 0 : index
    %c0_231 = arith.constant 0 : index
    %c0_232 = arith.constant 0 : index
    %190 = vector.load %arg10[%c0_230, %c0_231, %c0_232] : memref<4x64x32xf32, #tpu.memory_space<vmem>>, vector<1x64x32xf32>
    %191 = vector.shape_cast %190 : vector<1x64x32xf32> to vector<64x32xf32>
    %cst_233 = arith.constant dense<0.000000e+00> : vector<2x32xf32>
    %192 = tpu.matmul %189, %191, %cst_233 {dimension_numbers = #tpu.dot_dimension_numbers<[1], [0], [0], [1], [0, 0, 1, 1], [], []>} : vector<2x64xf32>, vector<64x32xf32>, vector<2x32xf32> -> vector<2x32xf32>
    %193 = arith.addf %179, %192 : vector<2x32xf32>
    %c0_234 = arith.constant 0 : index
    %c2_235 = arith.constant 2 : index
    %c0_236 = arith.constant 0 : index
    %194 = vector.load %arg18[%c0_234, %c2_235, %c0_236] : memref<2x8x128xf32, #tpu.memory_space<vmem>>, vector<2x1x128xf32>
    %195 = vector.shape_cast %194 : vector<2x1x128xf32> to vector<2x128xf32>
    %c0_237 = arith.constant 0 : index
    %c3_238 = arith.constant 3 : index
    %c0_239 = arith.constant 0 : index
    %196 = vector.load %arg18[%c0_237, %c3_238, %c0_239] : memref<2x8x128xf32, #tpu.memory_space<vmem>>, vector<2x1x128xf32>
    %197 = vector.shape_cast %196 : vector<2x1x128xf32> to vector<2x128xf32>
    %198 = arith.maximumf %195, %197 : vector<2x128xf32>
    %c0_240 = arith.constant 0 : index
    %c0_241 = arith.constant 0 : index
    %199 = vector.load %arg8[%c0_240, %c0_241] : memref<128x64xf32, #tpu.memory_space<vmem>>, vector<128x64xf32>
    %cst_242 = arith.constant dense<0.000000e+00> : vector<2x64xf32>
    %200 = tpu.matmul %198, %199, %cst_242 {dimension_numbers = #tpu.dot_dimension_numbers<[1], [0], [0], [1], [0, 0, 1, 1], [], []>} : vector<2x128xf32>, vector<128x64xf32>, vector<2x64xf32> -> vector<2x64xf32>
    %c0_243 = arith.constant 0 : index
    %c0_244 = arith.constant 0 : index
    %201 = vector.load %arg9[%c0_243, %c0_244] : memref<128x64xf32, #tpu.memory_space<vmem>>, vector<128x64xf32>
    %cst_245 = arith.constant dense<0.000000e+00> : vector<2x64xf32>
    %202 = tpu.matmul %198, %201, %cst_245 {dimension_numbers = #tpu.dot_dimension_numbers<[1], [0], [0], [1], [0, 0, 1, 1], [], []>} : vector<2x128xf32>, vector<128x64xf32>, vector<2x64xf32> -> vector<2x64xf32>
    %203 = arith.maximumf %200, %202 : vector<2x64xf32>
    %c1_246 = arith.constant 1 : index
    %c0_247 = arith.constant 0 : index
    %c0_248 = arith.constant 0 : index
    %204 = vector.load %arg10[%c1_246, %c0_247, %c0_248] : memref<4x64x32xf32, #tpu.memory_space<vmem>>, vector<1x64x32xf32>
    %205 = vector.shape_cast %204 : vector<1x64x32xf32> to vector<64x32xf32>
    %cst_249 = arith.constant dense<0.000000e+00> : vector<2x32xf32>
    %206 = tpu.matmul %203, %205, %cst_249 {dimension_numbers = #tpu.dot_dimension_numbers<[1], [0], [0], [1], [0, 0, 1, 1], [], []>} : vector<2x64xf32>, vector<64x32xf32>, vector<2x32xf32> -> vector<2x32xf32>
    %207 = arith.addf %193, %206 : vector<2x32xf32>
    %c0_250 = arith.constant 0 : index
    %c4_251 = arith.constant 4 : index
    %c0_252 = arith.constant 0 : index
    %208 = vector.load %arg18[%c0_250, %c4_251, %c0_252] : memref<2x8x128xf32, #tpu.memory_space<vmem>>, vector<2x1x128xf32>
    %209 = vector.shape_cast %208 : vector<2x1x128xf32> to vector<2x128xf32>
    %c0_253 = arith.constant 0 : index
    %c5_254 = arith.constant 5 : index
    %c0_255 = arith.constant 0 : index
    %210 = vector.load %arg18[%c0_253, %c5_254, %c0_255] : memref<2x8x128xf32, #tpu.memory_space<vmem>>, vector<2x1x128xf32>
    %211 = vector.shape_cast %210 : vector<2x1x128xf32> to vector<2x128xf32>
    %212 = arith.maximumf %209, %211 : vector<2x128xf32>
    %c0_256 = arith.constant 0 : index
    %c0_257 = arith.constant 0 : index
    %213 = vector.load %arg8[%c0_256, %c0_257] : memref<128x64xf32, #tpu.memory_space<vmem>>, vector<128x64xf32>
    %cst_258 = arith.constant dense<0.000000e+00> : vector<2x64xf32>
    %214 = tpu.matmul %212, %213, %cst_258 {dimension_numbers = #tpu.dot_dimension_numbers<[1], [0], [0], [1], [0, 0, 1, 1], [], []>} : vector<2x128xf32>, vector<128x64xf32>, vector<2x64xf32> -> vector<2x64xf32>
    %c0_259 = arith.constant 0 : index
    %c0_260 = arith.constant 0 : index
    %215 = vector.load %arg9[%c0_259, %c0_260] : memref<128x64xf32, #tpu.memory_space<vmem>>, vector<128x64xf32>
    %cst_261 = arith.constant dense<0.000000e+00> : vector<2x64xf32>
    %216 = tpu.matmul %212, %215, %cst_261 {dimension_numbers = #tpu.dot_dimension_numbers<[1], [0], [0], [1], [0, 0, 1, 1], [], []>} : vector<2x128xf32>, vector<128x64xf32>, vector<2x64xf32> -> vector<2x64xf32>
    %217 = arith.maximumf %214, %216 : vector<2x64xf32>
    %c2_262 = arith.constant 2 : index
    %c0_263 = arith.constant 0 : index
    %c0_264 = arith.constant 0 : index
    %218 = vector.load %arg10[%c2_262, %c0_263, %c0_264] : memref<4x64x32xf32, #tpu.memory_space<vmem>>, vector<1x64x32xf32>
    %219 = vector.shape_cast %218 : vector<1x64x32xf32> to vector<64x32xf32>
    %cst_265 = arith.constant dense<0.000000e+00> : vector<2x32xf32>
    %220 = tpu.matmul %217, %219, %cst_265 {dimension_numbers = #tpu.dot_dimension_numbers<[1], [0], [0], [1], [0, 0, 1, 1], [], []>} : vector<2x64xf32>, vector<64x32xf32>, vector<2x32xf32> -> vector<2x32xf32>
    %221 = arith.addf %207, %220 : vector<2x32xf32>
    %c0_266 = arith.constant 0 : index
    %c6_267 = arith.constant 6 : index
    %c0_268 = arith.constant 0 : index
    %222 = vector.load %arg18[%c0_266, %c6_267, %c0_268] : memref<2x8x128xf32, #tpu.memory_space<vmem>>, vector<2x1x128xf32>
    %223 = vector.shape_cast %222 : vector<2x1x128xf32> to vector<2x128xf32>
    %c0_269 = arith.constant 0 : index
    %c7_270 = arith.constant 7 : index
    %c0_271 = arith.constant 0 : index
    %224 = vector.load %arg18[%c0_269, %c7_270, %c0_271] : memref<2x8x128xf32, #tpu.memory_space<vmem>>, vector<2x1x128xf32>
    %225 = vector.shape_cast %224 : vector<2x1x128xf32> to vector<2x128xf32>
    %226 = arith.maximumf %223, %225 : vector<2x128xf32>
    %c0_272 = arith.constant 0 : index
    %c0_273 = arith.constant 0 : index
    %227 = vector.load %arg8[%c0_272, %c0_273] : memref<128x64xf32, #tpu.memory_space<vmem>>, vector<128x64xf32>
    %cst_274 = arith.constant dense<0.000000e+00> : vector<2x64xf32>
    %228 = tpu.matmul %226, %227, %cst_274 {dimension_numbers = #tpu.dot_dimension_numbers<[1], [0], [0], [1], [0, 0, 1, 1], [], []>} : vector<2x128xf32>, vector<128x64xf32>, vector<2x64xf32> -> vector<2x64xf32>
    %c0_275 = arith.constant 0 : index
    %c0_276 = arith.constant 0 : index
    %229 = vector.load %arg9[%c0_275, %c0_276] : memref<128x64xf32, #tpu.memory_space<vmem>>, vector<128x64xf32>
    %cst_277 = arith.constant dense<0.000000e+00> : vector<2x64xf32>
    %230 = tpu.matmul %226, %229, %cst_277 {dimension_numbers = #tpu.dot_dimension_numbers<[1], [0], [0], [1], [0, 0, 1, 1], [], []>} : vector<2x128xf32>, vector<128x64xf32>, vector<2x64xf32> -> vector<2x64xf32>
    %231 = arith.maximumf %228, %230 : vector<2x64xf32>
    %c3_278 = arith.constant 3 : index
    %c0_279 = arith.constant 0 : index
    %c0_280 = arith.constant 0 : index
    %232 = vector.load %arg10[%c3_278, %c0_279, %c0_280] : memref<4x64x32xf32, #tpu.memory_space<vmem>>, vector<1x64x32xf32>
    %233 = vector.shape_cast %232 : vector<1x64x32xf32> to vector<64x32xf32>
    %cst_281 = arith.constant dense<0.000000e+00> : vector<2x32xf32>
    %234 = tpu.matmul %231, %233, %cst_281 {dimension_numbers = #tpu.dot_dimension_numbers<[1], [0], [0], [1], [0, 0, 1, 1], [], []>} : vector<2x64xf32>, vector<64x32xf32>, vector<2x32xf32> -> vector<2x32xf32>
    %235 = arith.addf %221, %234 : vector<2x32xf32>
    %c0_282 = arith.constant 0 : index
    %c0_283 = arith.constant 0 : index
    %236 = vector.load %arg11[%c0_282, %c0_283] : memref<1x32xf32, #tpu.memory_space<vmem>>, vector<1x32xf32>
    %237 = vector.broadcast %236 : vector<1x32xf32> to vector<2x32xf32>
    %238 = arith.addf %235, %237 : vector<2x32xf32>
    %cst_284 = arith.constant 0.000000e+00 : f32
    %239 = vector.broadcast %cst_284 : f32 to vector<2x32xf32>
    %240 = arith.maximumf %238, %239 : vector<2x32xf32>
    %c0_285 = arith.constant 0 : index
    %c0_286 = arith.constant 0 : index
    %241 = vector.load %arg12[%c0_285, %c0_286] : memref<32x128xf32, #tpu.memory_space<vmem>>, vector<32x128xf32>
    %cst_287 = arith.constant dense<0.000000e+00> : vector<2x128xf32>
    %242 = tpu.matmul %240, %241, %cst_287 {dimension_numbers = #tpu.dot_dimension_numbers<[1], [0], [0], [1], [0, 0, 1, 1], [], []>} : vector<2x32xf32>, vector<32x128xf32>, vector<2x128xf32> -> vector<2x128xf32>
    %c0_288 = arith.constant 0 : index
    %c0_289 = arith.constant 0 : index
    %243 = vector.load %arg13[%c0_288, %c0_289] : memref<1x128xf32, #tpu.memory_space<vmem>>, vector<1x128xf32>
    %244 = vector.broadcast %243 : vector<1x128xf32> to vector<2x128xf32>
    %245 = arith.addf %242, %244 : vector<2x128xf32>
    %c0_290 = arith.constant 0 : index
    %c0_291 = arith.constant 0 : index
    %246 = vector.load %arg14[%c0_290, %c0_291] : memref<2x128xf32, #tpu.memory_space<vmem>>, vector<2x128xf32>
    tpu.vector_store %arg14[%c0_290, %c0_291], %245 {strides = array<i32>} : memref<2x128xf32, #tpu.memory_space<vmem>>, vector<2x128xf32>,
    return
  }
  func.func @transform_0(%arg0: i32) -> (i32, i32, i32) {
    %c0_i32 = arith.constant 0 : i32
    %c0_i32_0 = arith.constant 0 : i32
    %c0_i32_1 = arith.constant 0 : i32
    return %arg0, %c0_i32, %c0_i32_0 : i32, i32, i32
  }
  func.func @transform_1(%arg0: i32) -> (i32, i32, i32) {
    %c0_i32 = arith.constant 0 : i32
    %c0_i32_0 = arith.constant 0 : i32
    %c0_i32_1 = arith.constant 0 : i32
    %c0_i32_2 = arith.constant 0 : i32
    return %c0_i32, %c0_i32_0, %c0_i32_1 : i32, i32, i32
  }
  func.func @transform_2(%arg0: i32) -> (i32, i32) {
    %c0_i32 = arith.constant 0 : i32
    %c0_i32_0 = arith.constant 0 : i32
    %c0_i32_1 = arith.constant 0 : i32
    return %c0_i32, %c0_i32_0 : i32, i32
  }
  func.func @transform_3(%arg0: i32) -> (i32, i32) {
    %c0_i32 = arith.constant 0 : i32
    %c0_i32_0 = arith.constant 0 : i32
    %c0_i32_1 = arith.constant 0 : i32
    return %c0_i32, %c0_i32_0 : i32, i32
  }
  func.func @transform_4(%arg0: i32) -> (i32, i32) {
    %c0_i32 = arith.constant 0 : i32
    %c0_i32_0 = arith.constant 0 : i32
    %c0_i32_1 = arith.constant 0 : i32
    return %c0_i32, %c0_i32_0 : i32, i32
  }
  func.func @transform_5(%arg0: i32) -> (i32, i32, i32) {
    %c0_i32 = arith.constant 0 : i32
    %c0_i32_0 = arith.constant 0 : i32
    %c0_i32_1 = arith.constant 0 : i32
    %c0_i32_2 = arith.constant 0 : i32
    return %c0_i32, %c0_i32_0, %c0_i32_1 : i32, i32, i32
  }
  func.func @transform_6(%arg0: i32) -> (i32, i32) {
    %c0_i32 = arith.constant 0 : i32
    %c0_i32_0 = arith.constant 0 : i32
    %c0_i32_1 = arith.constant 0 : i32
    return %c0_i32, %c0_i32_0 : i32, i32
  }
  func.func @transform_7(%arg0: i32) -> (i32, i32) {
    %c0_i32 = arith.constant 0 : i32
    %c0_i32_0 = arith.constant 0 : i32
    %c0_i32_1 = arith.constant 0 : i32
    return %c0_i32, %c0_i32_0 : i32, i32
  }
  func.func @transform_8(%arg0: i32) -> (i32, i32) {
    %c0_i32 = arith.constant 0 : i32
    %c0_i32_0 = arith.constant 0 : i32
    %c0_i32_1 = arith.constant 0 : i32
    return %c0_i32, %c0_i32_0 : i32, i32
  }
  func.func @transform_9(%arg0: i32) -> (i32, i32, i32) {
    %c0_i32 = arith.constant 0 : i32
    %c0_i32_0 = arith.constant 0 : i32
    %c0_i32_1 = arith.constant 0 : i32
    %c0_i32_2 = arith.constant 0 : i32
    return %c0_i32, %c0_i32_0, %c0_i32_1 : i32, i32, i32
  }
  func.func @transform_10(%arg0: i32) -> (i32, i32) {
    %c0_i32 = arith.constant 0 : i32
    %c0_i32_0 = arith.constant 0 : i32
    %c0_i32_1 = arith.constant 0 : i32
    return %c0_i32, %c0_i32_0 : i32, i32
  }
  func.func @transform_11(%arg0: i32) -> (i32, i32) {
    %c0_i32 = arith.constant 0 : i32
    %c0_i32_0 = arith.constant 0 : i32
    %c0_i32_1 = arith.constant 0 : i32
    return %c0_i32, %c0_i32_0 : i32, i32
  }
  func.func @transform_12(%arg0: i32) -> (i32, i32) {
    %c0_i32 = arith.constant 0 : i32
    %c0_i32_0 = arith.constant 0 : i32
    %c0_i32_1 = arith.constant 0 : i32
    return %c0_i32, %c0_i32_0 : i32, i32
  }
  func.func @transform_13(%arg0: i32) -> (i32, i32) {
    %c0_i32 = arith.constant 0 : i32
    %c0_i32_0 = arith.constant 0 : i32
    return %arg0, %c0_i32 : i32, i32
  }
}

</mosaic_0001>

<bundles_post_ra>
// kernel: tile.18
= control target key start
LH: loop header
LB: loop body
LE: loop exit
PB: predicated region body
PF: predicated region fallthrough
CT: control target
= control target key end

     0   :  { %2 = vsyncpa [#allocation1], 0  ;;  %s42_s6 = smov [#allocation0]   ;;  %s59_s0 = inlined_call_operand.hbm [shape: f32[16], index: 0, kind: input, shape index: {}]   ;;  %s60_s1 = inlined_call_operand.vmem [shape: f32[8,16], index: 1, kind: output, shape index: {}]  }
   0x1   :  { %s9_s7 = sshll.u32 %s42_s6, 4  ;;  %s10_s7 = int_to_ptr.vmem [resolvable:$true] %s9_s7 }
   0x2   :  { %s28_s8 = scalar_lea.vmem %s10_s7, 16  ;;  %s32_s9 = scalar_lea.vmem %s10_s7, 32 }
   0x3   :  { %p29_p0 = scmp.ne.s32.totalorder %s10_s7, %s28_s8  ;;  %p33_p1 = scmp.lt.s32.totalorder %s10_s7, %s10_s7 }
   0x4   :  { %p34_p2 = scmp.lt.s32.totalorder %s32_s9, %s28_s8 }
   0x6   :  { %p35_p3 = por %p34_p2, %p33_p1 }
   0x8   :  { %p36_p4 = pnand %p35_p3, %p29_p0 }
   0xa   :  { %39 = shalt.err (!%p36_p4)
}
   0xb   :  { %12 = dma.hbm_to_vmem [thread:$0]  %s59_s0, 16, %s10_s7, [#allocation1]  }
   0xc   :  { %40 = dma.done.wait [#allocation1], 16  }
   0xd   :  { %41 = vsyncadd [#allocation1], 4294967280  ;;  %v16_v0 = vld [vmem:[#allocation0] ss:$0 sm:$0xff] }
   0xe   :  { %17 = vst [vmem:[%s60_s1] sm:$0xff] %v16_v0 }
   0xf   :  { %18 = vsyncpa [#allocation1], 1 }

// kernel: tile.19
= control target key start
LH: loop header
LB: loop body
LE: loop exit
PB: predicated region body
PF: predicated region fallthrough
CT: control target
= control target key end

     0   :  { %s69_s10 = smov 112   ;;  %s70_s11 = smov 80   ;;  %vm3_vm0 = vcmask 130048   ;;  %vm9_vm1 = vcmask 1048448   ;;  %vm15_vm2 = vcmask 917248   ;;  %vm21_vm3 = vcmask 786048   ;;  %s113_s0 = inlined_call_operand.vmem [shape: f32[8,16], index: 0, kind: input, shape index: {}]   ;;  %s114_s1 = inlined_call_operand.vmem [shape: f32[1,128], index: 1, kind: output, shape index: {}]  }
   0x1   :  { %v55_v0 = vld [vmem:[%s113_s0 + $0x7] sm:$0x1]   ;;  %v57_v1 = vld [vmem:[%s113_s0 + $0x5] sm:$0x1]   ;;  %v56_v2 = vld [vmem:[%s113_s0 + $0x6] sm:$0x1]  }
   0x2   :  { %7 = vrot.lane.b32.xlu0 %v55_v0, %s69_s10  ;;  %19 = vrot.lane.b32.xlu1 %v57_v1, %s70_s11  ;;  %v58_v3 = vld [vmem:[%s113_s0 + $0x4] sm:$0x1]   ;;  %v2_v4 = vld [vmem:[%s113_s0] sm:$0x1]   ;;  %s71_s18 = smov 96   ;;  %s72_s19 = smov 64  }
   0x3   :  { %4 = vst.msk [vmem:[#allocation0] sm:$0x1] %vm3_vm0, %v2_v4   ;;  %v59_v5 = vld [vmem:[%s113_s0 + $0x3] sm:$0x1]   ;;  %v60_v6 = vld [vmem:[%s113_s0 + $0x2] sm:$0x1]  }
   0x4   :  { %s73_s24 = smov 48   ;;  %s74_s25 = smov 32   ;;  %v61_v7 = vld [vmem:[%s113_s0 + $0x1] sm:$0x1]   ;;  %vm27_vm4 = vcmask 654848   ;;  %vm33_vm5 = vcmask 523648  }
   0x5   :  { %s75_s0 = smov 16   ;;  %vm39_vm6 = vcmask 392448   ;;  %vm45_vm7 = vcmask 261248  }
   0x6   :  { %13 = vrot.lane.b32.xlu0 %v56_v2, %s71_s18  ;;  %25 = vrot.lane.b32.xlu1 %v58_v3, %s72_s19 }
   0xa   :  { %31 = vrot.lane.b32.xlu0 %v59_v5, %s73_s24  ;;  %37 = vrot.lane.b32.xlu1 %v60_v6, %s74_s25 }
   0xe   :  { %43 = vrot.lane.b32.xlu0 %v61_v7, %s75_s0 }
  0x74   :  { %v8_v8 = vpop.permute.xlu0 %7   ;;  %v20_v9 = vpop.permute.xlu1 %19  }
  0x75   :  { %10 = vst.msk [vmem:[#allocation0] sm:$0x1] %vm9_vm1, %v8_v8  }
  0x78   :  { %v14_v10 = vpop.permute.xlu0 %13   ;;  %v26_v11 = vpop.permute.xlu1 %25  }
  0x79   :  { %16 = vst.msk [vmem:[#allocation0] sm:$0x1] %vm15_vm2, %v14_v10  }
  0x7a   :  { %22 = vst.msk [vmem:[#allocation0] sm:$0x1] %vm21_vm3, %v20_v9  }
  0x7b   :  { %28 = vst.msk [vmem:[#allocation0] sm:$0x1] %vm27_vm4, %v26_v11  }
  0x7c   :  { %v32_v12 = vpop.permute.xlu0 %31   ;;  %v38_v13 = vpop.permute.xlu1 %37  }
  0x7d   :  { %34 = vst.msk [vmem:[#allocation0] sm:$0x1] %vm33_vm5, %v32_v12  }
  0x7e   :  { %40 = vst.msk [vmem:[#allocation0] sm:$0x1] %vm39_vm6, %v38_v13  }
  0x80   :  { %v44_v14 = vpop.permute.xlu0 %43  }
  0x81   :  { %46 = vst.msk [vmem:[#allocation0] sm:$0x1] %vm45_vm7, %v44_v14  }
  0x88   :  { %v51_v15 = vld [vmem:[#allocation0] sm:$0x1] }
  0x89   :  { %54 = vst [vmem:[%s114_s1] sm:$0x1] %v51_v15 }

// kernel: tile.13
= control target key start
LH: loop header
LB: loop body
LE: loop exit
PB: predicated region body
PF: predicated region fallthrough
CT: control target
= control target key end

     0   :  { %2 = vsyncpa [#allocation1], 0  ;;  %s45_s6 = smov [#allocation0]   ;;  %s65_s0 = inlined_call_operand.hbm [shape: f32[8], index: 0, kind: input, shape index: {}]   ;;  %s66_s1 = inlined_call_operand.vmem [shape: f32[16,8], index: 1, kind: output, shape index: {}]  }
   0x1   :  { %s9_s7 = sshll.u32 %s45_s6, 4  ;;  %s10_s7 = int_to_ptr.vmem [resolvable:$true] %s9_s7 }
   0x2   :  { %s31_s8 = scalar_lea.vmem %s10_s7, 16  ;;  %s35_s9 = scalar_lea.vmem %s10_s7, 32 }
   0x3   :  { %p32_p0 = scmp.ne.s32.totalorder %s10_s7, %s31_s8  ;;  %p36_p1 = scmp.lt.s32.totalorder %s10_s7, %s10_s7 }
   0x4   :  { %p37_p2 = scmp.lt.s32.totalorder %s35_s9, %s31_s8 }
   0x6   :  { %p38_p3 = por %p37_p2, %p36_p1 }
   0x8   :  { %p39_p4 = pnand %p38_p3, %p32_p0 }
   0xa   :  { %42 = shalt.err (!%p39_p4)
}
   0xb   :  { %12 = dma.hbm_to_vmem [thread:$0]  %s65_s0, 16, %s10_s7, [#allocation1]  }
   0xc   :  { %43 = dma.done.wait [#allocation1], 16  }
   0xd   :  { %44 = vsyncadd [#allocation1], 4294967280  ;;  %v16_v0 = vld [vmem:[#allocation0] ss:$0 sm:$0xff] }
   0xe   :  { %17 = vst [vmem:[%s66_s1] sm:$0xff] %v16_v0  ;;  %21 = vst [vmem:[%s66_s1 + $0x8] sm:$0xff] %v16_v0 }
   0xf   :  { %20 = vsyncpa [#allocation1], 1 }

// kernel: tile.14
= control target key start
LH: loop header
LB: loop body
LE: loop exit
PB: predicated region body
PF: predicated region fallthrough
CT: control target
= control target key end

     0   :  { %s133_s10 = smov 120   ;;  %s134_s11 = smov 104   ;;  %vm3_vm0 = vcmask 64512   ;;  %vm9_vm1 = vcmask 1048512   ;;  %vm15_vm2 = vcmask 982912   ;;  %vm21_vm3 = vcmask 917312   ;;  %s209_s0 = inlined_call_operand.vmem [shape: f32[16,8], index: 0, kind: input, shape index: {}]   ;;  %s210_s1 = inlined_call_operand.vmem [shape: f32[1,128], index: 1, kind: output, shape index: {}]  }
   0x1   :  { %v103_v0 = vld [vmem:[%s209_s0 + $0xf] sm:$0x1]   ;;  %v105_v1 = vld [vmem:[%s209_s0 + $0xd] sm:$0x1]   ;;  %v104_v2 = vld [vmem:[%s209_s0 + $0xe] sm:$0x1]  }
   0x2   :  { %7 = vrot.lane.b32.xlu0 %v103_v0, %s133_s10  ;;  %19 = vrot.lane.b32.xlu1 %v105_v1, %s134_s11  ;;  %v106_v3 = vld [vmem:[%s209_s0 + $0xc] sm:$0x1]   ;;  %s135_s16 = smov 112   ;;  %s136_s17 = smov 96   ;;  %v107_v4 = vld [vmem:[%s209_s0 + $0xb] sm:$0x1]  }
   0x3   :  { %v108_v5 = vld [vmem:[%s209_s0 + $0xa] sm:$0x1]   ;;  %v2_v6 = vld [vmem:[%s209_s0] sm:$0x1]   ;;  %s137_s24 = smov 88   ;;  %s138_s25 = smov 80  }
   0x4   :  { %4 = vst.msk [vmem:[#allocation0] sm:$0x1] %vm3_vm0, %v2_v6   ;;  %v109_v7 = vld [vmem:[%s209_s0 + $0x9] sm:$0x1]   ;;  %v110_v8 = vld [vmem:[%s209_s0 + $0x8] sm:$0x1]  }
   0x5   :  { %s139_s30 = smov 72   ;;  %s140_s2 = smov 64   ;;  %v111_v9 = vld [vmem:[%s209_s0 + $0x7] sm:$0x1]   ;;  %v112_v10 = vld [vmem:[%s209_s0 + $0x6] sm:$0x1]  }
   0x6   :  { %13 = vrot.lane.b32.xlu0 %v104_v2, %s135_s16  ;;  %25 = vrot.lane.b32.xlu1 %v106_v3, %s136_s17  ;;  %s141_s7 = smov 56   ;;  %s142_s8 = smov 48   ;;  %v113_v11 = vld [vmem:[%s209_s0 + $0x5] sm:$0x1]   ;;  %v114_v12 = vld [vmem:[%s209_s0 + $0x4] sm:$0x1]  }
   0x7   :  { %s143_s13 = smov 40   ;;  %s144_s14 = smov 32   ;;  %v115_v13 = vld [vmem:[%s209_s0 + $0x3] sm:$0x1]   ;;  %v116_v14 = vld [vmem:[%s209_s0 + $0x2] sm:$0x1]  }
   0x8   :  { %s145_s19 = smov 24   ;;  %s146_s20 = smov 16   ;;  %v117_v15 = vld [vmem:[%s209_s0 + $0x1] sm:$0x1]   ;;  %vm27_vm4 = vcmask 851712   ;;  %vm33_vm5 = vcmask 786112  }
   0x9   :  { %s147_s0 = smov 8   ;;  %vm39_vm6 = vcmask 720512   ;;  %vm45_vm7 = vcmask 654912   ;;  %vm51_vm8 = vcmask 589312   ;;  %vm57_vm9 = vcmask 523712  }
   0xa   :  { %31 = vrot.lane.b32.xlu0 %v107_v4, %s137_s24  ;;  %37 = vrot.lane.b32.xlu1 %v108_v5, %s138_s25  ;;  %vm63_vm10 = vcmask 458112   ;;  %vm69_vm11 = vcmask 392512   ;;  %vm75_vm12 = vcmask 326912   ;;  %vm81_vm13 = vcmask 261312  }
   0xb   :  { %vm87_vm14 = vcmask 195712   ;;  %vm93_vm15 = vcmask 130112  }
   0xe   :  { %43 = vrot.lane.b32.xlu0 %v109_v7, %s139_s30  ;;  %49 = vrot.lane.b32.xlu1 %v110_v8, %s140_s2 }
  0x12   :  { %55 = vrot.lane.b32.xlu0 %v111_v9, %s141_s7  ;;  %61 = vrot.lane.b32.xlu1 %v112_v10, %s142_s8 }
  0x16   :  { %67 = vrot.lane.b32.xlu0 %v113_v11, %s143_s13  ;;  %73 = vrot.lane.b32.xlu1 %v114_v12, %s144_s14 }
  0x1a   :  { %79 = vrot.lane.b32.xlu0 %v115_v13, %s145_s19  ;;  %85 = vrot.lane.b32.xlu1 %v116_v14, %s146_s20 }
  0x1e   :  { %91 = vrot.lane.b32.xlu0 %v117_v15, %s147_s0 }
  0x74   :  { %v8_v16 = vpop.permute.xlu0 %7   ;;  %v20_v17 = vpop.permute.xlu1 %19  }
  0x75   :  { %10 = vst.msk [vmem:[#allocation0] sm:$0x1] %vm9_vm1, %v8_v16  }
  0x78   :  { %v14_v18 = vpop.permute.xlu0 %13   ;;  %v26_v19 = vpop.permute.xlu1 %25  }
  0x79   :  { %16 = vst.msk [vmem:[#allocation0] sm:$0x1] %vm15_vm2, %v14_v18  }
  0x7a   :  { %22 = vst.msk [vmem:[#allocation0] sm:$0x1] %vm21_vm3, %v20_v17  }
  0x7b   :  { %28 = vst.msk [vmem:[#allocation0] sm:$0x1] %vm27_vm4, %v26_v19  }
  0x7c   :  { %v32_v20 = vpop.permute.xlu0 %31   ;;  %v38_v21 = vpop.permute.xlu1 %37  }
  0x7d   :  { %34 = vst.msk [vmem:[#allocation0] sm:$0x1] %vm33_vm5, %v32_v20  }
  0x7e   :  { %40 = vst.msk [vmem:[#allocation0] sm:$0x1] %vm39_vm6, %v38_v21  }
  0x80   :  { %v44_v22 = vpop.permute.xlu0 %43   ;;  %v50_v23 = vpop.permute.xlu1 %49  }
  0x81   :  { %46 = vst.msk [vmem:[#allocation0] sm:$0x1] %vm45_vm7, %v44_v22  }
  0x82   :  { %52 = vst.msk [vmem:[#allocation0] sm:$0x1] %vm51_vm8, %v50_v23  }
  0x84   :  { %v56_v24 = vpop.permute.xlu0 %55   ;;  %v62_v25 = vpop.permute.xlu1 %61  }
  0x85   :  { %58 = vst.msk [vmem:[#allocation0] sm:$0x1] %vm57_vm9, %v56_v24  }
  0x86   :  { %64 = vst.msk [vmem:[#allocation0] sm:$0x1] %vm63_vm10, %v62_v25  }
  0x88   :  { %v68_v26 = vpop.permute.xlu0 %67   ;;  %v74_v27 = vpop.permute.xlu1 %73  }
  0x89   :  { %70 = vst.msk [vmem:[#allocation0] sm:$0x1] %vm69_vm11, %v68_v26  }
  0x8a   :  { %76 = vst.msk [vmem:[#allocation0] sm:$0x1] %vm75_vm12, %v74_v27  }
  0x8c   :  { %v80_v28 = vpop.permute.xlu0 %79   ;;  %v86_v29 = vpop.permute.xlu1 %85  }
  0x8d   :  { %82 = vst.msk [vmem:[#allocation0] sm:$0x1] %vm81_vm13, %v80_v28  }
  0x8e   :  { %88 = vst.msk [vmem:[#allocation0] sm:$0x1] %vm87_vm14, %v86_v29  }
  0x90   :  { %v92_v30 = vpop.permute.xlu0 %91  }
  0x91   :  { %94 = vst.msk [vmem:[#allocation0] sm:$0x1] %vm93_vm15, %v92_v30  }
  0x98   :  { %v99_v31 = vld [vmem:[#allocation0] sm:$0x1] }
  0x99   :  { %102 = vst [vmem:[%s210_s1] sm:$0x1] %v99_v31 }

// kernel: cnn2d_forward.1
= control target key start
LH: loop header
LB: loop body
LE: loop exit
PB: predicated region body
PF: predicated region fallthrough
CT: control target
= control target key end

     0   :  { %vm59_vm0 = vcmask 654336   ;;  %s4995_s0 = inlined_call_operand.vmem [shape: f32[2,20,80], index: 0, kind: input, shape index: {}]   ;;  %s4996_s1 = inlined_call_operand.vmem [shape: f32[5,80,128], index: 1, kind: input, shape index: {}]   ;;  %s4997_s2 = inlined_call_operand.vmem [shape: f32[1,128], index: 2, kind: input, shape index: {}]   ;;  %s4998_s3 = inlined_call_operand.vmem [shape: f32[128,96], index: 3, kind: input, shape index: {}]   ;;  %s4999_s4 = inlined_call_operand.vmem [shape: f32[128,96], index: 4, kind: input, shape index: {}]   ;;  %s5000_s5 = inlined_call_operand.vmem [shape: f32[5,96,128], index: 5, kind: input, shape index: {}]   ;;  %s5001_s6 = inlined_call_operand.vmem [shape: f32[1,128], index: 6, kind: input, shape index: {}]   ;;  %s5002_s7 = inlined_call_operand.vmem [shape: f32[128,64], index: 7, kind: input, shape index: {}]   ;;  %s5003_s8 = inlined_call_operand.vmem [shape: f32[128,64], index: 8, kind: input, shape index: {}]   ;;  %s5004_s9 = inlined_call_operand.vmem [shape: f32[4,64,32], index: 9, kind: input, shape index: {}]   ;;  %s5005_s10 = inlined_call_operand.vmem [shape: f32[1,32], index: 10, kind: input, shape index: {}]   ;;  %s5006_s11 = inlined_call_operand.vmem [shape: f32[32,128], index: 11, kind: input, shape index: {}]   ;;  %s5007_s12 = inlined_call_operand.vmem [shape: f32[1,128], index: 12, kind: input, shape index: {}]   ;;  %s5008_s13 = inlined_call_operand.hbm [shape: f32[2,128], index: 13, kind: output, shape index: {}]  }
   0x1   :  { %v58_v0 = vld [vmem:[%s4996_s1 + $0x48] sm:$0xff]  ;;  %v57_v1 = vld [vmem:[%s4996_s1 + $0x40] sm:$0xff]  ;;  %v2552_v2 = vld [vmem:[%s4996_s1 + $0x98] sm:$0xff] }
   0x2   :  { %3042 = vmatprep.subr.mxu0 %v58_v0  ;;  %v56_v3 = vld [vmem:[%s4996_s1 + $0x38] sm:$0xff]  ;;  %3068 = vmatprep.subr.mxu1 %v2552_v2  ;;  %v2551_v4 = vld [vmem:[%s4996_s1 + $0x90] sm:$0xff]  ;;  %v2550_v5 = vld [vmem:[%s4996_s1 + $0x88] sm:$0xff] }
   0x3   :  { %3043 = vmatpush3.msra.mxu0 %v58_v0  ;;  %3069 = vmatpush3.msra.mxu1 %v2552_v2  ;;  %v55_v6 = vld [vmem:[%s4996_s1 + $0x30] sm:$0xff]  ;;  %v2549_v7 = vld [vmem:[%s4996_s1 + $0x80] sm:$0xff]  ;;  %v54_v8 = vld [vmem:[%s4996_s1 + $0x28] sm:$0xff] }
   0x4   :  { %3044 = vmatprep.subr.mxu0 %v57_v1  ;;  %3070 = vmatprep.subr.mxu1 %v2551_v4  ;;  %v2548_v9 = vld [vmem:[%s4996_s1 + $0x78] sm:$0xff]  ;;  %v53_v10 = vld [vmem:[%s4996_s1 + $0x20] sm:$0xff]  ;;  %v2547_v11 = vld [vmem:[%s4996_s1 + $0x70] sm:$0xff] }
   0x5   :  { %3045 = vmatpush3.msra.mxu0 %v57_v1  ;;  %3071 = vmatpush3.msra.mxu1 %v2551_v4  ;;  %v52_v12 = vld [vmem:[%s4996_s1 + $0x18] sm:$0xff]  ;;  %v45_v13 = vld [vmem:[%s4995_s0] sm:$0xff]  ;;  %v51_v14 = vld [vmem:[%s4996_s1 + $0x10] sm:$0xff] }
   0x6   :  { %3046 = vmatprep.subr.mxu0 %v56_v3  ;;  %3072 = vmatprep.subr.mxu1 %v2550_v5  ;;  %v2546_v15 = vld [vmem:[%s4996_s1 + $0x68] sm:$0xff]  ;;  %v2545_v17 = vld [vmem:[%s4996_s1 + $0x60] sm:$0xff]  ;;  %v2544_v19 = vld [vmem:[%s4996_s1 + $0x58] sm:$0xff] }
   0x7   :  { %3047 = vmatpush3.msra.mxu0 %v56_v3  ;;  %3073 = vmatpush3.msra.mxu1 %v2550_v5  ;;  %v50_v16 = vld [vmem:[%s4996_s1 + $0x8] sm:$0xff]  ;;  %v49_v18 = vld [vmem:[%s4996_s1] sm:$0xff]  ;;  %v47_v22 = vld [vmem:[%s4995_s0 + $0x18] sm:$0xff] }
   0x8   :  { %3048 = vmatprep.subr.mxu0 %v55_v6  ;;  %3074 = vmatprep.subr.mxu1 %v2549_v7  ;;  %v46_v20 = vld [vmem:[%s4995_s0 + $0x8] sm:$0xff]  ;;  %v2565_v23 = vld [vmem:[%s4996_s1 + $0xe0] sm:$0xff]  ;;  %v2543_v24 = vld [vmem:[%s4996_s1 + $0x50] sm:$0xff] }
   0x9   :  { %3049 = vmatpush3.msra.mxu0 %v55_v6  ;;  %3075 = vmatpush3.msra.mxu1 %v2549_v7  ;;  %v2566_v21 = vld [vmem:[%s4996_s1 + $0xe8] sm:$0xff]  ;;  %v48_v25 = vld [vmem:[%s4995_s0 + $0x20] sm:$0xff]  ;;  %v2564_v26 = vld [vmem:[%s4996_s1 + $0xd8] sm:$0xff] }
   0xa   :  { %3050 = vmatprep.subr.mxu0 %v54_v8  ;;  %3076 = vmatprep.subr.mxu1 %v2548_v9  ;;  %v172_v27 = vld [vmem:[%s4995_s0 + $0x1] sm:$0xff] }
   0xb   :  { %3051 = vmatpush3.msra.mxu0 %v54_v8  ;;  %3077 = vmatpush3.msra.mxu1 %v2548_v9 }
   0xc   :  { %3052 = vmatprep.subr.mxu0 %v53_v10  ;;  %3078 = vmatprep.subr.mxu1 %v2547_v11 }
   0xd   :  { %3053 = vmatpush3.msra.mxu0 %v53_v10  ;;  %3062 = vmatprep.mubr.msk.f32.mxu0 %vm59_vm0, %v45_v13 }
   0xe   :  { %3054 = vmatprep.subr.mxu0 %v52_v12  ;;  %3079 = vmatpush3.msra.mxu1 %v2547_v11 }
   0xf   :  { %3055 = vmatpush3.msra.mxu0 %v52_v12  ;;  %3080 = vmatprep.subr.mxu1 %v2546_v15 }
  0x10   :  { %3056 = vmatprep.subr.mxu0 %v51_v14  ;;  %3081 = vmatpush3.msra.mxu1 %v2546_v15 }
  0x11   :  { %3057 = vmatpush3.msra.mxu0 %v51_v14  ;;  %3082 = vmatprep.subr.mxu1 %v2545_v17 }
  0x12   :  { %3058 = vmatprep.subr.mxu0 %v50_v16  ;;  %3083 = vmatpush3.msra.mxu1 %v2545_v17 }
  0x13   :  { %3059 = vmatpush3.msra.mxu0 %v50_v16  ;;  %3084 = vmatprep.subr.mxu1 %v2544_v19 }
  0x14   :  { %3060 = vmatprep.subr.mxu0 %v49_v18  ;;  %3085 = vmatpush3.msra.mxu1 %v2544_v19 }
  0x15   :  { %3061 = vmatpush3.msra.mxu0 %v49_v18  ;;  %3086 = vmatprep.subr.mxu1 %v2543_v24 }
  0x16   :  { %3063 = vmatmul.mubr.msk.f32.vlgmr.msra.gmra.mxu0 %vm59_vm0, %v46_v20  ;;  %3094 = vmatprep.subr.mxu0 %v2566_v21 }
  0x17   :  { %3095 = vmatpush3.msra.mxu0 %v2566_v21  ;;  %3065 = vmatprep.mubr.msk.f32.mxu0 %vm59_vm0, %v47_v22 }
  0x18   :  { %3096 = vmatprep.subr.mxu0 %v2565_v23 }
  0x19   :  { %18 = vsyncpa [#allocation7], 0  ;;  %3097 = vmatpush3.msra.mxu0 %v2565_v23  ;;  %v2563_v28 = vld [vmem:[%s4996_s1 + $0xd0] sm:$0xff]  ;;  %3087 = vmatpush3.msra.mxu1 %v2543_v24  ;;  %v2580_v30 = vld [vmem:[%s4996_s1 + $0x138] sm:$0xff]  ;;  %vm930_vm1 = vcmask 779264   ;;  %vm935_vm2 = vcmask 785408  }
  0x1a   :  { %v173_v29 = vld [vmem:[%s4995_s0 + $0x9] sm:$0xff]  ;;  %3066 = vmatmul.mubr.msk.f32.gmra.mxu0 %vm59_vm0, %v48_v25  ;;  %3098 = vmatprep.subr.mxu0 %v2564_v26  ;;  %v2561_v33 = vld [vmem:[%s4996_s1 + $0xc0] sm:$0xff]  ;;  %v2560_v36 = vld [vmem:[%s4996_s1 + $0xb8] sm:$0xff]  ;;  %vm3770_vm3 = vmmov 0   ;;  %vm1483_vm4 = vcmask 1041409   ;;  %vm1812_vm5 = vcmask 523264  }
  0x1b   :  { %3099 = vmatpush3.msra.mxu0 %v2564_v26  ;;  %3088 = vmatprep.mubr.msk.f32.mxu1 %vm59_vm0, %v172_v27  ;;  %v2562_v31 = vld [vmem:[%s4996_s1 + $0xc8] sm:$0xff]  ;;  %v2579_v32 = vld [vmem:[%s4996_s1 + $0x130] sm:$0xff]  ;;  %v174_v34 = vld [vmem:[%s4995_s0 + $0x19] sm:$0xff]  ;;  %vm2449_vm6 = vcmask 261120  }
  0x1c   :  { %3100 = vmatprep.subr.mxu0 %v2563_v28  ;;  %3089 = vmatmul.mubr.msk.f32.vlgmr.msra.gmra.mxu1 %vm59_vm0, %v173_v29  ;;  %v175_v35 = vld [vmem:[%s4995_s0 + $0x21] sm:$0xff]  ;;  %v2559_v38 = vld [vmem:[%s4996_s1 + $0xb0] sm:$0xff]  ;;  %v2576_v41 = vld [vmem:[%s4996_s1 + $0x118] sm:$0xff] }
  0x1d   :  { %3101 = vmatpush3.msra.mxu0 %v2563_v28  ;;  %3120 = vmatprep.subr.mxu1 %v2580_v30  ;;  %v2578_v37 = vld [vmem:[%s4996_s1 + $0x128] sm:$0xff]  ;;  %v2577_v39 = vld [vmem:[%s4996_s1 + $0x120] sm:$0xff]  ;;  %v2575_v43 = vld [vmem:[%s4996_s1 + $0x110] sm:$0xff] }
  0x1e   :  { %3102 = vmatprep.subr.mxu0 %v2562_v31  ;;  %3121 = vmatpush3.msra.mxu1 %v2580_v30  ;;  %v2558_v40 = vld [vmem:[%s4996_s1 + $0xa8] sm:$0xff]  ;;  %v2557_v42 = vld [vmem:[%s4996_s1 + $0xa0] sm:$0xff]  ;;  %v2572_v52 = vld [vmem:[%s4996_s1 + $0xf8] sm:$0xff] }
  0x1f   :  { %3103 = vmatpush3.msra.mxu0 %v2562_v31  ;;  %3122 = vmatprep.subr.mxu1 %v2579_v32  ;;  %v296_v44 = vld [vmem:[%s4995_s0 + $0x2] sm:$0xff]  ;;  %v297_v45 = vld [vmem:[%s4995_s0 + $0xa] sm:$0xff]  ;;  %v298_v50 = vld [vmem:[%s4995_s0 + $0x1a] sm:$0xff] }
  0x20   :  { %3104 = vmatprep.subr.mxu0 %v2561_v33  ;;  %3091 = vmatprep.mubr.msk.f32.mxu1 %vm59_vm0, %v174_v34  ;;  %v2574_v46 = vld [vmem:[%s4996_s1 + $0x108] sm:$0xff]  ;;  %v2573_v48 = vld [vmem:[%s4996_s1 + $0x100] sm:$0xff]  ;;  %v2592_v53 = vld [vmem:[%s4996_s1 + $0x178] sm:$0xff] }
  0x21   :  { %3105 = vmatpush3.msra.mxu0 %v2561_v33  ;;  %3123 = vmatpush3.msra.mxu1 %v2579_v32  ;;  %v2594_v47 = vld [vmem:[%s4996_s1 + $0x188] sm:$0xff]  ;;  %v2593_v49 = vld [vmem:[%s4996_s1 + $0x180] sm:$0xff]  ;;  %v2571_v54 = vld [vmem:[%s4996_s1 + $0xf0] sm:$0xff] }
  0x22   :  { %3092 = vmatmul.mubr.msk.f32.gmra.mxu1 %vm59_vm0, %v175_v35  ;;  %3106 = vmatprep.subr.mxu0 %v2560_v36  ;;  %v299_v51 = vld [vmem:[%s4995_s0 + $0x22] sm:$0xff]  ;;  %v2591_v55 = vld [vmem:[%s4996_s1 + $0x170] sm:$0xff]  ;;  %v2588_v63 = vld [vmem:[%s4996_s1 + $0x158] sm:$0xff] }
  0x23   :  { %3124 = vmatprep.subr.mxu1 %v2578_v37  ;;  %3107 = vmatpush3.msra.mxu0 %v2560_v36  ;;  %v420_v56 = vld [vmem:[%s4995_s0 + $0x3] sm:$0xff]  ;;  %v421_v57 = vld [vmem:[%s4995_s0 + $0xb] sm:$0xff]  ;;  %v422_v59 = vld [vmem:[%s4995_s0 + $0x1b] sm:$0xff] }
  0x24   :  { %3125 = vmatpush3.msra.mxu1 %v2578_v37  ;;  %3108 = vmatprep.subr.mxu0 %v2559_v38  ;;  %v2590_v58 = vld [vmem:[%s4996_s1 + $0x168] sm:$0xff]  ;;  %v2589_v60 = vld [vmem:[%s4996_s1 + $0x160] sm:$0xff]  ;;  %v2587_v0 = vld [vmem:[%s4996_s1 + $0x150] sm:$0xff] }
  0x25   :  { %3126 = vmatprep.subr.mxu1 %v2577_v39  ;;  %3109 = vmatpush3.msra.mxu0 %v2559_v38  ;;  %v544_v61 = vld [vmem:[%s4995_s0 + $0x4] sm:$0xff]  ;;  %v545_v3 = vld [vmem:[%s4995_s0 + $0xc] sm:$0xff]  ;;  %v546_v4 = vld [vmem:[%s4995_s0 + $0x1c] sm:$0xff] }
  0x26   :  { %3127 = vmatpush3.msra.mxu1 %v2577_v39  ;;  %3110 = vmatprep.subr.mxu0 %v2558_v40  ;;  %v423_v62 = vld [vmem:[%s4995_s0 + $0x23] sm:$0xff]  ;;  %v761_v6 = vld [vmem:[%s4998_s3 + $0x78] sm:$0xff]  ;;  %v760_v8 = vld [vmem:[%s4998_s3 + $0x70] sm:$0xff] }
  0x27   :  { %3128 = vmatprep.subr.mxu1 %v2576_v41  ;;  %3111 = vmatpush3.msra.mxu0 %v2558_v40  ;;  %v2586_v1 = vld [vmem:[%s4996_s1 + $0x148] sm:$0xff]  ;;  %v2585_v2 = vld [vmem:[%s4996_s1 + $0x140] sm:$0xff]  ;;  %v852_v7 = vld [vmem:[%s4999_s4 + $0x78] sm:$0xff] }
  0x28   :  { %3129 = vmatpush3.msra.mxu1 %v2576_v41  ;;  %3112 = vmatprep.subr.mxu0 %v2557_v42  ;;  %v547_v5 = vld [vmem:[%s4995_s0 + $0x24] sm:$0xff]  ;;  %v851_v9 = vld [vmem:[%s4999_s4 + $0x70] sm:$0xff]  ;;  %v757_v14 = vld [vmem:[%s4998_s3 + $0x58] sm:$0xff] }
  0x29   :  { %3130 = vmatprep.subr.mxu1 %v2575_v43  ;;  %3113 = vmatpush3.msra.mxu0 %v2557_v42  ;;  %v759_v10 = vld [vmem:[%s4998_s3 + $0x68] sm:$0xff]  ;;  %v758_v12 = vld [vmem:[%s4998_s3 + $0x60] sm:$0xff]  ;;  %v848_v15 = vld [vmem:[%s4999_s4 + $0x58] sm:$0xff] }
  0x2a   :  { %3114 = vmatprep.mubr.msk.f32.mxu0 %vm59_vm0, %v296_v44  ;;  %3131 = vmatpush3.msra.mxu1 %v2575_v43  ;;  %v850_v11 = vld [vmem:[%s4999_s4 + $0x68] sm:$0xff]  ;;  %v849_v13 = vld [vmem:[%s4999_s4 + $0x60] sm:$0xff]  ;;  %v756_v16 = vld [vmem:[%s4998_s3 + $0x50] sm:$0xff] }
  0x2b   :  { %3115 = vmatmul.mubr.msk.f32.vlgmr.msra.gmra.mxu0 %vm59_vm0, %v297_v45  ;;  %3132 = vmatprep.subr.mxu1 %v2574_v46  ;;  %v847_v17 = vld [vmem:[%s4999_s4 + $0x50] sm:$0xff]  ;;  %v755_v18 = vld [vmem:[%s4998_s3 + $0x48] sm:$0xff]  ;;  %v754_v20 = vld [vmem:[%s4998_s3 + $0x40] sm:$0xff] }
  0x2c   :  { %3146 = vmatprep.subr.mxu0 %v2594_v47  ;;  %3133 = vmatpush3.msra.mxu1 %v2574_v46  ;;  %v846_v19 = vld [vmem:[%s4999_s4 + $0x48] sm:$0xff]  ;;  %v845_v21 = vld [vmem:[%s4999_s4 + $0x40] sm:$0xff]  ;;  %v753_v22 = vld [vmem:[%s4998_s3 + $0x38] sm:$0xff] }
  0x2d   :  { %3147 = vmatpush3.msra.mxu0 %v2594_v47  ;;  %3134 = vmatprep.subr.mxu1 %v2573_v48  ;;  %v844_v23 = vld [vmem:[%s4999_s4 + $0x38] sm:$0xff]  ;;  %v752_v24 = vld [vmem:[%s4998_s3 + $0x30] sm:$0xff]  ;;  %v751_v26 = vld [vmem:[%s4998_s3 + $0x28] sm:$0xff] }
  0x2e   :  { %3148 = vmatprep.subr.mxu0 %v2593_v49  ;;  %3117 = vmatprep.mubr.msk.f32.mxu0 %vm59_vm0, %v298_v50  ;;  %v843_v25 = vld [vmem:[%s4999_s4 + $0x30] sm:$0xff]  ;;  %v842_v27 = vld [vmem:[%s4999_s4 + $0x28] sm:$0xff]  ;;  %v750_v28 = vld [vmem:[%s4998_s3 + $0x20] sm:$0xff] }
  0x2f   :  { %3135 = vmatpush3.msra.mxu1 %v2573_v48  ;;  %3149 = vmatpush3.msra.mxu0 %v2593_v49  ;;  %v841_v29 = vld [vmem:[%s4999_s4 + $0x20] sm:$0xff]  ;;  %v749_v30 = vld [vmem:[%s4998_s3 + $0x18] sm:$0xff]  ;;  %v748_v32 = vld [vmem:[%s4998_s3 + $0x10] sm:$0xff] }
  0x30   :  { %3118 = vmatmul.mubr.msk.f32.gmra.mxu0 %vm59_vm0, %v299_v51  ;;  %3136 = vmatprep.subr.mxu1 %v2572_v52  ;;  %v840_v31 = vld [vmem:[%s4999_s4 + $0x18] sm:$0xff]  ;;  %v839_v33 = vld [vmem:[%s4999_s4 + $0x10] sm:$0xff]  ;;  %v747_v34 = vld [vmem:[%s4998_s3 + $0x8] sm:$0xff] }
  0x31   :  { %3150 = vmatprep.subr.mxu0 %v2592_v53  ;;  %3137 = vmatpush3.msra.mxu1 %v2572_v52  ;;  %v838_v35 = vld [vmem:[%s4999_s4 + $0x8] sm:$0xff]  ;;  %v746_v36 = vld [vmem:[%s4998_s3] sm:$0xff]  ;;  %v4171_v38 = vld [vmem:[%s5000_s5 + $0x58] sm:$0xff] }
  0x32   :  { %3151 = vmatpush3.msra.mxu0 %v2592_v53  ;;  %3138 = vmatprep.subr.mxu1 %v2571_v54  ;;  %v837_v37 = vld [vmem:[%s4999_s4] sm:$0xff]  ;;  %v4176_v39 = vld [vmem:[%s5000_s5 + $0xb8] sm:$0xff] }
  0x33   :  { %3152 = vmatprep.subr.mxu0 %v2591_v55  ;;  %3139 = vmatpush3.msra.mxu1 %v2571_v54  ;;  %v2542_v47 = vld [vmem:[%s4997_s2] ss:$0 sm:$0xff]  ;;  %s3771_s2 = smov [#allocation6]  }
  0x34   :  { %3140 = vmatprep.mubr.msk.f32.mxu1 %vm59_vm0, %v420_v56  ;;  %3153 = vmatpush3.msra.mxu0 %v2591_v55 }
  0x35   :  { %3141 = vmatmul.mubr.msk.f32.vlgmr.msra.gmra.mxu1 %vm59_vm0, %v421_v57  ;;  %3154 = vmatprep.subr.mxu0 %v2590_v58 }
  0x36   :  { %3155 = vmatpush3.msra.mxu0 %v2590_v58  ;;  %3143 = vmatprep.mubr.msk.f32.mxu1 %vm59_vm0, %v422_v59 }
  0x37   :  { %3156 = vmatprep.subr.mxu0 %v2589_v60  ;;  %3166 = vmatprep.mubr.msk.f32.mxu0 %vm59_vm0, %v544_v61 }
  0x38   :  { %3157 = vmatpush3.msra.mxu0 %v2589_v60  ;;  %3172 = vmatprep.subr.mxu1 %v761_v6 }
  0x39   :  { %3144 = vmatmul.mubr.msk.f32.gmra.mxu1 %vm59_vm0, %v423_v62  ;;  %3158 = vmatprep.subr.mxu0 %v2588_v63 }
  0x3a   :  { %3159 = vmatpush3.msra.mxu0 %v2588_v63  ;;  %3173 = vmatpush3.msra.mxu1 %v761_v6 }
  0x3b   :  { %3160 = vmatprep.subr.mxu0 %v2587_v0  ;;  %3174 = vmatprep.subr.mxu1 %v760_v8 }
  0x3c   :  { %3161 = vmatpush3.msra.mxu0 %v2587_v0  ;;  %3175 = vmatpush3.msra.mxu1 %v760_v8 }
  0x3d   :  { %3162 = vmatprep.subr.mxu0 %v2586_v1  ;;  %3176 = vmatprep.subr.mxu1 %v759_v10 }
  0x3e   :  { %3163 = vmatpush3.msra.mxu0 %v2586_v1  ;;  %3177 = vmatpush3.msra.mxu1 %v759_v10 }
  0x3f   :  { %3164 = vmatprep.subr.mxu0 %v2585_v2  ;;  %3178 = vmatprep.subr.mxu1 %v758_v12 }
  0x40   :  { %3165 = vmatpush3.msra.mxu0 %v2585_v2  ;;  %3179 = vmatpush3.msra.mxu1 %v758_v12 }
  0x41   :  { %3167 = vmatmul.mubr.msk.f32.vlgmr.msra.gmra.mxu0 %vm59_vm0, %v545_v3  ;;  %3207 = vmatprep.subr.mxu0 %v852_v7 }
  0x42   :  { %3169 = vmatprep.mubr.msk.f32.mxu0 %vm59_vm0, %v546_v4  ;;  %3208 = vmatpush3.msra.mxu0 %v852_v7 }
  0x43   :  { %3209 = vmatprep.subr.mxu0 %v851_v9  ;;  %3180 = vmatprep.subr.mxu1 %v757_v14 }
  0x44   :  { %3210 = vmatpush3.msra.mxu0 %v851_v9  ;;  %3181 = vmatpush3.msra.mxu1 %v757_v14 }
  0x45   :  { %3170 = vmatmul.mubr.msk.f32.gmra.mxu0 %vm59_vm0, %v547_v5  ;;  %3211 = vmatprep.subr.mxu0 %v850_v11 }
  0x46   :  { %3212 = vmatpush3.msra.mxu0 %v850_v11  ;;  %3182 = vmatprep.subr.mxu1 %v756_v16 }
  0x47   :  { %3213 = vmatprep.subr.mxu0 %v849_v13  ;;  %3183 = vmatpush3.msra.mxu1 %v756_v16 }
  0x48   :  { %3214 = vmatpush3.msra.mxu0 %v849_v13  ;;  %3184 = vmatprep.subr.mxu1 %v755_v18 }
  0x49   :  { %3215 = vmatprep.subr.mxu0 %v848_v15  ;;  %3185 = vmatpush3.msra.mxu1 %v755_v18 }
  0x4a   :  { %3216 = vmatpush3.msra.mxu0 %v848_v15  ;;  %3186 = vmatprep.subr.mxu1 %v754_v20 }
  0x4b   :  { %3217 = vmatprep.subr.mxu0 %v847_v17  ;;  %3187 = vmatpush3.msra.mxu1 %v754_v20 }
  0x4c   :  { %3218 = vmatpush3.msra.mxu0 %v847_v17  ;;  %3188 = vmatprep.subr.mxu1 %v753_v22 }
  0x4d   :  { %3219 = vmatprep.subr.mxu0 %v846_v19  ;;  %3189 = vmatpush3.msra.mxu1 %v753_v22 }
  0x4e   :  { %3220 = vmatpush3.msra.mxu0 %v846_v19  ;;  %3190 = vmatprep.subr.mxu1 %v752_v24 }
  0x4f   :  { %3221 = vmatprep.subr.mxu0 %v845_v21  ;;  %3191 = vmatpush3.msra.mxu1 %v752_v24 }
  0x50   :  { %3222 = vmatpush3.msra.mxu0 %v845_v21  ;;  %3192 = vmatprep.subr.mxu1 %v751_v26 }
  0x51   :  { %3223 = vmatprep.subr.mxu0 %v844_v23  ;;  %3193 = vmatpush3.msra.mxu1 %v751_v26 }
  0x52   :  { %3224 = vmatpush3.msra.mxu0 %v844_v23  ;;  %3194 = vmatprep.subr.mxu1 %v750_v28 }
  0x53   :  { %3225 = vmatprep.subr.mxu0 %v843_v25  ;;  %3195 = vmatpush3.msra.mxu1 %v750_v28 }
  0x54   :  { %3226 = vmatpush3.msra.mxu0 %v843_v25  ;;  %3196 = vmatprep.subr.mxu1 %v749_v30 }
  0x55   :  { %3227 = vmatprep.subr.mxu0 %v842_v27  ;;  %3197 = vmatpush3.msra.mxu1 %v749_v30 }
  0x56   :  { %3228 = vmatpush3.msra.mxu0 %v842_v27  ;;  %3198 = vmatprep.subr.mxu1 %v748_v32 }
  0x57   :  { %3229 = vmatprep.subr.mxu0 %v841_v29  ;;  %3199 = vmatpush3.msra.mxu1 %v748_v32 }
  0x58   :  { %3230 = vmatpush3.msra.mxu0 %v841_v29  ;;  %3200 = vmatprep.subr.mxu1 %v747_v34 }
  0x59   :  { %3231 = vmatprep.subr.mxu0 %v840_v31  ;;  %3201 = vmatpush3.msra.mxu1 %v747_v34 }
  0x5a   :  { %3232 = vmatpush3.msra.mxu0 %v840_v31  ;;  %3202 = vmatprep.subr.mxu1 %v746_v36 }
  0x5b   :  { %3233 = vmatprep.subr.mxu0 %v839_v33  ;;  %3203 = vmatpush3.msra.mxu1 %v746_v36 }
  0x5c   :  { %3234 = vmatpush3.msra.mxu0 %v839_v33  ;;  %3242 = vmatprep.subr.mxu1 %v4171_v38 }
  0x5d   :  { %3235 = vmatprep.subr.mxu0 %v838_v35 }
  0x5e   :  { %3236 = vmatpush3.msra.mxu0 %v838_v35 }
  0x5f   :  { %3237 = vmatprep.subr.mxu0 %v837_v37 }
  0x60   :  { %3238 = vmatpush3.msra.mxu0 %v837_v37 }
  0x61   :  { %3269 = vmatprep.subr.mxu0 %v4176_v39 }
  0xd6   :  { %v3064_v40 = vpop.f32.mrf.mxu0 }
  0xd7   :  { %v165_v50 = vadd.f32 %v3064_v40, %v2542_v47 }
  0xd8   :  { %v138_v41 = vpop.f32.mrf.mxu0 }
  0xd9   :  { %v164_v53 = vadd.f32 %v2542_v47, %v138_v41 }
  0xda   :  { %v3067_v43 = vpop.f32.mrf.mxu0 }
  0xdb   :  { %v167_v54 = vadd.f32 %v3067_v43, %v2542_v47 }
  0xdc   :  { %v3090_v42 = vpop.f32.mrf.mxu1  ;;  %v148_v45 = vpop.f32.mrf.mxu0 }
  0xdd   :  { %v289_v55 = vadd.f32 %v3090_v42, %v165_v50  ;;  %v166_v58 = vadd.f32 %v2542_v47, %v148_v45 }
  0xde   :  { %v265_v44 = vpop.f32.mrf.mxu1 }
  0xdf   :  { %v288_v59 = vadd.f32 %v265_v44, %v164_v53 }
  0xe2   :  { %v3093_v46 = vpop.f32.mrf.mxu1 }
  0xe3   :  { %v291_v61 = vadd.f32 %v3093_v46, %v167_v54 }
  0xe4   :  { %v275_v48 = vpop.f32.mrf.mxu1 }
  0xe5   :  { %v290_v1 = vadd.f32 %v275_v48, %v166_v58 }
  0xeb   :  { %v3116_v49 = vpop.f32.mrf.mxu0 }
  0xec   :  { %v413_v60 = vadd.f32 %v3116_v49, %v289_v55 }
  0xed   :  { %v389_v51 = vpop.f32.mrf.mxu0 }
  0xee   :  { %v412_v62 = vadd.f32 %v389_v51, %v288_v59 }
  0xf0   :  { %v3119_v56 = vpop.f32.mrf.mxu0 }
  0xf1   :  { %v415_v2 = vadd.f32 %v3119_v56, %v291_v61 }
  0xf2   :  { %v399_v63 = vpop.f32.mrf.mxu0 }
  0xf3   :  { %v414_v5 = vadd.f32 %v399_v63, %v290_v1 }
  0xf5   :  { %v3142_v52 = vpop.f32.mrf.mxu1 }
  0xf6   :  { %v537_v3 = vadd.f32 %v3142_v52, %v413_v60 }
  0xf7   :  { %v513_v57 = vpop.f32.mrf.mxu1 }
  0xf8   :  { %v536_v6 = vadd.f32 %v513_v57, %v412_v62 }
  0xf9   :  { %v3145_v0 = vpop.f32.mrf.mxu1 }
  0xfa   :  { %v539_v10 = vadd.f32 %v3145_v0, %v415_v2 }
  0xfb   :  { %v523_v8 = vpop.f32.mrf.mxu1 }
  0xfc   :  { %v538_v14 = vadd.f32 %v523_v8, %v414_v5 }
 0x101   :  { %v3168_v4 = vpop.f32.mrf.mxu0 }
 0x102   :  { %v661_v7 = vadd.f32 %v3168_v4, %v537_v3 }
 0x103   :  { %v637_v9 = vpop.f32.mrf.mxu0 }
 0x104   :  { %v673_v11 = vmax.f32 %v661_v7, 0.0  ;;  %v660_v12 = vadd.f32 %v637_v9, %v536_v6  ;;  %v950_v9 = vld [vmem:[%s5000_s5 + $0x50] sm:$0xff] }
 0x105   :  { %v3171_v13 = vpop.f32.mrf.mxu0 }
 0x106   :  { %677 = vst [vmem:[#allocation2 + $0x8] sm:$0xff] %v673_v11  ;;  %v672_v15 = vmax.f32 %v660_v12, 0.0  ;;  %v663_v16 = vadd.f32 %v3171_v13, %v539_v10  ;;  %v2612_v10 = vld [vmem:[%s5000_s5 + $0xb0] sm:$0xff]  ;;  %v949_v11 = vld [vmem:[%s5000_s5 + $0x48] sm:$0xff]  ;;  %v948_v13 = vld [vmem:[%s5000_s5 + $0x40] sm:$0xff] }
 0x107   :  { %v647_v17 = vpop.f32.mrf.mxu0  ;;  %v2611_v12 = vld [vmem:[%s5000_s5 + $0xa8] sm:$0xff] }
 0x108   :  { %676 = vst [vmem:[#allocation2] sm:$0xff] %v672_v15  ;;  %v675_v18 = vmax.f32 %v663_v16, 0.0  ;;  %v662_v19 = vadd.f32 %v647_v17, %v538_v14  ;;  %v2609_v14 = vld [vmem:[%s5000_s5 + $0x98] sm:$0xff]  ;;  %v946_v15 = vld [vmem:[%s5000_s5 + $0x30] sm:$0xff]  ;;  %v945_v17 = vld [vmem:[%s5000_s5 + $0x28] sm:$0xff] }
 0x109   :  { %v2608_v16 = vld [vmem:[%s5000_s5 + $0x90] sm:$0xff] }
 0x10a   :  { %679 = vst [vmem:[#allocation2 + $0x18] sm:$0xff] %v675_v18  ;;  %v674_v20 = vmax.f32 %v662_v19, 0.0  ;;  %v2607_v18 = vld [vmem:[%s5000_s5 + $0x88] sm:$0xff]  ;;  %v944_v19 = vld [vmem:[%s5000_s5 + $0x20] sm:$0xff] }
 0x10c   :  { %678 = vst [vmem:[#allocation2 + $0x10] sm:$0xff] %v674_v20  ;;  %v2606_v20 = vld [vmem:[%s5000_s5 + $0x80] sm:$0xff] }
 0x10d   :  { %v712_v21 = vld [vmem:[#allocation2 + $0x8] sm:$0x1]  ;;  %v714_v22 = vld [vmem:[#allocation2 + $0x9] sm:$0x1]  ;;  %v720_v23 = vld [vmem:[#allocation2 + $0xa] sm:$0x1] }
 0x10e   :  { %v716_v24 = vmax.f32 %v712_v21, %v714_v22  ;;  %v722_v25 = vld [vmem:[#allocation2 + $0xb] sm:$0x1]  ;;  %v728_v26 = vld [vmem:[#allocation2 + $0xc] sm:$0x1]  ;;  %v730_v27 = vld [vmem:[#allocation2 + $0xd] sm:$0x1] }
 0x10f   :  { %v680_v28 = vld [vmem:[#allocation2] sm:$0x1]  ;;  %v682_v29 = vld [vmem:[#allocation2 + $0x1] sm:$0x1]  ;;  %v688_v30 = vld [vmem:[#allocation2 + $0x2] sm:$0x1]  ;;  %v724_v31 = vmax.f32 %v720_v23, %v722_v25  ;;  %v732_v32 = vmax.f32 %v728_v26, %v730_v27 }
 0x110   :  { %v684_v33 = vmax.f32 %v680_v28, %v682_v29  ;;  %v690_v34 = vld [vmem:[#allocation2 + $0x3] sm:$0x1]  ;;  %v696_v35 = vld [vmem:[#allocation2 + $0x4] sm:$0x1]  ;;  %v698_v36 = vld [vmem:[#allocation2 + $0x5] sm:$0x1] }
 0x111   :  { %718 = vst [vmem:[#allocation3 + $0x4] sm:$0x1] %v716_v24  ;;  %v713_v37 = vld [vmem:[#allocation2 + $0x18] sm:$0x1]  ;;  %v715_v40 = vld [vmem:[#allocation2 + $0x19] sm:$0x1]  ;;  %v692_v42 = vmax.f32 %v688_v30, %v690_v34  ;;  %v700_v43 = vmax.f32 %v696_v35, %v698_v36 }
 0x112   :  { %v721_v41 = vld [vmem:[#allocation2 + $0x1a] sm:$0x1]  ;;  %726 = vst [vmem:[#allocation3 + $0x5] sm:$0x1] %v724_v31  ;;  %734 = vst [vmem:[#allocation3 + $0x6] sm:$0x1] %v732_v32  ;;  %v717_v47 = vmax.f32 %v713_v37, %v715_v40 }
 0x113   :  { %v723_v44 = vld [vmem:[#allocation2 + $0x1b] sm:$0x1]  ;;  %v729_v45 = vld [vmem:[#allocation2 + $0x1c] sm:$0x1]  ;;  %v731_v46 = vld [vmem:[#allocation2 + $0x1d] sm:$0x1] }
 0x114   :  { %686 = vst [vmem:[#allocation3] sm:$0x1] %v684_v33  ;;  %v737_v48 = vld [vmem:[#allocation2 + $0x1e] sm:$0x1]  ;;  %v739_v49 = vld [vmem:[#allocation2 + $0x1f] sm:$0x1]  ;;  %v725_v51 = vmax.f32 %v721_v41, %v723_v44  ;;  %v733_v52 = vmax.f32 %v729_v45, %v731_v46 }
 0x115   :  { %v681_v50 = vld [vmem:[#allocation2 + $0x10] sm:$0x1]  ;;  %694 = vst [vmem:[#allocation3 + $0x1] sm:$0x1] %v692_v42  ;;  %702 = vst [vmem:[#allocation3 + $0x2] sm:$0x1] %v700_v43  ;;  %v741_v56 = vmax.f32 %v737_v48, %v739_v49 }
 0x116   :  { %v683_v53 = vld [vmem:[#allocation2 + $0x11] sm:$0x1]  ;;  %v689_v54 = vld [vmem:[#allocation2 + $0x12] sm:$0x1]  ;;  %v691_v55 = vld [vmem:[#allocation2 + $0x13] sm:$0x1] }
 0x117   :  { %719 = vst [vmem:[#allocation3 + $0xc] sm:$0x1] %v717_v47  ;;  %v697_v57 = vld [vmem:[#allocation2 + $0x14] sm:$0x1]  ;;  %v699_v58 = vld [vmem:[#allocation2 + $0x15] sm:$0x1]  ;;  %v685_v60 = vmax.f32 %v681_v50, %v683_v53  ;;  %v693_v61 = vmax.f32 %v689_v54, %v691_v55 }
 0x118   :  { %v705_v59 = vld [vmem:[#allocation2 + $0x16] sm:$0x1]  ;;  %727 = vst [vmem:[#allocation3 + $0xd] sm:$0x1] %v725_v51  ;;  %735 = vst [vmem:[#allocation3 + $0xe] sm:$0x1] %v733_v52  ;;  %v701_v1 = vmax.f32 %v697_v57, %v699_v58 }
 0x119   :  { %v707_v62 = vld [vmem:[#allocation2 + $0x17] sm:$0x1]  ;;  %v704_v63 = vld [vmem:[#allocation2 + $0x6] sm:$0x1]  ;;  %v706_v0 = vld [vmem:[#allocation2 + $0x7] sm:$0x1] }
 0x11a   :  { %743 = vst [vmem:[#allocation3 + $0xf] sm:$0x1] %v741_v56  ;;  %v708_v2 = vmax.f32 %v704_v63, %v706_v0  ;;  %v736_v3 = vld [vmem:[#allocation2 + $0xe] sm:$0x1]  ;;  %v738_v4 = vld [vmem:[#allocation2 + $0xf] sm:$0x1]  ;;  %v709_v5 = vmax.f32 %v705_v59, %v707_v62 }
 0x11b   :  { %687 = vst [vmem:[#allocation3 + $0x8] sm:$0x1] %v685_v60  ;;  %695 = vst [vmem:[#allocation3 + $0x9] sm:$0x1] %v693_v61  ;;  %v740_v6 = vmax.f32 %v736_v3, %v738_v4  ;;  %v943_v21 = vld [vmem:[%s5000_s5 + $0x18] sm:$0xff]  ;;  %v3769_v23 = vmov 0.0  }
 0x11c   :  { %703 = vst [vmem:[#allocation3 + $0xa] sm:$0x1] %v701_v1  ;;  %710 = vst [vmem:[#allocation3 + $0x3] sm:$0x1] %v708_v2  ;;  %v2605_v22 = vld [vmem:[%s5000_s5 + $0x78] sm:$0xff]  ;;  %v942_v24 = vld [vmem:[%s5000_s5 + $0x10] sm:$0xff] }
 0x11d   :  { %711 = vst [vmem:[#allocation3 + $0xb] sm:$0x1] %v709_v5  ;;  %742 = vst [vmem:[#allocation3 + $0x7] sm:$0x1] %v740_v6  ;;  %v2604_v25 = vld [vmem:[%s5000_s5 + $0x70] sm:$0xff]  ;;  %v941_v26 = vld [vmem:[%s5000_s5 + $0x8] sm:$0xff] }
 0x11e   :  { %931 = vst.msk [vmem:[#allocation4] sm:$0x3] %vm930_vm1, %v3769_v23  ;;  %932 = vst.msk [vmem:[#allocation4 + $0x10] sm:$0x3] %vm930_vm1, %v3769_v23  ;;  %v2603_v27 = vld [vmem:[%s5000_s5 + $0x68] sm:$0xff]  ;;  %v940_v28 = vld [vmem:[%s5000_s5] sm:$0xff] }
 0x11f   :  { %933 = vst.msk [vmem:[#allocation4 + $0xa] sm:$0x3] %vm930_vm1, %v3769_v23  ;;  %934 = vst.msk [vmem:[#allocation4 + $0x1a] sm:$0x3] %vm930_vm1, %v3769_v23  ;;  %v2602_v29 = vld [vmem:[%s5000_s5 + $0x60] sm:$0xff]  ;;  %v2627_v30 = vld [vmem:[%s5000_s5 + $0x118] sm:$0xff] }
 0x120   :  { %v2641_v31 = vld [vmem:[%s5000_s5 + $0x178] sm:$0xff]  ;;  %v2626_v44 = vld [vmem:[%s5000_s5 + $0x110] sm:$0xff]  ;;  %v2625_v48 = vld [vmem:[%s5000_s5 + $0x108] sm:$0xff] }
 0x121   :  { %v2640_v45 = vld [vmem:[%s5000_s5 + $0x170] sm:$0xff]  ;;  %v2639_v49 = vld [vmem:[%s5000_s5 + $0x168] sm:$0xff]  ;;  %v2624_v50 = vld [vmem:[%s5000_s5 + $0x100] sm:$0xff] }
 0x122   :  { %v2638_v51 = vld [vmem:[%s5000_s5 + $0x160] sm:$0xff]  ;;  %v2623_v52 = vld [vmem:[%s5000_s5 + $0xf8] sm:$0xff]  ;;  %v2622_v54 = vld [vmem:[%s5000_s5 + $0xf0] sm:$0xff] }
 0x123   :  { %v2637_v53 = vld [vmem:[%s5000_s5 + $0x158] sm:$0xff]  ;;  %v2636_v55 = vld [vmem:[%s5000_s5 + $0x150] sm:$0xff]  ;;  %v2621_v56 = vld [vmem:[%s5000_s5 + $0xe8] sm:$0xff] }
 0x124   :  { %v745_v7 = vld [vmem:[#allocation3 + $0x8] sm:$0xff]  ;;  %v744_v8 = vld [vmem:[#allocation3] sm:$0xff]  ;;  %v2619_v60 = vld [vmem:[%s5000_s5 + $0xd8] sm:$0xff] }
 0x125   :  { %3204 = vmatprep.mubr.f32.mxu1 %v744_v8  ;;  %3239 = vmatprep.mubr.f32.mxu0 %v744_v8  ;;  %v2635_v57 = vld [vmem:[%s5000_s5 + $0x148] sm:$0xff]  ;;  %v2620_v58 = vld [vmem:[%s5000_s5 + $0xe0] sm:$0xff]  ;;  %v2633_v61 = vld [vmem:[%s5000_s5 + $0x138] sm:$0xff] }
 0x126   :  { %3205 = vmatmul.mubr.f32.vlgmr.msra.gmra.mxu1 %v745_v7  ;;  %3240 = vmatmul.mubr.f32.vlgmr.msra.gmra.mxu0 %v745_v7  ;;  %v2634_v59 = vld [vmem:[%s5000_s5 + $0x140] sm:$0xff]  ;;  %v2618_v62 = vld [vmem:[%s5000_s5 + $0xd0] sm:$0xff]  ;;  %v2617_v0 = vld [vmem:[%s5000_s5 + $0xc8] sm:$0xff] }
 0x127   :  { %3243 = vmatpush3.msra.mxu1 %v4171_v38  ;;  %3270 = vmatpush3.msra.mxu0 %v4176_v39  ;;  %v2610_v38 = vld [vmem:[%s5000_s5 + $0xa0] sm:$0xff]  ;;  %v947_v39 = vld [vmem:[%s5000_s5 + $0x38] sm:$0xff]  ;;  %v2632_v63 = vld [vmem:[%s5000_s5 + $0x130] sm:$0xff] }
 0x128   :  { %3244 = vmatprep.subr.mxu1 %v950_v9  ;;  %3271 = vmatprep.subr.mxu0 %v2612_v10  ;;  %v2631_v1 = vld [vmem:[%s5000_s5 + $0x128] sm:$0xff]  ;;  %v2616_v2 = vld [vmem:[%s5000_s5 + $0xc0] sm:$0xff]  ;;  %v2655_v4 = vld [vmem:[%s5000_s5 + $0x1d8] sm:$0xff] }
 0x129   :  { %3245 = vmatpush3.msra.mxu1 %v950_v9  ;;  %3272 = vmatpush3.msra.mxu0 %v2612_v10  ;;  %v2630_v3 = vld [vmem:[%s5000_s5 + $0x120] sm:$0xff]  ;;  %v2654_v8 = vld [vmem:[%s5000_s5 + $0x1d0] sm:$0xff]  ;;  %v2653_v9 = vld [vmem:[%s5000_s5 + $0x1c8] sm:$0xff] }
 0x12a   :  { %3246 = vmatprep.subr.mxu1 %v949_v11  ;;  %3273 = vmatprep.subr.mxu0 %v2611_v12  ;;  %v2652_v10 = vld [vmem:[%s5000_s5 + $0x1c0] sm:$0xff] }
 0x12b   :  { %3247 = vmatpush3.msra.mxu1 %v949_v11  ;;  %3274 = vmatpush3.msra.mxu0 %v2611_v12  ;;  %v2651_v11 = vld [vmem:[%s5000_s5 + $0x1b8] sm:$0xff]  ;;  %v2650_v12 = vld [vmem:[%s5000_s5 + $0x1b0] sm:$0xff] }
 0x12c   :  { %3248 = vmatprep.subr.mxu1 %v948_v13  ;;  %3275 = vmatprep.subr.mxu0 %v2610_v38 }
 0x12d   :  { %3249 = vmatpush3.msra.mxu1 %v948_v13  ;;  %3276 = vmatpush3.msra.mxu0 %v2610_v38  ;;  %v2649_v13 = vld [vmem:[%s5000_s5 + $0x1a8] sm:$0xff]  ;;  %v2648_v38 = vld [vmem:[%s5000_s5 + $0x1a0] sm:$0xff] }
 0x12e   :  { %3250 = vmatprep.subr.mxu1 %v947_v39  ;;  %3277 = vmatprep.subr.mxu0 %v2609_v14 }
 0x12f   :  { %3251 = vmatpush3.msra.mxu1 %v947_v39  ;;  %3278 = vmatpush3.msra.mxu0 %v2609_v14  ;;  %v2647_v39 = vld [vmem:[%s5000_s5 + $0x198] sm:$0xff]  ;;  %v2646_v14 = vld [vmem:[%s5000_s5 + $0x190] sm:$0xff] }
 0x130   :  { %3252 = vmatprep.subr.mxu1 %v946_v15  ;;  %3279 = vmatprep.subr.mxu0 %v2608_v16 }
 0x131   :  { %3253 = vmatpush3.msra.mxu1 %v946_v15  ;;  %3280 = vmatpush3.msra.mxu0 %v2608_v16  ;;  %v2645_v15 = vld [vmem:[%s5000_s5 + $0x188] sm:$0xff]  ;;  %v2644_v16 = vld [vmem:[%s5000_s5 + $0x180] sm:$0xff] }
 0x132   :  { %3254 = vmatprep.subr.mxu1 %v945_v17  ;;  %3281 = vmatprep.subr.mxu0 %v2607_v18 }
 0x133   :  { %3255 = vmatpush3.msra.mxu1 %v945_v17  ;;  %3282 = vmatpush3.msra.mxu0 %v2607_v18  ;;  %v4380_v18 = vld [vmem:[%s5002_s7 + $0x78] sm:$0xff] }
 0x134   :  { %3256 = vmatprep.subr.mxu1 %v944_v19  ;;  %3283 = vmatprep.subr.mxu0 %v2606_v20 }
 0x135   :  { %3257 = vmatpush3.msra.mxu1 %v944_v19  ;;  %3284 = vmatpush3.msra.mxu0 %v2606_v20  ;;  %v4385_v19 = vld [vmem:[%s5003_s8 + $0x78] sm:$0xff]  ;;  %v4390_v20 = vld [vmem:[%s5002_s7 + $0x70] sm:$0xff] }
 0x136   :  { %3258 = vmatprep.subr.mxu1 %v943_v21  ;;  %3285 = vmatprep.subr.mxu0 %v2605_v22 }
 0x137   :  { %3259 = vmatpush3.msra.mxu1 %v943_v21  ;;  %3286 = vmatpush3.msra.mxu0 %v2605_v22  ;;  %v4397_v21 = vld [vmem:[%s5003_s8 + $0x70] sm:$0xff]  ;;  %v4404_v22 = vld [vmem:[%s5002_s7 + $0x68] sm:$0xff] }
 0x138   :  { %3260 = vmatprep.subr.mxu1 %v942_v24  ;;  %3287 = vmatprep.subr.mxu0 %v2604_v25 }
 0x139   :  { %3261 = vmatpush3.msra.mxu1 %v942_v24  ;;  %3288 = vmatpush3.msra.mxu0 %v2604_v25  ;;  %v4409_v24 = vld [vmem:[%s5003_s8 + $0x68] sm:$0xff]  ;;  %v4422_v25 = vld [vmem:[%s5002_s7 + $0x60] sm:$0xff] }
 0x13a   :  { %3262 = vmatprep.subr.mxu1 %v941_v26  ;;  %3289 = vmatprep.subr.mxu0 %v2603_v27 }
 0x13b   :  { %3263 = vmatpush3.msra.mxu1 %v941_v26  ;;  %3290 = vmatpush3.msra.mxu0 %v2603_v27  ;;  %v4427_v26 = vld [vmem:[%s5003_s8 + $0x60] sm:$0xff]  ;;  %v4436_v27 = vld [vmem:[%s5002_s7 + $0x58] sm:$0xff] }
 0x13c   :  { %3264 = vmatprep.subr.mxu1 %v940_v28  ;;  %3291 = vmatprep.subr.mxu0 %v2602_v29 }
 0x13d   :  { %3265 = vmatpush3.msra.mxu1 %v940_v28  ;;  %3292 = vmatpush3.msra.mxu0 %v2602_v29  ;;  %v4441_v28 = vld [vmem:[%s5003_s8 + $0x58] sm:$0xff]  ;;  %v4450_v29 = vld [vmem:[%s5002_s7 + $0x50] sm:$0xff] }
 0x13e   :  { %3296 = vmatprep.subr.mxu1 %v2627_v30  ;;  %3323 = vmatprep.subr.mxu0 %v2641_v31 }
 0x1e6   :  { %v3206_v32 = vpop.f32.mrf.mxu1  ;;  %v3241_v33 = vpop.f32.mrf.mxu0 }
 0x1e7   :  { %v929_v34 = vmax.f32 %v3206_v32, %v3241_v33  ;;  %v4469_v32 = vld [vmem:[%s5003_s8 + $0x48] sm:$0xff]  ;;  %v4478_v33 = vld [vmem:[%s5002_s7 + $0x40] sm:$0xff] }
 0x1e8   :  { %v828_v35 = vpop.f32.mrf.mxu1  ;;  %v919_v36 = vpop.f32.mrf.mxu0 }
 0x1e9   :  { %937 = vst.msk [vmem:[#allocation4 + $0x12] sm:$0xff] %vm935_vm2, %v929_v34  ;;  %v928_v37 = vmax.f32 %v828_v35, %v919_v36  ;;  %v4483_v34 = vld [vmem:[%s5003_s8 + $0x40] sm:$0xff]  ;;  %v4492_v35 = vld [vmem:[%s5002_s7 + $0x38] sm:$0xff] }
 0x1ea   :  { %v4497_v36 = vld [vmem:[%s5003_s8 + $0x38] sm:$0xff] }
 0x1eb   :  { %936 = vst.msk [vmem:[#allocation4 + $0x2] sm:$0xff] %vm935_vm2, %v928_v37  ;;  %v4506_v37 = vld [vmem:[%s5002_s7 + $0x30] sm:$0xff] }
 0x1f0   :  { %v939_v42 = vld [vmem:[#allocation4 + $0x10] sm:$0xff] }
 0x1f1   :  { %v1045_v43 = vld [vmem:[#allocation4 + $0x11] sm:$0xff] }
 0x1f2   :  { %v938_v40 = vld [vmem:[#allocation4] sm:$0xff]  ;;  %v1147_v5 = vld [vmem:[#allocation4 + $0x12] sm:$0xff] }
 0x1f3   :  { %v1044_v41 = vld [vmem:[#allocation4 + $0x1] sm:$0xff]  ;;  %3266 = vmatprep.mubr.msk.f32.mxu1 %vm935_vm2, %v938_v40  ;;  %v1249_v6 = vld [vmem:[#allocation4 + $0x13] sm:$0xff] }
 0x1f4   :  { %3293 = vmatprep.mubr.msk.f32.mxu0 %vm935_vm2, %v1044_v41  ;;  %3267 = vmatmul.mubr.msk.f32.vlgmr.msra.gmra.mxu1 %vm935_vm2, %v939_v42  ;;  %v1146_v46 = vld [vmem:[#allocation4 + $0x2] sm:$0xff]  ;;  %v1351_v17 = vld [vmem:[#allocation4 + $0x14] sm:$0xff] }
 0x1f5   :  { %3294 = vmatmul.mubr.msk.f32.vlgmr.msra.gmra.mxu0 %vm935_vm2, %v1045_v43  ;;  %3297 = vmatpush3.msra.mxu1 %v2627_v30  ;;  %v1248_v47 = vld [vmem:[#allocation4 + $0x3] sm:$0xff]  ;;  %v4520_v41 = vld [vmem:[%s5002_s7 + $0x28] sm:$0xff]  ;;  %v4530_v43 = vld [vmem:[%s5002_s7 + $0x20] sm:$0xff] }
 0x1f6   :  { %3324 = vmatpush3.msra.mxu0 %v2641_v31  ;;  %3298 = vmatprep.subr.mxu1 %v2626_v44  ;;  %v1350_v7 = vld [vmem:[#allocation4 + $0x4] sm:$0xff]  ;;  %v4464_v31 = vld [vmem:[%s5002_s7 + $0x48] sm:$0xff] }
 0x1f7   :  { %3320 = vmatprep.mubr.msk.f32.mxu1 %vm935_vm2, %v1146_v46  ;;  %3325 = vmatprep.subr.mxu0 %v2640_v45  ;;  %v4455_v30 = vld [vmem:[%s5003_s8 + $0x50] sm:$0xff]  ;;  %v4525_v42 = vld [vmem:[%s5003_s8 + $0x28] sm:$0xff]  ;;  %v4549_v46 = vld [vmem:[%s5003_s8 + $0x18] sm:$0xff] }
 0x1f8   :  { %3347 = vmatprep.mubr.msk.f32.mxu0 %vm935_vm2, %v1248_v47  ;;  %3299 = vmatpush3.msra.mxu1 %v2626_v44  ;;  %v4511_v40 = vld [vmem:[%s5003_s8 + $0x30] sm:$0xff]  ;;  %v4537_v44 = vld [vmem:[%s5003_s8 + $0x20] sm:$0xff] }
 0x1f9   :  { %3326 = vmatpush3.msra.mxu0 %v2640_v45  ;;  %3300 = vmatprep.subr.mxu1 %v2625_v48  ;;  %v4544_v45 = vld [vmem:[%s5002_s7 + $0x18] sm:$0xff]  ;;  %v4558_v47 = vld [vmem:[%s5002_s7 + $0x10] sm:$0xff] }
 0x1fa   :  { %3327 = vmatprep.subr.mxu0 %v2639_v49  ;;  %3301 = vmatpush3.msra.mxu1 %v2625_v48  ;;  %v4563_v48 = vld [vmem:[%s5003_s8 + $0x10] sm:$0xff] }
 0x1fb   :  { %3328 = vmatpush3.msra.mxu0 %v2639_v49  ;;  %3302 = vmatprep.subr.mxu1 %v2624_v50  ;;  %v4572_v49 = vld [vmem:[%s5002_s7 + $0x8] sm:$0xff] }
 0x1fc   :  { %3329 = vmatprep.subr.mxu0 %v2638_v51  ;;  %3303 = vmatpush3.msra.mxu1 %v2624_v50  ;;  %v4577_v50 = vld [vmem:[%s5003_s8 + $0x8] sm:$0xff] }
 0x1fd   :  { %3330 = vmatpush3.msra.mxu0 %v2638_v51  ;;  %3304 = vmatprep.subr.mxu1 %v2623_v52  ;;  %v4586_v51 = vld [vmem:[%s5002_s7] sm:$0xff] }
 0x1fe   :  { %3331 = vmatprep.subr.mxu0 %v2637_v53  ;;  %3305 = vmatpush3.msra.mxu1 %v2623_v52  ;;  %v4591_v52 = vld [vmem:[%s5003_s8] sm:$0xff] }
 0x1ff   :  { %3332 = vmatpush3.msra.mxu0 %v2637_v53  ;;  %3306 = vmatprep.subr.mxu1 %v2622_v54 }
 0x200   :  { %3333 = vmatprep.subr.mxu0 %v2636_v55  ;;  %3307 = vmatpush3.msra.mxu1 %v2622_v54  ;;  %v2601_v54 = vld [vmem:[%s5001_s6] ss:$0 sm:$0xff] }
 0x201   :  { %3334 = vmatpush3.msra.mxu0 %v2636_v55  ;;  %3308 = vmatprep.subr.mxu1 %v2621_v56 }
 0x202   :  { %3335 = vmatprep.subr.mxu0 %v2635_v57  ;;  %3309 = vmatpush3.msra.mxu1 %v2621_v56 }
 0x203   :  { %3336 = vmatpush3.msra.mxu0 %v2635_v57  ;;  %3310 = vmatprep.subr.mxu1 %v2620_v58 }
 0x204   :  { %3337 = vmatprep.subr.mxu0 %v2634_v59  ;;  %3311 = vmatpush3.msra.mxu1 %v2620_v58 }
 0x205   :  { %3338 = vmatpush3.msra.mxu0 %v2634_v59  ;;  %3312 = vmatprep.subr.mxu1 %v2619_v60 }
 0x206   :  { %3339 = vmatprep.subr.mxu0 %v2633_v61  ;;  %3313 = vmatpush3.msra.mxu1 %v2619_v60 }
 0x207   :  { %3340 = vmatpush3.msra.mxu0 %v2633_v61  ;;  %3314 = vmatprep.subr.mxu1 %v2618_v62 }
 0x208   :  { %3341 = vmatprep.subr.mxu0 %v2632_v63  ;;  %3315 = vmatpush3.msra.mxu1 %v2618_v62 }
 0x209   :  { %3342 = vmatpush3.msra.mxu0 %v2632_v63  ;;  %3316 = vmatprep.subr.mxu1 %v2617_v0 }
 0x20a   :  { %3343 = vmatprep.subr.mxu0 %v2631_v1  ;;  %3317 = vmatpush3.msra.mxu1 %v2617_v0 }
 0x20b   :  { %3344 = vmatpush3.msra.mxu0 %v2631_v1  ;;  %3318 = vmatprep.subr.mxu1 %v2616_v2 }
 0x20c   :  { %3345 = vmatprep.subr.mxu0 %v2630_v3  ;;  %3319 = vmatpush3.msra.mxu1 %v2616_v2 }
 0x20d   :  { %3346 = vmatpush3.msra.mxu0 %v2630_v3  ;;  %3321 = vmatmul.mubr.msk.f32.vlgmr.msra.gmra.mxu1 %vm935_vm2, %v1147_v5 }
 0x20e   :  { %3348 = vmatmul.mubr.msk.f32.vlgmr.msra.gmra.mxu0 %vm935_vm2, %v1249_v6  ;;  %3350 = vmatprep.subr.mxu1 %v2655_v4 }
 0x20f   :  { %3374 = vmatprep.mubr.msk.f32.mxu1 %vm935_vm2, %v1350_v7  ;;  %3351 = vmatpush3.msra.mxu1 %v2655_v4 }
 0x210   :  { %3377 = vmatprep.subr.mxu0 %v3769_v23  ;;  %3352 = vmatprep.subr.mxu1 %v2654_v8 }
 0x211   :  { %3353 = vmatpush3.msra.mxu1 %v2654_v8  ;;  %3378 = vmatpush3.msra.mxu0 %v4380_v18 }
 0x212   :  { %3354 = vmatprep.subr.mxu1 %v2653_v9  ;;  %3379 = vmatprep.subr.mxu0 %v3769_v23 }
 0x213   :  { %3355 = vmatpush3.msra.mxu1 %v2653_v9  ;;  %3380 = vmatpush3.msra.mxu0 %v4390_v20 }
 0x214   :  { %3356 = vmatprep.subr.mxu1 %v2652_v10  ;;  %3381 = vmatprep.subr.mxu0 %v3769_v23 }
 0x215   :  { %3357 = vmatpush3.msra.mxu1 %v2652_v10  ;;  %3382 = vmatpush3.msra.mxu0 %v4404_v22 }
 0x216   :  { %3358 = vmatprep.subr.mxu1 %v2651_v11  ;;  %3383 = vmatprep.subr.mxu0 %v3769_v23 }
 0x217   :  { %3359 = vmatpush3.msra.mxu1 %v2651_v11  ;;  %3384 = vmatpush3.msra.mxu0 %v4422_v25 }
 0x218   :  { %3360 = vmatprep.subr.mxu1 %v2650_v12  ;;  %3385 = vmatprep.subr.mxu0 %v3769_v23 }
 0x219   :  { %3361 = vmatpush3.msra.mxu1 %v2650_v12  ;;  %3386 = vmatpush3.msra.mxu0 %v4436_v27 }
 0x21a   :  { %3362 = vmatprep.subr.mxu1 %v2649_v13  ;;  %3387 = vmatprep.subr.mxu0 %v3769_v23 }
 0x21b   :  { %3363 = vmatpush3.msra.mxu1 %v2649_v13  ;;  %3388 = vmatpush3.msra.mxu0 %v4450_v29 }
 0x21c   :  { %3364 = vmatprep.subr.mxu1 %v2648_v38  ;;  %3389 = vmatprep.subr.mxu0 %v3769_v23 }
 0x21d   :  { %3365 = vmatpush3.msra.mxu1 %v2648_v38  ;;  %3390 = vmatpush3.msra.mxu0 %v4464_v31 }
 0x21e   :  { %3366 = vmatprep.subr.mxu1 %v2647_v39  ;;  %3391 = vmatprep.subr.mxu0 %v3769_v23 }
 0x21f   :  { %3367 = vmatpush3.msra.mxu1 %v2647_v39  ;;  %3392 = vmatpush3.msra.mxu0 %v4478_v33 }
 0x220   :  { %3368 = vmatprep.subr.mxu1 %v2646_v14  ;;  %3393 = vmatprep.subr.mxu0 %v3769_v23 }
 0x221   :  { %3369 = vmatpush3.msra.mxu1 %v2646_v14  ;;  %3394 = vmatpush3.msra.mxu0 %v4492_v35 }
 0x222   :  { %3370 = vmatprep.subr.mxu1 %v2645_v15  ;;  %3395 = vmatprep.subr.mxu0 %v3769_v23 }
 0x223   :  { %3371 = vmatpush3.msra.mxu1 %v2645_v15  ;;  %3396 = vmatpush3.msra.mxu0 %v4506_v37 }
 0x224   :  { %3372 = vmatprep.subr.mxu1 %v2644_v16  ;;  %3397 = vmatprep.subr.mxu0 %v3769_v23 }
 0x225   :  { %3373 = vmatpush3.msra.mxu1 %v2644_v16  ;;  %3398 = vmatpush3.msra.mxu0 %v4520_v41 }
 0x226   :  { %3375 = vmatmul.mubr.msk.f32.vlgmr.msra.gmra.mxu1 %vm935_vm2, %v1351_v17  ;;  %3412 = vmatprep.subr.mxu1 %v3769_v23 }
 0x227   :  { %3413 = vmatpush3.msra.mxu1 %v4385_v19  ;;  %3399 = vmatprep.subr.mxu0 %v3769_v23 }
 0x228   :  { %3414 = vmatprep.subr.mxu1 %v3769_v23  ;;  %3400 = vmatpush3.msra.mxu0 %v4530_v43 }
 0x229   :  { %3415 = vmatpush3.msra.mxu1 %v4397_v21  ;;  %3401 = vmatprep.subr.mxu0 %v3769_v23 }
 0x22a   :  { %3416 = vmatprep.subr.mxu1 %v3769_v23  ;;  %3402 = vmatpush3.msra.mxu0 %v4544_v45 }
 0x22b   :  { %3417 = vmatpush3.msra.mxu1 %v4409_v24  ;;  %3403 = vmatprep.subr.mxu0 %v3769_v23 }
 0x22c   :  { %3418 = vmatprep.subr.mxu1 %v3769_v23  ;;  %3404 = vmatpush3.msra.mxu0 %v4558_v47 }
 0x22d   :  { %3419 = vmatpush3.msra.mxu1 %v4427_v26  ;;  %3405 = vmatprep.subr.mxu0 %v3769_v23 }
 0x22e   :  { %3420 = vmatprep.subr.mxu1 %v3769_v23  ;;  %3406 = vmatpush3.msra.mxu0 %v4572_v49 }
 0x22f   :  { %3421 = vmatpush3.msra.mxu1 %v4441_v28  ;;  %3407 = vmatprep.subr.mxu0 %v3769_v23 }
 0x230   :  { %3422 = vmatprep.subr.mxu1 %v3769_v23  ;;  %3408 = vmatpush3.msra.mxu0 %v4586_v51 }
 0x231   :  { %3423 = vmatpush3.msra.mxu1 %v4455_v30  ;;  %3409 = vmatprep.mubr.msk.f32.mxu0 %vm3770_vm3, %v3769_v23 }
 0x232   :  { %3424 = vmatprep.subr.mxu1 %v3769_v23  ;;  %3444 = vmatprep.mubr.msk.f32.mxu1 %vm3770_vm3, %v3769_v23 }
 0x233   :  { %3425 = vmatpush3.msra.mxu1 %v4469_v32  ;;  %3447 = vmatprep.subr.mxu0 %v3769_v23 }
 0x234   :  { %3426 = vmatprep.subr.mxu1 %v3769_v23 }
 0x235   :  { %3427 = vmatpush3.msra.mxu1 %v4483_v34 }
 0x236   :  { %3428 = vmatprep.subr.mxu1 %v3769_v23 }
 0x237   :  { %3429 = vmatpush3.msra.mxu1 %v4497_v36 }
 0x238   :  { %3430 = vmatprep.subr.mxu1 %v3769_v23 }
 0x239   :  { %3431 = vmatpush3.msra.mxu1 %v4511_v40 }
 0x23a   :  { %3432 = vmatprep.subr.mxu1 %v3769_v23 }
 0x23b   :  { %3433 = vmatpush3.msra.mxu1 %v4525_v42 }
 0x23c   :  { %3434 = vmatprep.subr.mxu1 %v3769_v23 }
 0x23d   :  { %3435 = vmatpush3.msra.mxu1 %v4537_v44 }
 0x23e   :  { %3436 = vmatprep.subr.mxu1 %v3769_v23 }
 0x23f   :  { %3437 = vmatpush3.msra.mxu1 %v4549_v46 }
 0x240   :  { %3438 = vmatprep.subr.mxu1 %v3769_v23 }
 0x241   :  { %3439 = vmatpush3.msra.mxu1 %v4563_v48 }
 0x242   :  { %3440 = vmatprep.subr.mxu1 %v3769_v23 }
 0x243   :  { %3441 = vmatpush3.msra.mxu1 %v4577_v50 }
 0x244   :  { %3442 = vmatprep.subr.mxu1 %v3769_v23 }
 0x245   :  { %3443 = vmatpush3.msra.mxu1 %v4591_v52 }
 0x246   :  { %3482 = vmatprep.subr.mxu1 %v3769_v23 }
 0x2b4   :  { %v3268_v53 = vpop.f32.mrf.mxu1 }
 0x2b5   :  { %v1041_v56 = vadd.f32 %v3268_v53, %v2601_v54  ;;  %v3295_v57 = vpop.f32.mrf.mxu0 }
 0x2b6   :  { %v1024_v55 = vpop.f32.mrf.mxu1 }
 0x2b7   :  { %v1040_v59 = vadd.f32 %v2601_v54, %v1024_v55  ;;  %v1143_v60 = vadd.f32 %v3295_v57, %v1041_v56  ;;  %v1131_v61 = vpop.f32.mrf.mxu0 }
 0x2b9   :  { %v1142_v63 = vadd.f32 %v1131_v61, %v1040_v59  ;;  %v1650_v61 = vld [vmem:[%s5004_s9 + $0x38] sm:$0xff] }
 0x2cd   :  { %v3322_v58 = vpop.f32.mrf.mxu1 }
 0x2ce   :  { %v1245_v0 = vadd.f32 %v3322_v58, %v1143_v60  ;;  %v3349_v1 = vpop.f32.mrf.mxu0 }
 0x2cf   :  { %v1233_v62 = vpop.f32.mrf.mxu1 }
 0x2d0   :  { %v1244_v2 = vadd.f32 %v1233_v62, %v1142_v63  ;;  %v1347_v3 = vadd.f32 %v3349_v1, %v1245_v0  ;;  %v1335_v4 = vpop.f32.mrf.mxu0  ;;  %v1649_v62 = vld [vmem:[%s5004_s9 + $0x30] sm:$0xff]  ;;  %v1648_v63 = vld [vmem:[%s5004_s9 + $0x28] sm:$0xff]  ;;  %v1647_v0 = vld [vmem:[%s5004_s9 + $0x20] sm:$0xff] }
 0x2d1   :  { %v1646_v1 = vld [vmem:[%s5004_s9 + $0x18] sm:$0xff] }
 0x2d2   :  { %v1346_v6 = vadd.f32 %v1335_v4, %v1244_v2  ;;  %v1645_v2 = vld [vmem:[%s5004_s9 + $0x10] sm:$0xff]  ;;  %v1643_v4 = vld [vmem:[%s5004_s9] sm:$0xff] }
 0x2e6   :  { %v3376_v5 = vpop.f32.mrf.mxu1 }
 0x2e7   :  { %v1449_v7 = vadd.f32 %v3376_v5, %v1347_v3  ;;  %v1644_v3 = vld [vmem:[%s5004_s9 + $0x8] sm:$0xff]  ;;  %v2665_v5 = vld [vmem:[%s5004_s9 + $0x78] sm:$0xff] }
 0x2e8   :  { %v1437_v8 = vpop.f32.mrf.mxu1 }
 0x2e9   :  { %v1455_v9 = vmax.f32 %v1449_v7, 0.0  ;;  %v1448_v10 = vadd.f32 %v1437_v8, %v1346_v6  ;;  %v2664_v6 = vld [vmem:[%s5004_s9 + $0x70] sm:$0xff]  ;;  %v2663_v7 = vld [vmem:[%s5004_s9 + $0x68] sm:$0xff]  ;;  %v2662_v8 = vld [vmem:[%s5004_s9 + $0x60] sm:$0xff] }
 0x2eb   :  { %1457 = vst [vmem:[#allocation5 + $0x8] sm:$0xff] %v1455_v9  ;;  %v1454_v11 = vmax.f32 %v1448_v10, 0.0  ;;  %v2661_v9 = vld [vmem:[%s5004_s9 + $0x58] sm:$0xff]  ;;  %v2660_v10 = vld [vmem:[%s5004_s9 + $0x50] sm:$0xff] }
 0x2ed   :  { %1456 = vst [vmem:[#allocation5] sm:$0xff] %v1454_v11  ;;  %v2659_v11 = vld [vmem:[%s5004_s9 + $0x48] sm:$0xff] }
 0x2f2   :  { %v1459_v12 = vld [vmem:[#allocation5 + $0x8] sm:$0x1]  ;;  %v1461_v13 = vld [vmem:[#allocation5 + $0x9] sm:$0x1]  ;;  %v1652_v53 = vld [vmem:[#allocation5 + $0xa] sm:$0x1] }
 0x2f3   :  { %v1463_v38 = vmax.f32 %v1459_v12, %v1461_v13  ;;  %v1654_v54 = vld [vmem:[#allocation5 + $0xb] sm:$0x1]  ;;  %v2658_v12 = vld [vmem:[%s5004_s9 + $0x40] sm:$0xff] }
 0x2f4   :  { %v1458_v39 = vld [vmem:[#allocation5] sm:$0x1]  ;;  %v1460_v14 = vld [vmem:[#allocation5 + $0x1] sm:$0x1]  ;;  %v1656_v55 = vmax.f32 %v1652_v53, %v1654_v54  ;;  %v1651_v56 = vld [vmem:[#allocation5 + $0x2] sm:$0x1] }
 0x2f5   :  { %v1462_v15 = vmax.f32 %v1458_v39, %v1460_v14  ;;  %v1482_v16 = vrot.slane %v1463_v38, 7  ;;  %v1653_v57 = vld [vmem:[#allocation5 + $0x3] sm:$0x1]  ;;  %v1959_v54 = vld [vmem:[#allocation5 + $0x4] sm:$0x1] }
 0x2f6   :  { %v1655_v58 = vmax.f32 %v1651_v56, %v1653_v57  ;;  %v1659_v59 = vrot.slane %v1656_v55, 7  ;;  %v1961_v55 = vld [vmem:[#allocation5 + $0x5] sm:$0x1] }
 0x2f7   :  { %v1484_v17 = vsel %vm1483_vm4, %v1482_v16, %v1462_v15  ;;  %v1960_v16 = vld [vmem:[#allocation5 + $0xc] sm:$0x1]  ;;  %v1963_v56 = vmax.f32 %v1959_v54, %v1961_v55 }
 0x2f8   :  { %3410 = vmatmul.mubr.f32.vlgmr.msra.gmra.mxu0 %v1484_v17  ;;  %3445 = vmatmul.mubr.f32.vlgmr.msra.gmra.mxu1 %v1484_v17  ;;  %v1660_v60 = vsel %vm1483_vm4, %v1659_v59, %v1655_v58  ;;  %v1962_v17 = vld [vmem:[#allocation5 + $0xd] sm:$0x1] }
 0x2f9   :  { %3448 = vmatpush3.msra.mxu0 %v4380_v18  ;;  %3483 = vmatpush3.msra.mxu1 %v4385_v19  ;;  %v1964_v53 = vmax.f32 %v1960_v16, %v1962_v17 }
 0x2fa   :  { %3449 = vmatprep.subr.mxu0 %v3769_v23  ;;  %3484 = vmatprep.subr.mxu1 %v3769_v23 }
 0x2fb   :  { %3450 = vmatpush3.msra.mxu0 %v4390_v20  ;;  %3485 = vmatpush3.msra.mxu1 %v4397_v21  ;;  %v1967_v57 = vrot.slane %v1964_v53, 7  ;;  %v2687_v53 = vld [vmem:[%s5007_s12] ss:$0 sm:$0xff] }
 0x2fc   :  { %3451 = vmatprep.subr.mxu0 %v3769_v23  ;;  %3486 = vmatprep.subr.mxu1 %v3769_v23 }
 0x2fd   :  { %3452 = vmatpush3.msra.mxu0 %v4404_v22  ;;  %3487 = vmatpush3.msra.mxu1 %v4409_v24 }
 0x2fe   :  { %3453 = vmatprep.subr.mxu0 %v3769_v23  ;;  %3488 = vmatprep.subr.mxu1 %v3769_v23 }
 0x2ff   :  { %3454 = vmatpush3.msra.mxu0 %v4422_v25  ;;  %3489 = vmatpush3.msra.mxu1 %v4427_v26 }
 0x300   :  { %3455 = vmatprep.subr.mxu0 %v3769_v23  ;;  %3490 = vmatprep.subr.mxu1 %v3769_v23 }
 0x301   :  { %3456 = vmatpush3.msra.mxu0 %v4436_v27  ;;  %3491 = vmatpush3.msra.mxu1 %v4441_v28 }
 0x302   :  { %3457 = vmatprep.subr.mxu0 %v3769_v23  ;;  %3492 = vmatprep.subr.mxu1 %v3769_v23 }
 0x303   :  { %3458 = vmatpush3.msra.mxu0 %v4450_v29  ;;  %3493 = vmatpush3.msra.mxu1 %v4455_v30 }
 0x304   :  { %3459 = vmatprep.subr.mxu0 %v3769_v23  ;;  %3494 = vmatprep.subr.mxu1 %v3769_v23 }
 0x305   :  { %3460 = vmatpush3.msra.mxu0 %v4464_v31  ;;  %3495 = vmatpush3.msra.mxu1 %v4469_v32 }
 0x306   :  { %3461 = vmatprep.subr.mxu0 %v3769_v23  ;;  %3496 = vmatprep.subr.mxu1 %v3769_v23 }
 0x307   :  { %3462 = vmatpush3.msra.mxu0 %v4478_v33  ;;  %3497 = vmatpush3.msra.mxu1 %v4483_v34 }
 0x308   :  { %3463 = vmatprep.subr.mxu0 %v3769_v23  ;;  %3498 = vmatprep.subr.mxu1 %v3769_v23 }
 0x309   :  { %3464 = vmatpush3.msra.mxu0 %v4492_v35  ;;  %3499 = vmatpush3.msra.mxu1 %v4497_v36 }
 0x30a   :  { %3465 = vmatprep.subr.mxu0 %v3769_v23  ;;  %3500 = vmatprep.subr.mxu1 %v3769_v23 }
 0x30b   :  { %3466 = vmatpush3.msra.mxu0 %v4506_v37  ;;  %3501 = vmatpush3.msra.mxu1 %v4511_v40 }
 0x30c   :  { %3467 = vmatprep.subr.mxu0 %v3769_v23  ;;  %3502 = vmatprep.subr.mxu1 %v3769_v23 }
 0x30d   :  { %3468 = vmatpush3.msra.mxu0 %v4520_v41  ;;  %3503 = vmatpush3.msra.mxu1 %v4525_v42 }
 0x30e   :  { %3469 = vmatprep.subr.mxu0 %v3769_v23  ;;  %3504 = vmatprep.subr.mxu1 %v3769_v23 }
 0x30f   :  { %3470 = vmatpush3.msra.mxu0 %v4530_v43  ;;  %3505 = vmatpush3.msra.mxu1 %v4537_v44 }
 0x310   :  { %3471 = vmatprep.subr.mxu0 %v3769_v23  ;;  %3506 = vmatprep.subr.mxu1 %v3769_v23 }
 0x311   :  { %3472 = vmatpush3.msra.mxu0 %v4544_v45  ;;  %3507 = vmatpush3.msra.mxu1 %v4549_v46 }
 0x312   :  { %3473 = vmatprep.subr.mxu0 %v3769_v23  ;;  %3508 = vmatprep.subr.mxu1 %v3769_v23 }
 0x313   :  { %3474 = vmatpush3.msra.mxu0 %v4558_v47  ;;  %3509 = vmatpush3.msra.mxu1 %v4563_v48 }
 0x314   :  { %3475 = vmatprep.subr.mxu0 %v3769_v23  ;;  %3510 = vmatprep.subr.mxu1 %v3769_v23 }
 0x315   :  { %3476 = vmatpush3.msra.mxu0 %v4572_v49  ;;  %3511 = vmatpush3.msra.mxu1 %v4577_v50 }
 0x316   :  { %3477 = vmatprep.subr.mxu0 %v3769_v23  ;;  %3512 = vmatprep.subr.mxu1 %v3769_v23 }
 0x317   :  { %3478 = vmatpush3.msra.mxu0 %v4586_v51  ;;  %3479 = vmatprep.mubr.msk.f32.mxu0 %vm3770_vm3, %v3769_v23 }
 0x318   :  { %3513 = vmatpush3.msra.mxu1 %v4591_v52  ;;  %3514 = vmatprep.mubr.msk.f32.mxu1 %vm3770_vm3, %v3769_v23 }
 0x319   :  { %3480 = vmatmul.mubr.f32.vlgmr.msra.gmra.mxu0 %v1660_v60  ;;  %3515 = vmatmul.mubr.f32.vlgmr.msra.gmra.mxu1 %v1660_v60 }
 0x31a   :  { %3536 = vmatprep.subr.mxu1 %v3769_v23  ;;  %3552 = vmatprep.mubr.msk.f32.mxu1 %vm3770_vm3, %v3769_v23 }
 0x31b   :  { %3537 = vmatpush3.msra.mxu1 %v1650_v61  ;;  %3517 = vmatprep.subr.mxu0 %v3769_v23  ;;  %v4781_v61 = vsel %vm1483_vm4, %v1967_v57, %v1963_v56 }
 0x31c   :  { %3538 = vmatprep.subr.mxu1 %v3769_v23  ;;  %3533 = vmatprep.mubr.msk.f32.mxu0 %vm3770_vm3, %v3769_v23 }
 0x31d   :  { %3539 = vmatpush3.msra.mxu1 %v1649_v62  ;;  %3518 = vmatpush3.msra.mxu0 %v2665_v5 }
 0x31e   :  { %3540 = vmatprep.subr.mxu1 %v3769_v23  ;;  %3519 = vmatprep.subr.mxu0 %v3769_v23 }
 0x31f   :  { %3541 = vmatpush3.msra.mxu1 %v1648_v63  ;;  %3520 = vmatpush3.msra.mxu0 %v2664_v6 }
 0x320   :  { %3542 = vmatprep.subr.mxu1 %v3769_v23  ;;  %3521 = vmatprep.subr.mxu0 %v3769_v23 }
 0x321   :  { %3543 = vmatpush3.msra.mxu1 %v1647_v0  ;;  %3522 = vmatpush3.msra.mxu0 %v2663_v7 }
 0x322   :  { %3544 = vmatprep.subr.mxu1 %v3769_v23  ;;  %3523 = vmatprep.subr.mxu0 %v3769_v23 }
 0x323   :  { %3545 = vmatpush3.msra.mxu1 %v1646_v1  ;;  %3524 = vmatpush3.msra.mxu0 %v2662_v8 }
 0x324   :  { %3546 = vmatprep.subr.mxu1 %v3769_v23  ;;  %3525 = vmatprep.subr.mxu0 %v3769_v23 }
 0x325   :  { %3547 = vmatpush3.msra.mxu1 %v1645_v2  ;;  %3526 = vmatpush3.msra.mxu0 %v2661_v9 }
 0x326   :  { %3548 = vmatprep.subr.mxu1 %v3769_v23  ;;  %3527 = vmatprep.subr.mxu0 %v3769_v23 }
 0x327   :  { %3549 = vmatpush3.msra.mxu1 %v1644_v3  ;;  %3528 = vmatpush3.msra.mxu0 %v2660_v10 }
 0x328   :  { %3550 = vmatprep.subr.mxu1 %v3769_v23  ;;  %3529 = vmatprep.subr.mxu0 %v3769_v23 }
 0x329   :  { %3551 = vmatpush3.msra.mxu1 %v1643_v4  ;;  %3530 = vmatpush3.msra.mxu0 %v2659_v11 }
 0x32a   :  { %3590 = vmatprep.subr.mxu1 %v3769_v23  ;;  %3531 = vmatprep.subr.mxu0 %v3769_v23 }
 0x32b   :  { %3532 = vmatpush3.msra.mxu0 %v2658_v12  ;;  %v2439_v12 = vld [vmem:[%s5006_s11 + $0x8] sm:$0xff] }
 0x32c   :  { %3555 = vmatprep.subr.mxu0 %v3769_v23 }
 0x3b8   :  { %v1552_v13 = vpop.f32.mrf.mxu0  ;;  %v1638_v38 = vpop.f32.mrf.mxu1 }
 0x3b9   :  { %v1642_v39 = vmax.f32 %v1552_v13, %v1638_v38  ;;  %v2438_v13 = vld [vmem:[%s5006_s11] sm:$0xff] }
 0x3ba   :  { %v3411_v14 = vpop.f32.mrf.mxu0  ;;  %v3446_v15 = vpop.f32.mrf.mxu1 }
 0x3bb   :  { %3553 = vmatmul.mubr.msk.f32.vlgmr.msra.gmra.mxu1 %vm1812_vm5, %v1642_v39  ;;  %v2686_v39 = vld [vmem:[%s5005_s10] ss:$0 sm:$0xff] }
 0x3bc   :  { %3591 = vmatpush3.msra.mxu1 %v4385_v19  ;;  %3622 = vmatprep.mubr.msk.f32.mxu1 %vm3770_vm3, %v3769_v23 }
 0x3bd   :  { %3592 = vmatprep.subr.mxu1 %v3769_v23 }
 0x3be   :  { %3593 = vmatpush3.msra.mxu1 %v4397_v21 }
 0x3bf   :  { %3594 = vmatprep.subr.mxu1 %v3769_v23 }
 0x3c0   :  { %3595 = vmatpush3.msra.mxu1 %v4409_v24 }
 0x3c1   :  { %3596 = vmatprep.subr.mxu1 %v3769_v23 }
 0x3c2   :  { %3597 = vmatpush3.msra.mxu1 %v4427_v26 }
 0x3c3   :  { %3598 = vmatprep.subr.mxu1 %v3769_v23 }
 0x3c4   :  { %3599 = vmatpush3.msra.mxu1 %v4441_v28 }
 0x3c5   :  { %3600 = vmatprep.subr.mxu1 %v3769_v23 }
 0x3c6   :  { %3601 = vmatpush3.msra.mxu1 %v4455_v30 }
 0x3c7   :  { %3602 = vmatprep.subr.mxu1 %v3769_v23 }
 0x3c8   :  { %3603 = vmatpush3.msra.mxu1 %v4469_v32 }
 0x3c9   :  { %3604 = vmatprep.subr.mxu1 %v3769_v23 }
 0x3ca   :  { %3605 = vmatpush3.msra.mxu1 %v4483_v34 }
 0x3cb   :  { %3606 = vmatprep.subr.mxu1 %v3769_v23 }
 0x3cc   :  { %3607 = vmatpush3.msra.mxu1 %v4497_v36 }
 0x3cd   :  { %3608 = vmatprep.subr.mxu1 %v3769_v23 }
 0x3ce   :  { %3609 = vmatpush3.msra.mxu1 %v4511_v40 }
 0x3cf   :  { %3610 = vmatprep.subr.mxu1 %v3769_v23 }
 0x3d0   :  { %3611 = vmatpush3.msra.mxu1 %v4525_v42 }
 0x3d1   :  { %3612 = vmatprep.subr.mxu1 %v3769_v23 }
 0x3d2   :  { %3613 = vmatpush3.msra.mxu1 %v4537_v44 }
 0x3d3   :  { %3614 = vmatprep.subr.mxu1 %v3769_v23 }
 0x3d4   :  { %3615 = vmatpush3.msra.mxu1 %v4549_v46 }
 0x3d5   :  { %3616 = vmatprep.subr.mxu1 %v3769_v23 }
 0x3d6   :  { %3617 = vmatpush3.msra.mxu1 %v4563_v48 }
 0x3d7   :  { %3618 = vmatprep.subr.mxu1 %v3769_v23 }
 0x3d8   :  { %3619 = vmatpush3.msra.mxu1 %v4577_v50 }
 0x3d9   :  { %v1728_v58 = vpop.f32.mrf.mxu0  ;;  %v1798_v59 = vpop.f32.mrf.mxu1  ;;  %3620 = vmatprep.subr.mxu1 %v3769_v23 }
 0x3da   :  { %v1802_v60 = vmax.f32 %v1728_v58, %v1798_v59  ;;  %3621 = vmatpush3.msra.mxu1 %v4591_v52 }
 0x3db   :  { %v3481_v62 = vpop.f32.mrf.mxu0  ;;  %v3516_v63 = vpop.f32.mrf.mxu1  ;;  %3623 = vmatmul.mubr.f32.vlgmr.msra.gmra.mxu1 %v4781_v61  ;;  %3644 = vmatprep.subr.mxu1 %v3769_v23 }
 0x3dc   :  { %3534 = vmatmul.mubr.msk.f32.vlgmr.msra.gmra.mxu0 %vm1812_vm5, %v1802_v60  ;;  %3645 = vmatpush3.msra.mxu1 %v4380_v18 }
 0x3dd   :  { %3556 = vmatpush3.msra.mxu0 %v4380_v18  ;;  %3646 = vmatprep.subr.mxu1 %v3769_v23  ;;  %v2195_v18 = vld [vmem:[#allocation5 + $0xe] sm:$0x1] }
 0x3de   :  { %3557 = vmatprep.subr.mxu0 %v3769_v23  ;;  %3647 = vmatpush3.msra.mxu1 %v4390_v20 }
 0x3df   :  { %3558 = vmatpush3.msra.mxu0 %v4390_v20  ;;  %3648 = vmatprep.subr.mxu1 %v3769_v23  ;;  %v2197_v20 = vld [vmem:[#allocation5 + $0xf] sm:$0x1] }
 0x3e0   :  { %3559 = vmatprep.subr.mxu0 %v3769_v23  ;;  %3649 = vmatpush3.msra.mxu1 %v4404_v22 }
 0x3e1   :  { %3560 = vmatpush3.msra.mxu0 %v4404_v22  ;;  %3650 = vmatprep.subr.mxu1 %v3769_v23  ;;  %v2199_v22 = vmax.f32 %v2195_v18, %v2197_v20 }
 0x3e2   :  { %3561 = vmatprep.subr.mxu0 %v3769_v23  ;;  %3651 = vmatpush3.msra.mxu1 %v4422_v25 }
 0x3e3   :  { %3562 = vmatpush3.msra.mxu0 %v4422_v25  ;;  %3652 = vmatprep.subr.mxu1 %v3769_v23  ;;  %v2194_v25 = vld [vmem:[#allocation5 + $0x6] sm:$0x1] }
 0x3e4   :  { %3563 = vmatprep.subr.mxu0 %v3769_v23  ;;  %3653 = vmatpush3.msra.mxu1 %v4436_v27 }
 0x3e5   :  { %3564 = vmatpush3.msra.mxu0 %v4436_v27  ;;  %3654 = vmatprep.subr.mxu1 %v3769_v23  ;;  %v2196_v27 = vld [vmem:[#allocation5 + $0x7] sm:$0x1] }
 0x3e6   :  { %3565 = vmatprep.subr.mxu0 %v3769_v23  ;;  %3655 = vmatpush3.msra.mxu1 %v4450_v29 }
 0x3e7   :  { %3566 = vmatpush3.msra.mxu0 %v4450_v29  ;;  %3656 = vmatprep.subr.mxu1 %v3769_v23  ;;  %v2198_v29 = vmax.f32 %v2194_v25, %v2196_v27 }
 0x3e8   :  { %3567 = vmatprep.subr.mxu0 %v3769_v23  ;;  %3657 = vmatpush3.msra.mxu1 %v4464_v31 }
 0x3e9   :  { %3568 = vmatpush3.msra.mxu0 %v4464_v31  ;;  %3658 = vmatprep.subr.mxu1 %v3769_v23  ;;  %v2202_v31 = vrot.slane %v2199_v22, 7 }
 0x3ea   :  { %3569 = vmatprep.subr.mxu0 %v3769_v23  ;;  %3659 = vmatpush3.msra.mxu1 %v4478_v33 }
 0x3eb   :  { %3570 = vmatpush3.msra.mxu0 %v4478_v33  ;;  %3660 = vmatprep.subr.mxu1 %v3769_v23  ;;  %v4854_v33 = vsel %vm1483_vm4, %v2202_v31, %v2198_v29 }
 0x3ec   :  { %3571 = vmatprep.subr.mxu0 %v3769_v23  ;;  %3661 = vmatpush3.msra.mxu1 %v4492_v35 }
 0x3ed   :  { %3572 = vmatpush3.msra.mxu0 %v4492_v35  ;;  %3662 = vmatprep.subr.mxu1 %v3769_v23  ;;  %v2675_v35 = vld [vmem:[%s5004_s9 + $0xb8] sm:$0xff] }
 0x3ee   :  { %3573 = vmatprep.subr.mxu0 %v3769_v23  ;;  %3663 = vmatpush3.msra.mxu1 %v4506_v37 }
 0x3ef   :  { %3574 = vmatpush3.msra.mxu0 %v4506_v37  ;;  %3664 = vmatprep.subr.mxu1 %v3769_v23  ;;  %v2674_v37 = vld [vmem:[%s5004_s9 + $0xb0] sm:$0xff] }
 0x3f0   :  { %3575 = vmatprep.subr.mxu0 %v3769_v23  ;;  %3665 = vmatpush3.msra.mxu1 %v4520_v41 }
 0x3f1   :  { %3576 = vmatpush3.msra.mxu0 %v4520_v41  ;;  %3666 = vmatprep.subr.mxu1 %v3769_v23  ;;  %v2673_v41 = vld [vmem:[%s5004_s9 + $0xa8] sm:$0xff] }
 0x3f2   :  { %3577 = vmatprep.subr.mxu0 %v3769_v23  ;;  %3667 = vmatpush3.msra.mxu1 %v4530_v43 }
 0x3f3   :  { %3578 = vmatpush3.msra.mxu0 %v4530_v43  ;;  %3668 = vmatprep.subr.mxu1 %v3769_v23  ;;  %v2672_v43 = vld [vmem:[%s5004_s9 + $0xa0] sm:$0xff] }
 0x3f4   :  { %3579 = vmatprep.subr.mxu0 %v3769_v23  ;;  %3669 = vmatpush3.msra.mxu1 %v4544_v45 }
 0x3f5   :  { %3580 = vmatpush3.msra.mxu0 %v4544_v45  ;;  %3670 = vmatprep.subr.mxu1 %v3769_v23  ;;  %v2671_v45 = vld [vmem:[%s5004_s9 + $0x98] sm:$0xff] }
 0x3f6   :  { %3581 = vmatprep.subr.mxu0 %v3769_v23  ;;  %3671 = vmatpush3.msra.mxu1 %v4558_v47 }
 0x3f7   :  { %3582 = vmatpush3.msra.mxu0 %v4558_v47  ;;  %3672 = vmatprep.subr.mxu1 %v3769_v23  ;;  %v2670_v47 = vld [vmem:[%s5004_s9 + $0x90] sm:$0xff] }
 0x3f8   :  { %3583 = vmatprep.subr.mxu0 %v3769_v23  ;;  %3673 = vmatpush3.msra.mxu1 %v4572_v49 }
 0x3f9   :  { %3584 = vmatpush3.msra.mxu0 %v4572_v49  ;;  %3587 = vmatprep.mubr.msk.f32.mxu0 %vm3770_vm3, %v3769_v23  ;;  %v2669_v49 = vld [vmem:[%s5004_s9 + $0x88] sm:$0xff] }
 0x3fa   :  { %3585 = vmatprep.subr.mxu0 %v3769_v23  ;;  %3674 = vmatprep.subr.mxu1 %v3769_v23 }
 0x3fb   :  { %3586 = vmatpush3.msra.mxu0 %v4586_v51  ;;  %3675 = vmatpush3.msra.mxu1 %v4586_v51  ;;  %v2668_v51 = vld [vmem:[%s5004_s9 + $0x80] sm:$0xff] }
 0x3fc   :  { %3588 = vmatmul.mubr.f32.vlgmr.msra.gmra.mxu0 %v4781_v61  ;;  %3676 = vmatprep.mubr.msk.f32.mxu1 %vm3770_vm3, %v3769_v23 }
 0x3fd   :  { %3677 = vmatmul.mubr.f32.vlgmr.msra.gmra.mxu1 %v4854_v33  ;;  %3625 = vmatprep.subr.mxu0 %v3769_v23 }
 0x3fe   :  { %3641 = vmatprep.mubr.msk.f32.mxu0 %vm3770_vm3, %v3769_v23  ;;  %3714 = vmatprep.subr.mxu1 %v3769_v23 }
 0x3ff   :  { %3730 = vmatprep.mubr.msk.f32.mxu1 %vm3770_vm3, %v3769_v23  ;;  %3626 = vmatpush3.msra.mxu0 %v2675_v35 }
 0x400   :  { %3627 = vmatprep.subr.mxu0 %v3769_v23 }
 0x401   :  { %3628 = vmatpush3.msra.mxu0 %v2674_v37 }
 0x402   :  { %3629 = vmatprep.subr.mxu0 %v3769_v23 }
 0x403   :  { %3630 = vmatpush3.msra.mxu0 %v2673_v41 }
 0x404   :  { %3631 = vmatprep.subr.mxu0 %v3769_v23 }
 0x405   :  { %3632 = vmatpush3.msra.mxu0 %v2672_v43 }
 0x406   :  { %3633 = vmatprep.subr.mxu0 %v3769_v23 }
 0x407   :  { %3634 = vmatpush3.msra.mxu0 %v2671_v45 }
 0x408   :  { %3635 = vmatprep.subr.mxu0 %v3769_v23 }
 0x409   :  { %3636 = vmatpush3.msra.mxu0 %v2670_v47 }
 0x40a   :  { %3637 = vmatprep.subr.mxu0 %v3769_v23 }
 0x40b   :  { %3638 = vmatpush3.msra.mxu0 %v2669_v49 }
 0x40c   :  { %3639 = vmatprep.subr.mxu0 %v3769_v23 }
 0x40d   :  { %3640 = vmatpush3.msra.mxu0 %v2668_v51 }
 0x40e   :  { %3679 = vmatprep.subr.mxu0 %v3769_v23 }
 0x47b   :  { %v1955_v0 = vpop.f32.mrf.mxu1 }
 0x47d   :  { %v3554_v1 = vpop.f32.mrf.mxu1 }
 0x49b   :  { %v2106_v2 = vpop.f32.mrf.mxu1 }
 0x49c   :  { %v1882_v3 = vpop.f32.mrf.mxu0 }
 0x49d   :  { %v4895_v4 = vadd.f32 %v1955_v0, %v1882_v3  ;;  %v3624_v5 = vpop.f32.mrf.mxu1 }
 0x49e   :  { %v3535_v6 = vpop.f32.mrf.mxu0 }
 0x4bc   :  { %v2036_v7 = vpop.f32.mrf.mxu0 }
 0x4bd   :  { %v2110_v8 = vmax.f32 %v2036_v7, %v2106_v2  ;;  %v4897_v9 = vpop.f32.mrf.mxu1 }
 0x4be   :  { %v3589_v10 = vpop.f32.mrf.mxu0 }
 0x4bf   :  { %3642 = vmatmul.mubr.msk.f32.vlgmr.msra.gmra.mxu0 %vm1812_vm5, %v2110_v8  ;;  %v3678_v11 = vpop.f32.mrf.mxu1 }
 0x4c0   :  { %3680 = vmatpush3.msra.mxu0 %v4385_v19  ;;  %3711 = vmatprep.mubr.msk.f32.mxu0 %vm3770_vm3, %v3769_v23  ;;  %v2684_v19 = vld [vmem:[%s5004_s9 + $0xf8] sm:$0xff] }
 0x4c1   :  { %3681 = vmatprep.subr.mxu0 %v3769_v23  ;;  %3715 = vmatpush3.msra.mxu1 %v2684_v19 }
 0x4c2   :  { %3682 = vmatpush3.msra.mxu0 %v4397_v21  ;;  %v2683_v21 = vld [vmem:[%s5004_s9 + $0xf0] sm:$0xff]  ;;  %3716 = vmatprep.subr.mxu1 %v3769_v23 }
 0x4c3   :  { %3683 = vmatprep.subr.mxu0 %v3769_v23  ;;  %3717 = vmatpush3.msra.mxu1 %v2683_v21 }
 0x4c4   :  { %3684 = vmatpush3.msra.mxu0 %v4409_v24  ;;  %v2682_v24 = vld [vmem:[%s5004_s9 + $0xe8] sm:$0xff]  ;;  %3718 = vmatprep.subr.mxu1 %v3769_v23 }
 0x4c5   :  { %3685 = vmatprep.subr.mxu0 %v3769_v23  ;;  %3719 = vmatpush3.msra.mxu1 %v2682_v24 }
 0x4c6   :  { %3686 = vmatpush3.msra.mxu0 %v4427_v26  ;;  %v2681_v26 = vld [vmem:[%s5004_s9 + $0xe0] sm:$0xff]  ;;  %3720 = vmatprep.subr.mxu1 %v3769_v23 }
 0x4c7   :  { %3687 = vmatprep.subr.mxu0 %v3769_v23  ;;  %3721 = vmatpush3.msra.mxu1 %v2681_v26 }
 0x4c8   :  { %3688 = vmatpush3.msra.mxu0 %v4441_v28  ;;  %v2680_v28 = vld [vmem:[%s5004_s9 + $0xd8] sm:$0xff]  ;;  %3722 = vmatprep.subr.mxu1 %v3769_v23 }
 0x4c9   :  { %3689 = vmatprep.subr.mxu0 %v3769_v23  ;;  %3723 = vmatpush3.msra.mxu1 %v2680_v28 }
 0x4ca   :  { %3690 = vmatpush3.msra.mxu0 %v4455_v30  ;;  %v2679_v30 = vld [vmem:[%s5004_s9 + $0xd0] sm:$0xff]  ;;  %3724 = vmatprep.subr.mxu1 %v3769_v23 }
 0x4cb   :  { %3691 = vmatprep.subr.mxu0 %v3769_v23  ;;  %3725 = vmatpush3.msra.mxu1 %v2679_v30 }
 0x4cc   :  { %3692 = vmatpush3.msra.mxu0 %v4469_v32  ;;  %3726 = vmatprep.subr.mxu1 %v3769_v23  ;;  %v2678_v32 = vld [vmem:[%s5004_s9 + $0xc8] sm:$0xff] }
 0x4cd   :  { %3693 = vmatprep.subr.mxu0 %v3769_v23  ;;  %3727 = vmatpush3.msra.mxu1 %v2678_v32 }
 0x4ce   :  { %3694 = vmatpush3.msra.mxu0 %v4483_v34  ;;  %3728 = vmatprep.subr.mxu1 %v3769_v23  ;;  %v2677_v34 = vld [vmem:[%s5004_s9 + $0xc0] sm:$0xff] }
 0x4cf   :  { %3695 = vmatprep.subr.mxu0 %v3769_v23  ;;  %3729 = vmatpush3.msra.mxu1 %v2677_v34 }
 0x4d0   :  { %3696 = vmatpush3.msra.mxu0 %v4497_v36 }
 0x4d1   :  { %3697 = vmatprep.subr.mxu0 %v3769_v23 }
 0x4d2   :  { %3698 = vmatpush3.msra.mxu0 %v4511_v40 }
 0x4d3   :  { %3699 = vmatprep.subr.mxu0 %v3769_v23 }
 0x4d4   :  { %3700 = vmatpush3.msra.mxu0 %v4525_v42 }
 0x4d5   :  { %3701 = vmatprep.subr.mxu0 %v3769_v23 }
 0x4d6   :  { %3702 = vmatpush3.msra.mxu0 %v4537_v44 }
 0x4d7   :  { %3703 = vmatprep.subr.mxu0 %v3769_v23 }
 0x4d8   :  { %3704 = vmatpush3.msra.mxu0 %v4549_v46 }
 0x4d9   :  { %3705 = vmatprep.subr.mxu0 %v3769_v23 }
 0x4da   :  { %3706 = vmatpush3.msra.mxu0 %v4563_v48 }
 0x4db   :  { %3707 = vmatprep.subr.mxu0 %v3769_v23 }
 0x4dc   :  { %3708 = vmatpush3.msra.mxu0 %v4577_v50  ;;  %v2441_v50 = vld [vmem:[%s5006_s11 + $0x18] sm:$0xff] }
 0x4dd   :  { %3709 = vmatprep.subr.mxu0 %v3769_v23 }
 0x4de   :  { %3710 = vmatpush3.msra.mxu0 %v4591_v52  ;;  %v2440_v52 = vld [vmem:[%s5006_s11 + $0x10] sm:$0xff]  ;;  %s2530_s11 = sshll.u32 %s3771_s2, 4  ;;  %s2531_s11 = int_to_ptr.vmem [resolvable:$true] %s2530_s11 }
 0x4df   :  { %3712 = vmatmul.mubr.f32.vlgmr.msra.gmra.mxu0 %v4854_v33  ;;  %3733 = vmatprep.subr.mxu0 %v3769_v23  ;;  %s3747_s7 = scalar_lea.vmem %s2531_s11, 32  ;;  %p3752_p1 = scmp.lt.s32.totalorder %s2531_s11, %s2531_s11 }
 0x4e0   :  { %3741 = vmatprep.mubr.msk.f32.mxu0 %vm3770_vm3, %v3769_v23  ;;  %3734 = vmatpush3.msra.mxu0 %v2441_v50  ;;  %p3748_p0 = scmp.ne.s32.totalorder %s2531_s11, %s3747_s7  ;;  %p3753_p2 = scmp.lt.s32.totalorder %s3747_s7, %s3747_s7 }
 0x4e1   :  { %3735 = vmatprep.subr.mxu0 %v3769_v23 }
 0x4e2   :  { %3736 = vmatpush3.msra.mxu0 %v2440_v52  ;;  %p3754_p3 = por %p3753_p2, %p3752_p1 }
 0x4e3   :  { %3737 = vmatprep.subr.mxu0 %v3769_v23 }
 0x4e4   :  { %3738 = vmatpush3.msra.mxu0 %v2439_v12  ;;  %p3755_p4 = pnand %p3754_p3, %p3748_p0 }
 0x4e5   :  { %3739 = vmatprep.subr.mxu0 %v3769_v23 }
 0x4e6   :  { %3740 = vmatpush3.msra.mxu0 %v2438_v13 }
 0x57f   :  { %v2189_v36 = vpop.f32.mrf.mxu0 }
 0x580   :  { %v2193_v40 = vadd.f32 %v2189_v36, %v4895_v4 }
 0x581   :  { %v3643_v42 = vpop.f32.mrf.mxu0 }
 0x59f   :  { %v2341_v44 = vpop.f32.mrf.mxu0 }
 0x5a0   :  { %v2345_v46 = vmax.f32 %v4897_v9, %v2341_v44 }
 0x5a1   :  { %v3713_v48 = vpop.f32.mrf.mxu0 }
 0x5a2   :  { %3731 = vmatmul.mubr.msk.f32.vlgmr.msra.gmra.mxu1 %vm1812_vm5, %v2345_v46 }
 0x662   :  { %v2424_v38 = vpop.f32.mrf.mxu1 }
 0x663   :  { %v2428_v14 = vadd.f32 %v2424_v38, %v2193_v40 }
 0x664   :  { %v3732_v15 = vpop.f32.mrf.mxu1 }
 0x665   :  { %v2436_v16 = vadd.f32 %v2686_v39, %v2428_v14 }
 0x667   :  { %v2437_v17 = vmax.f32 %v2436_v16, 0.0 }
 0x669   :  { %3742 = vmatmul.mubr.msk.f32.vlgmr.msra.gmra.mxu0 %vm2449_vm6, %v2437_v17 }
 0x729   :  { %v2519_v54 = vpop.f32.mrf.mxu0 }
 0x72a   :  { %v2520_v23 = vadd.f32 %v2687_v53, %v2519_v54 }
 0x72b   :  { %v3743_v55 = vpop.f32.mrf.mxu0 }
 0x72c   :  { %2523 = vst [vmem:[#allocation6] sm:$0x3] %v2520_v23 }
 0x72d   :  { %3758 = shalt.err (!%p3755_p4)
}
 0x72e   :  { %2533 = dma.vmem_to_hbm [thread:$0]  %s2531_s11, 32, %s5008_s13, [#allocation7]  }
 0x72f   :  { %3767 = dma.done.wait [#allocation7], 32  }
 0x730   :  { %3768 = vsyncadd [#allocation7], 4294967264 }
 0x731   :  { %2537 = vsyncpa [#allocation7], 1 }

</bundles_post_ra>
